<compile_context>
chip_gen: v7x
topology: tpu7x:2x2x1
jax: 0.10.0
libtpu: 0.0.40
codegen_flags: <defaults>
</compile_context>

<pallas_src>
import math
import functools

import jax
import jax.numpy as jnp
from jax import lax
from jax.experimental import pallas as pl
from jax.experimental.pallas import tpu as pltpu


# ------------------------------ fused kernel ------------------------------

def _autoencoder_kernel(
    # inputs (time-major flattened, batch padded to B sublanes)
    pre_lab_ref, pre_time_ref, suf_lab_ref, suf_time_ref,
    # encoder weights: augmented embedding table, fused [W_ih; W_hh], bias
    enc_tab_ref, enc_w_ref, enc_b_ref,
    # decoder weights
    dec_tab_ref, dec_w_ref, dec_b_ref,
    # fused, lane-dense readout
    w_out_ref, b_out_ref,
    # output slab
    out_ref,
    # scratch
    enc_g0, dec_g0, h_st, c_st,
    *, B, H, L, V, Tp, Ts):
    """B is the padded batch (multiple of 8).  Everything lives in VMEM."""
    f32 = jnp.float32
    bf16 = jnp.bfloat16

    # ---- embedding + hoisted layer-0 input projection (one GEMM each) ----
    def embed_project(lab_ref, time_ref, tab_ref, w_ref, b_ref, g0_buf, T):
        n = T * B
        lab = lab_ref[...]                                       # (n, 1) int32
        tm = time_ref[...]                                       # (n, 1) f32
        col = lax.broadcasted_iota(jnp.int32, (n, V + 2), 1)
        aug = ((col == lab).astype(f32)                          # label one-hot
               + jnp.where(col == V, tm, 0.0)                    # time column
               + (col == V + 1).astype(f32))                     # bias column
        # exact gather + time fold + sqrt(H) scale, all in one f32 GEMM
        x = jnp.dot(aug, tab_ref[...], preferred_element_type=f32)          # (n, H)
        # hoisted layer-0 input projection (bias folded in here)
        g0_buf[...] = (jnp.dot(x.astype(bf16), w_ref[0, 0:H, :],
                               preferred_element_type=f32) + b_ref[0])

    # Decoder GEMMs issued before the encoder recurrence: independent work the
    # scheduler can overlap with the latency-bound recurrence below.
    embed_project(pre_lab_ref, pre_time_ref, enc_tab_ref, enc_w_ref, enc_b_ref,
                  enc_g0, Tp)
    embed_project(suf_lab_ref, suf_time_ref, dec_tab_ref, dec_w_ref, dec_b_ref,
                  dec_g0, Ts)

    # ---- wavefront-scheduled LSTM stack ----
    def run_stack(g0_buf, w_ref, b_ref, T, zero_init, emit_out):
        # hoist per-layer weights / biases (loaded once, reused by every cell)
        whh0 = w_ref[0, H:2 * H, :]                              # (H, 4H) bf16
        wcat = [None] + [w_ref[l] for l in range(1, L)]          # (2H, 4H) bf16
        bias = [None] + [b_ref[l] for l in range(1, L)]          # (1, 4H)  f32
        if emit_out:
            w_out = w_out_ref[...]                               # (H, 128) bf16
            b_out = b_out_ref[...]                               # (1, 128) f32

        if zero_init:                      # encoder: zero init_hidden
            for l in range(L):
                h_st[l] = jnp.zeros((B, H), f32)
                c_st[l] = jnp.zeros((B, H), f32)
        # else: h_st / c_st already hold the encoder's final (h_n, c_n) per layer.

        # Wavefront: at step s, layer l processes time t = s - l, so all L chains
        # are in flight at once.  Decreasing-l order lets layer l read layer l-1's
        # time-t output (written at step s-1) straight out of h_st[l-1].
        for s in range(T + L - 1):
            for l in range(min(L - 1, s), max(0, s - T + 1) - 1, -1):
                t = s - l
                h_prev = h_st[l]
                c_prev = c_st[l]
                if l == 0:
                    g = g0_buf[t * B:(t + 1) * B, :] + jnp.dot(
                        h_prev.astype(bf16), whh0, preferred_element_type=f32)
                else:
                    # fused [x ; h] @ [W_ih ; W_hh]: one MXU push per cell
                    xh = jnp.concatenate([h_st[l - 1], h_prev], axis=1)
                    g = jnp.dot(xh.astype(bf16), wcat[l],
                                preferred_element_type=f32) + bias[l]
                # full-width transcendentals (2 EUP passes), then slice i/f/g/o
                sg = jax.nn.sigmoid(g)
                th = jnp.tanh(g)
                c = sg[:, H:2 * H] * c_prev + sg[:, 0:H] * th[:, 2 * H:3 * H]
                h = sg[:, 3 * H:4 * H] * jnp.tanh(c)
                c_st[l] = c
                h_st[l] = h
                if emit_out and l == L - 1:
                    # per-step fused readout: lane-dense (B, 128) block store
                    out_ref[t * B:(t + 1) * B, :] = (
                        jnp.dot(h.astype(bf16), w_out,
                                preferred_element_type=f32) + b_out)

    # encoder: leaves final (h_n, c_n) in h_st / c_st
    run_stack(enc_g0, enc_w_ref, enc_b_ref, Tp, zero_init=True, emit_out=False)
    # decoder: init_hidden = encoder final states, emits readout per step
    run_stack(dec_g0, dec_w_ref, dec_b_ref, Ts, zero_init=False, emit_out=True)


# ------------------------------ wrapper ------------------------------

def sequential_autoencoder_forward(params, prefix, suffix):
    p_lab, p_time = prefix            # (B, Tp, 1) int, (B, Tp, 1) float
    s_lab, s_time = suffix            # (B, Ts, 1) int, (B, Ts, 1) float
    B, Tp = p_lab.shape[0], p_lab.shape[1]
    Ts = s_lab.shape[1]
    H = params["hidden_size"]
    L = params["enc_wih"].shape[0]
    V = params["enc_emb"].shape[0]
    Vout = params["w_act_out"].shape[1]
    B_pad = ((max(B, 8) + 7) // 8) * 8
    OUT_PAD = 128                     # lane-dense output slab width
    sqrt_h = math.sqrt(H)

    def prep(lab, tm, T):
        # batch-first (B,T,1) -> time-major flat (T*B_pad, 1), batch zero-padded
        lab2 = jnp.swapaxes(lab.reshape(B, T), 0, 1)
        tm2 = jnp.swapaxes(tm.reshape(B, T), 0, 1)
        lab2 = jnp.pad(lab2, ((0, 0), (0, B_pad - B)))
        tm2 = jnp.pad(tm2, ((0, 0), (0, B_pad - B)))
        return (lab2.reshape(T * B_pad, 1).astype(jnp.int32),
                tm2.reshape(T * B_pad, 1).astype(jnp.float32))

    pre_lab, pre_time = prep(p_lab, p_time, Tp)
    suf_lab, suf_time = prep(s_lab, s_time, Ts)

    def fold_stack(emb, tw, tb, wih, whh):
        # augmented, pre-scaled embedding table: [emb; tw; tb] * sqrt(H)
        tab = (jnp.concatenate([emb, tw, tb], axis=0) * sqrt_h).astype(jnp.float32)
        # fused per-layer [W_ih; W_hh], bf16 MXU operands
        wcat = jnp.concatenate([wih, whh], axis=1).astype(jnp.bfloat16)   # (L,2H,4H)
        return tab, wcat

    enc_tab, enc_w = fold_stack(params["enc_emb"], params["enc_tw"], params["enc_tb"],
                                params["enc_wih"], params["enc_whh"])
    dec_tab, dec_w = fold_stack(params["dec_emb"], params["dec_tw"], params["dec_tb"],
                                params["dec_wih"], params["dec_whh"])
    enc_b = params["enc_b"].astype(jnp.float32)
    dec_b = params["dec_b"].astype(jnp.float32)

    # fold both readout linears into one lane-dense (H, 128) bf16 weight
    w_out = jnp.concatenate([params["w_act_out"], params["w_time_out"]], axis=1)
    w_out = jnp.pad(w_out, ((0, 0), (0, OUT_PAD - (Vout + 1)))).astype(jnp.bfloat16)
    b_out = jnp.concatenate([params["b_act_out"], params["b_time_out"]], axis=0)
    b_out = jnp.pad(b_out, (0, OUT_PAD - (Vout + 1))).reshape(1, OUT_PAD)
    b_out = b_out.astype(jnp.float32)

    # resident VMEM footprint -> explicit scoped-VMEM limit
    operands = (pre_lab, pre_time, suf_lab, suf_time,
                enc_tab, enc_w, enc_b, dec_tab, dec_w, dec_b, w_out, b_out)
    resident = sum(int(a.size) * a.dtype.itemsize for a in operands)
    resident += Ts * B_pad * OUT_PAD * 4                  # output slab
    resident += (Tp + Ts) * B_pad * 4 * H * 4             # layer-0 gate buffers
    resident += 2 * L * B_pad * H * 4                     # h / c state
    vmem_limit = int(min(max(2 * resident + (8 << 20), 32 << 20), 64 << 20))

    slab = pl.pallas_call(
        functools.partial(_autoencoder_kernel, B=B_pad, H=H, L=L, V=V, Tp=Tp, Ts=Ts),
        out_shape=jax.ShapeDtypeStruct((Ts * B_pad, OUT_PAD), jnp.float32),
        scratch_shapes=[
            pltpu.VMEM((Tp * B_pad, 4 * H), jnp.float32),  # encoder layer-0 gates
            pltpu.VMEM((Ts * B_pad, 4 * H), jnp.float32),  # decoder layer-0 gates
            pltpu.VMEM((L, B_pad, H), jnp.float32),        # h per layer
            pltpu.VMEM((L, B_pad, H), jnp.float32),        # c per layer
        ],
        compiler_params=pltpu.CompilerParams(vmem_limit_bytes=vmem_limit),
    )(pre_lab, pre_time, suf_lab, suf_time,
      enc_tab, enc_w, enc_b, dec_tab, dec_w, dec_b, w_out, b_out)

    out = jnp.swapaxes(slab.reshape(Ts, B_pad, OUT_PAD), 0, 1)[:B]    # (B, Ts, 128)
    act_logits = out[:, :, :Vout]                                     # (B, Ts, V)
    time_pred = out[:, :, Vout:Vout + 1]                              # (B, Ts, 1)
    return act_logits, time_pred


# ------------------------------ pure-JAX reference ------------------------------

def reference_forward(params, prefix, suffix, mxu_dtype=jnp.float32):
    """Exact module semantics.  mxu_dtype=bf16 emulates the kernel's MXU operand
    precision (weights/activations rounded to bf16, accumulation in f32)."""
    H = params["hidden_size"]
    sqrtd = math.sqrt(H)
    cast = lambda a: a.astype(mxu_dtype).astype(jnp.float32)

    def embed(lab, tm, emb_w, tw, tb):
        e = emb_w[lab[..., 0]]                       # nn.Embedding(...).squeeze(2)
        t = tm * tw + tb                             # nn.Linear(1, H) (single product)
        return (e + t) * sqrtd                       # dropout(p=0) is identity

    def run_lstm(x, wih, whh, b, h0, c0):
        Lc = wih.shape[0]
        wih_c, whh_c = cast(wih), cast(whh)
        hs, cs = [], []
        for l in range(Lc):
            def step(carry, x_t, l=l):
                h, c = carry
                g = cast(x_t) @ wih_c[l] + cast(h) @ whh_c[l] + b[l][0]
                i = jax.nn.sigmoid(g[:, :H])
                f = jax.nn.sigmoid(g[:, H:2 * H])
                gg = jnp.tanh(g[:, 2 * H:3 * H])
                o = jax.nn.sigmoid(g[:, 3 * H:])
                c = f * c + i * gg
                h = o * jnp.tanh(c)
                return (h, c), h
            (hf, cf), ys = lax.scan(step, (h0[l], c0[l]), jnp.transpose(x, (1, 0, 2)))
            x = jnp.transpose(ys, (1, 0, 2))
            hs.append(hf)
            cs.append(cf)
        return x, (jnp.stack(hs), jnp.stack(cs))

    p_lab, p_time = prefix
    s_lab, s_time = suffix
    B = p_lab.shape[0]
    L = params["enc_wih"].shape[0]

    enc_x = embed(p_lab, p_time, params["enc_emb"], params["enc_tw"], params["enc_tb"])
    z = jnp.zeros((L, B, H), jnp.float32)
    _, (hn, cn) = run_lstm(enc_x, params["enc_wih"], params["enc_whh"], params["enc_b"], z, z)

    dec_x = embed(s_lab, s_time, params["dec_emb"], params["dec_tw"], params["dec_tb"])
    dec_out, _ = run_lstm(dec_x, params["dec_wih"], params["dec_whh"], params["dec_b"], hn, cn)

    act = cast(dec_out) @ cast(params["w_act_out"]) + params["b_act_out"]
    tim = cast(dec_out) @ cast(params["w_time_out"]) + params["b_time_out"]
    return act, tim


# ------------------------------ main ------------------------------

if __name__ == "__main__":
    B, T, H, L = 2, 8, 32, 2                      # batch, seq len, hidden_size, num_layers
    vocab_size, nb_special_tokens = 12, 4
    V = vocab_size + nb_special_tokens            # self.vocab_size in the module
    pad_token = 0

    key = jax.random.PRNGKey(0)
    ks = iter(jax.random.split(key, 40))

    def u(shape, fan_in):
        bound = 1.0 / math.sqrt(fan_in)
        return jax.random.uniform(next(ks), shape, jnp.float32, -bound, bound)

    def emb_table():
        w = jax.random.normal(next(ks), (V, H), jnp.float32) * 0.3
        return w.at[pad_token].set(0.0)           # padding_idx row is zero

    def lstm_stack():
        wih, whh, b = [], [], []
        for _ in range(L):
            wih.append(u((H, 4 * H), H))          # W_ih^T
            whh.append(u((H, 4 * H), H))          # W_hh^T
            b.append(u((1, 4 * H), H) + u((1, 4 * H), H))   # b_ih + b_hh
        return jnp.stack(wih), jnp.stack(whh), jnp.stack(b)

    params = {"hidden_size": H}
    params["enc_emb"] = emb_table()
    params["enc_tw"] = u((1, H), 1)
    params["enc_tb"] = u((1, H), 1)
    params["enc_wih"], params["enc_whh"], params["enc_b"] = lstm_stack()
    params["dec_emb"] = emb_table()
    params["dec_tw"] = u((1, H), 1)
    params["dec_tb"] = u((1, H), 1)
    params["dec_wih"], params["dec_whh"], params["dec_b"] = lstm_stack()
    params["w_act_out"] = u((H, V), H)            # Readout.activity_label: Linear(H, V)
    params["b_act_out"] = u((V,), H)
    params["w_time_out"] = u((H, 1), H)           # Readout.time_attribute: Linear(H, 1)
    params["b_time_out"] = u((1,), H)

    kp1, kp2, kq1, kq2 = jax.random.split(next(ks), 4)
    p_lab = jax.random.randint(kp1, (B, T, 1), 0, V, dtype=jnp.int32)
    p_time = jax.random.uniform(kp2, (B, T, 1), dtype=jnp.float32)
    s_lab = jax.random.randint(kq1, (B, T, 1), 0, V, dtype=jnp.int32)
    s_time = jax.random.uniform(kq2, (B, T, 1), dtype=jnp.float32)

    act, tim = sequential_autoencoder_forward(params, (p_lab, p_time), (s_lab, s_time))
    act = jax.block_until_ready(act)
    tim = jax.block_until_ready(tim)

    assert act.shape == (B, T, V), act.shape
    assert tim.shape == (B, T, 1), tim.shape

    # Tight check against a reference with matched bf16-MXU-operand numerics.
    ref_act_m, ref_tim_m = reference_forward(params, (p_lab, p_time), (s_lab, s_time),
                                             mxu_dtype=jnp.bfloat16)
    err_am = float(jnp.max(jnp.abs(act - ref_act_m)))
    err_tm = float(jnp.max(jnp.abs(tim - ref_tim_m)))
    assert err_am < 5e-3 and err_tm < 5e-3, (err_am, err_tm)

    # Loose sanity check against exact f32 module semantics (bf16 operand tolerance).
    ref_act_f, ref_tim_f = reference_forward(params, (p_lab, p_time), (s_lab, s_time))
    err_af = float(jnp.max(jnp.abs(act - ref_act_f)))
    err_tf = float(jnp.max(jnp.abs(tim - ref_tim_f)))
    assert err_af < 1e-1 and err_tf < 1e-1, (err_af, err_tf)

    # TODO(synk): nn.Dropout is identity here (p=0.0 / eval); stochastic training-mode
    # dropout could be added with pltpu.prng_seed / pltpu.stateful_bernoulli.
    print("KERNEL_OK")
</pallas_src>

<mosaic_0001>
module attributes {stable_mosaic.version = 11 : i64} {
  func.func @_autoencoder_kernel(%arg0: memref<64x1xi32, #tpu.memory_space<vmem>>, %arg1: memref<64x1xf32, #tpu.memory_space<vmem>>, %arg2: memref<64x1xi32, #tpu.memory_space<vmem>>, %arg3: memref<64x1xf32, #tpu.memory_space<vmem>>, %arg4: memref<18x32xf32, #tpu.memory_space<vmem>>, %arg5: memref<2x64x128xbf16, #tpu.memory_space<vmem>>, %arg6: memref<2x1x128xf32, #tpu.memory_space<vmem>>, %arg7: memref<18x32xf32, #tpu.memory_space<vmem>>, %arg8: memref<2x64x128xbf16, #tpu.memory_space<vmem>>, %arg9: memref<2x1x128xf32, #tpu.memory_space<vmem>>, %arg10: memref<32x128xbf16, #tpu.memory_space<vmem>>, %arg11: memref<1x128xf32, #tpu.memory_space<vmem>>, %arg12: memref<64x128xf32, #tpu.memory_space<vmem>>, %arg13: memref<64x128xf32, #tpu.memory_space<vmem>>, %arg14: memref<64x128xf32, #tpu.memory_space<vmem>>, %arg15: memref<2x8x32xf32, #tpu.memory_space<vmem>>, %arg16: memref<2x8x32xf32, #tpu.memory_space<vmem>>) attributes {dimension_semantics = [], scalar_prefetch = 0 : i64, scratch_operands = 4 : i64, tpu.core_type = #tpu.core_type<tc>} {
    %c0 = arith.constant 0 : index
    %c0_0 = arith.constant 0 : index
    %0 = vector.load %arg0[%c0, %c0_0] : memref<64x1xi32, #tpu.memory_space<vmem>>, vector<64x1xi32>
    %c0_1 = arith.constant 0 : index
    %c0_2 = arith.constant 0 : index
    %1 = vector.load %arg1[%c0_1, %c0_2] : memref<64x1xf32, #tpu.memory_space<vmem>>, vector<64x1xf32>
    %2 = tpu.iota {dimensions = array<i32: 1>} : vector<64x18xi32>
    %3 = vector.broadcast %0 : vector<64x1xi32> to vector<64x18xi32>
    %4 = arith.cmpi eq, %2, %3 : vector<64x18xi32>
    %5 = arith.extui %4 : vector<64x18xi1> to vector<64x18xi32>
    %6 = arith.sitofp %5 : vector<64x18xi32> to vector<64x18xf32>
    %c16_i32 = arith.constant 16 : i32
    %7 = vector.broadcast %c16_i32 : i32 to vector<64x18xi32>
    %8 = arith.cmpi eq, %2, %7 : vector<64x18xi32>
    %cst = arith.constant 0.000000e+00 : f32
    %9 = vector.shape_cast %1 : vector<64x1xf32> to vector<64x1xf32>
    %10 = vector.broadcast %9 : vector<64x1xf32> to vector<64x18xf32>
    %11 = vector.broadcast %cst : f32 to vector<64x18xf32>
    %12 = arith.select %8, %10, %11 : vector<64x18xi1>, vector<64x18xf32>
    %13 = arith.addf %6, %12 : vector<64x18xf32>
    %c17_i32 = arith.constant 17 : i32
    %14 = vector.broadcast %c17_i32 : i32 to vector<64x18xi32>
    %15 = arith.cmpi eq, %2, %14 : vector<64x18xi32>
    %16 = arith.extui %15 : vector<64x18xi1> to vector<64x18xi32>
    %17 = arith.sitofp %16 : vector<64x18xi32> to vector<64x18xf32>
    %18 = arith.addf %13, %17 : vector<64x18xf32>
    %c0_3 = arith.constant 0 : index
    %c0_4 = arith.constant 0 : index
    %19 = vector.load %arg4[%c0_3, %c0_4] : memref<18x32xf32, #tpu.memory_space<vmem>>, vector<18x32xf32>
    %cst_5 = arith.constant dense<0.000000e+00> : vector<64x32xf32>
    %20 = tpu.matmul %18, %19, %cst_5 {dimension_numbers = #tpu.dot_dimension_numbers<[1], [0], [0], [1], [0, 0, 1, 1], [], []>} : vector<64x18xf32>, vector<18x32xf32>, vector<64x32xf32> -> vector<64x32xf32>
    %21 = arith.truncf %20 : vector<64x32xf32> to vector<64x32xbf16>
    %c0_6 = arith.constant 0 : index
    %c0_7 = arith.constant 0 : index
    %c0_8 = arith.constant 0 : index
    %22 = vector.load %arg5[%c0_6, %c0_7, %c0_8] : memref<2x64x128xbf16, #tpu.memory_space<vmem>>, vector<1x32x128xbf16>
    %23 = vector.shape_cast %22 : vector<1x32x128xbf16> to vector<32x128xbf16>
    %cst_9 = arith.constant dense<0.000000e+00> : vector<64x128xf32>
    %24 = tpu.matmul %21, %23, %cst_9 {dimension_numbers = #tpu.dot_dimension_numbers<[1], [0], [0], [1], [0, 0, 1, 1], [], []>} : vector<64x32xbf16>, vector<32x128xbf16>, vector<64x128xf32> -> vector<64x128xf32>
    %c0_10 = arith.constant 0 : index
    %c0_11 = arith.constant 0 : index
    %c0_12 = arith.constant 0 : index
    %25 = vector.load %arg6[%c0_10, %c0_11, %c0_12] : memref<2x1x128xf32, #tpu.memory_space<vmem>>, vector<1x1x128xf32>
    %26 = vector.shape_cast %25 : vector<1x1x128xf32> to vector<1x128xf32>
    %27 = vector.broadcast %26 : vector<1x128xf32> to vector<64x128xf32>
    %28 = arith.addf %24, %27 : vector<64x128xf32>
    %c0_13 = arith.constant 0 : index
    %c0_14 = arith.constant 0 : index
    %29 = vector.load %arg13[%c0_13, %c0_14] : memref<64x128xf32, #tpu.memory_space<vmem>>, vector<64x128xf32>
    tpu.vector_store %arg13[%c0_13, %c0_14], %28 {strides = array<i32>} : memref<64x128xf32, #tpu.memory_space<vmem>>, vector<64x128xf32>,
    %c0_15 = arith.constant 0 : index
    %c0_16 = arith.constant 0 : index
    %30 = vector.load %arg2[%c0_15, %c0_16] : memref<64x1xi32, #tpu.memory_space<vmem>>, vector<64x1xi32>
    %c0_17 = arith.constant 0 : index
    %c0_18 = arith.constant 0 : index
    %31 = vector.load %arg3[%c0_17, %c0_18] : memref<64x1xf32, #tpu.memory_space<vmem>>, vector<64x1xf32>
    %32 = tpu.iota {dimensions = array<i32: 1>} : vector<64x18xi32>
    %33 = vector.broadcast %30 : vector<64x1xi32> to vector<64x18xi32>
    %34 = arith.cmpi eq, %32, %33 : vector<64x18xi32>
    %35 = arith.extui %34 : vector<64x18xi1> to vector<64x18xi32>
    %36 = arith.sitofp %35 : vector<64x18xi32> to vector<64x18xf32>
    %c16_i32_19 = arith.constant 16 : i32
    %37 = vector.broadcast %c16_i32_19 : i32 to vector<64x18xi32>
    %38 = arith.cmpi eq, %32, %37 : vector<64x18xi32>
    %cst_20 = arith.constant 0.000000e+00 : f32
    %39 = vector.shape_cast %31 : vector<64x1xf32> to vector<64x1xf32>
    %40 = vector.broadcast %39 : vector<64x1xf32> to vector<64x18xf32>
    %41 = vector.broadcast %cst_20 : f32 to vector<64x18xf32>
    %42 = arith.select %38, %40, %41 : vector<64x18xi1>, vector<64x18xf32>
    %43 = arith.addf %36, %42 : vector<64x18xf32>
    %c17_i32_21 = arith.constant 17 : i32
    %44 = vector.broadcast %c17_i32_21 : i32 to vector<64x18xi32>
    %45 = arith.cmpi eq, %32, %44 : vector<64x18xi32>
    %46 = arith.extui %45 : vector<64x18xi1> to vector<64x18xi32>
    %47 = arith.sitofp %46 : vector<64x18xi32> to vector<64x18xf32>
    %48 = arith.addf %43, %47 : vector<64x18xf32>
    %c0_22 = arith.constant 0 : index
    %c0_23 = arith.constant 0 : index
    %49 = vector.load %arg7[%c0_22, %c0_23] : memref<18x32xf32, #tpu.memory_space<vmem>>, vector<18x32xf32>
    %cst_24 = arith.constant dense<0.000000e+00> : vector<64x32xf32>
    %50 = tpu.matmul %48, %49, %cst_24 {dimension_numbers = #tpu.dot_dimension_numbers<[1], [0], [0], [1], [0, 0, 1, 1], [], []>} : vector<64x18xf32>, vector<18x32xf32>, vector<64x32xf32> -> vector<64x32xf32>
    %51 = arith.truncf %50 : vector<64x32xf32> to vector<64x32xbf16>
    %c0_25 = arith.constant 0 : index
    %c0_26 = arith.constant 0 : index
    %c0_27 = arith.constant 0 : index
    %52 = vector.load %arg8[%c0_25, %c0_26, %c0_27] : memref<2x64x128xbf16, #tpu.memory_space<vmem>>, vector<1x32x128xbf16>
    %53 = vector.shape_cast %52 : vector<1x32x128xbf16> to vector<32x128xbf16>
    %cst_28 = arith.constant dense<0.000000e+00> : vector<64x128xf32>
    %54 = tpu.matmul %51, %53, %cst_28 {dimension_numbers = #tpu.dot_dimension_numbers<[1], [0], [0], [1], [0, 0, 1, 1], [], []>} : vector<64x32xbf16>, vector<32x128xbf16>, vector<64x128xf32> -> vector<64x128xf32>
    %c0_29 = arith.constant 0 : index
    %c0_30 = arith.constant 0 : index
    %c0_31 = arith.constant 0 : index
    %55 = vector.load %arg9[%c0_29, %c0_30, %c0_31] : memref<2x1x128xf32, #tpu.memory_space<vmem>>, vector<1x1x128xf32>
    %56 = vector.shape_cast %55 : vector<1x1x128xf32> to vector<1x128xf32>
    %57 = vector.broadcast %56 : vector<1x128xf32> to vector<64x128xf32>
    %58 = arith.addf %54, %57 : vector<64x128xf32>
    %c0_32 = arith.constant 0 : index
    %c0_33 = arith.constant 0 : index
    %59 = vector.load %arg14[%c0_32, %c0_33] : memref<64x128xf32, #tpu.memory_space<vmem>>, vector<64x128xf32>
    tpu.vector_store %arg14[%c0_32, %c0_33], %58 {strides = array<i32>} : memref<64x128xf32, #tpu.memory_space<vmem>>, vector<64x128xf32>,
    %c0_34 = arith.constant 0 : index
    %c32 = arith.constant 32 : index
    %c0_35 = arith.constant 0 : index
    %60 = vector.load %arg5[%c0_34, %c32, %c0_35] : memref<2x64x128xbf16, #tpu.memory_space<vmem>>, vector<1x32x128xbf16>
    %61 = vector.shape_cast %60 : vector<1x32x128xbf16> to vector<32x128xbf16>
    %c1 = arith.constant 1 : index
    %c0_36 = arith.constant 0 : index
    %c0_37 = arith.constant 0 : index
    %62 = vector.load %arg5[%c1, %c0_36, %c0_37] : memref<2x64x128xbf16, #tpu.memory_space<vmem>>, vector<1x64x128xbf16>
    %63 = vector.shape_cast %62 : vector<1x64x128xbf16> to vector<64x128xbf16>
    %c1_38 = arith.constant 1 : index
    %c0_39 = arith.constant 0 : index
    %c0_40 = arith.constant 0 : index
    %64 = vector.load %arg6[%c1_38, %c0_39, %c0_40] : memref<2x1x128xf32, #tpu.memory_space<vmem>>, vector<1x1x128xf32>
    %65 = vector.shape_cast %64 : vector<1x1x128xf32> to vector<1x128xf32>
    %cst_41 = arith.constant 0.000000e+00 : f32
    %66 = vector.broadcast %cst_41 : f32 to vector<8x32xf32>
    %c0_42 = arith.constant 0 : index
    %c0_43 = arith.constant 0 : index
    %c0_44 = arith.constant 0 : index
    %67 = vector.load %arg15[%c0_42, %c0_43, %c0_44] : memref<2x8x32xf32, #tpu.memory_space<vmem>>, vector<1x8x32xf32>
    %68 = vector.shape_cast %67 : vector<1x8x32xf32> to vector<8x32xf32>
    %69 = vector.shape_cast %66 : vector<8x32xf32> to vector<1x8x32xf32>
    tpu.vector_store %arg15[%c0_42, %c0_43, %c0_44], %69 {strides = array<i32>} : memref<2x8x32xf32, #tpu.memory_space<vmem>>, vector<1x8x32xf32>,
    %cst_45 = arith.constant 0.000000e+00 : f32
    %70 = vector.broadcast %cst_45 : f32 to vector<8x32xf32>
    %c0_46 = arith.constant 0 : index
    %c0_47 = arith.constant 0 : index
    %c0_48 = arith.constant 0 : index
    %71 = vector.load %arg16[%c0_46, %c0_47, %c0_48] : memref<2x8x32xf32, #tpu.memory_space<vmem>>, vector<1x8x32xf32>
    %72 = vector.shape_cast %71 : vector<1x8x32xf32> to vector<8x32xf32>
    %73 = vector.shape_cast %70 : vector<8x32xf32> to vector<1x8x32xf32>
    tpu.vector_store %arg16[%c0_46, %c0_47, %c0_48], %73 {strides = array<i32>} : memref<2x8x32xf32, #tpu.memory_space<vmem>>, vector<1x8x32xf32>,
    %cst_49 = arith.constant 0.000000e+00 : f32
    %74 = vector.broadcast %cst_49 : f32 to vector<8x32xf32>
    %c1_50 = arith.constant 1 : index
    %c0_51 = arith.constant 0 : index
    %c0_52 = arith.constant 0 : index
    %75 = vector.load %arg15[%c1_50, %c0_51, %c0_52] : memref<2x8x32xf32, #tpu.memory_space<vmem>>, vector<1x8x32xf32>
    %76 = vector.shape_cast %75 : vector<1x8x32xf32> to vector<8x32xf32>
    %77 = vector.shape_cast %74 : vector<8x32xf32> to vector<1x8x32xf32>
    tpu.vector_store %arg15[%c1_50, %c0_51, %c0_52], %77 {strides = array<i32>} : memref<2x8x32xf32, #tpu.memory_space<vmem>>, vector<1x8x32xf32>,
    %cst_53 = arith.constant 0.000000e+00 : f32
    %78 = vector.broadcast %cst_53 : f32 to vector<8x32xf32>
    %c1_54 = arith.constant 1 : index
    %c0_55 = arith.constant 0 : index
    %c0_56 = arith.constant 0 : index
    %79 = vector.load %arg16[%c1_54, %c0_55, %c0_56] : memref<2x8x32xf32, #tpu.memory_space<vmem>>, vector<1x8x32xf32>
    %80 = vector.shape_cast %79 : vector<1x8x32xf32> to vector<8x32xf32>
    %81 = vector.shape_cast %78 : vector<8x32xf32> to vector<1x8x32xf32>
    tpu.vector_store %arg16[%c1_54, %c0_55, %c0_56], %81 {strides = array<i32>} : memref<2x8x32xf32, #tpu.memory_space<vmem>>, vector<1x8x32xf32>,
    %c0_57 = arith.constant 0 : index
    %c0_58 = arith.constant 0 : index
    %c0_59 = arith.constant 0 : index
    %82 = vector.load %arg15[%c0_57, %c0_58, %c0_59] : memref<2x8x32xf32, #tpu.memory_space<vmem>>, vector<1x8x32xf32>
    %83 = vector.shape_cast %82 : vector<1x8x32xf32> to vector<8x32xf32>
    %c0_60 = arith.constant 0 : index
    %c0_61 = arith.constant 0 : index
    %c0_62 = arith.constant 0 : index
    %84 = vector.load %arg16[%c0_60, %c0_61, %c0_62] : memref<2x8x32xf32, #tpu.memory_space<vmem>>, vector<1x8x32xf32>
    %85 = vector.shape_cast %84 : vector<1x8x32xf32> to vector<8x32xf32>
    %c0_63 = arith.constant 0 : index
    %c0_64 = arith.constant 0 : index
    %86 = vector.load %arg13[%c0_63, %c0_64] : memref<64x128xf32, #tpu.memory_space<vmem>>, vector<8x128xf32>
    %87 = arith.truncf %83 : vector<8x32xf32> to vector<8x32xbf16>
    %cst_65 = arith.constant dense<0.000000e+00> : vector<8x128xf32>
    %88 = tpu.matmul %87, %61, %cst_65 {dimension_numbers = #tpu.dot_dimension_numbers<[1], [0], [0], [1], [0, 0, 1, 1], [], []>} : vector<8x32xbf16>, vector<32x128xbf16>, vector<8x128xf32> -> vector<8x128xf32>
    %89 = arith.addf %86, %88 : vector<8x128xf32>
    %90 = arith.negf %89 : vector<8x128xf32>
    %91 = math.exp %90 : vector<8x128xf32>
    %cst_66 = arith.constant 1.000000e+00 : f32
    %92 = vector.broadcast %cst_66 : f32 to vector<8x128xf32>
    %93 = arith.addf %92, %91 : vector<8x128xf32>
    %94 = arith.divf %92, %93 : vector<8x128xf32>
    %95 = math.tanh %89 : vector<8x128xf32>
    %96 = vector.extract_strided_slice %94 {offsets = [0, 32], sizes = [8, 32], strides = [1, 1]} : vector<8x128xf32> to vector<8x32xf32>
    %97 = arith.mulf %96, %85 : vector<8x32xf32>
    %98 = vector.extract_strided_slice %94 {offsets = [0, 0], sizes = [8, 32], strides = [1, 1]} : vector<8x128xf32> to vector<8x32xf32>
    %99 = vector.extract_strided_slice %95 {offsets = [0, 64], sizes = [8, 32], strides = [1, 1]} : vector<8x128xf32> to vector<8x32xf32>
    %100 = arith.mulf %98, %99 : vector<8x32xf32>
    %101 = arith.addf %97, %100 : vector<8x32xf32>
    %102 = vector.extract_strided_slice %94 {offsets = [0, 96], sizes = [8, 32], strides = [1, 1]} : vector<8x128xf32> to vector<8x32xf32>
    %103 = math.tanh %101 : vector<8x32xf32>
    %104 = arith.mulf %102, %103 : vector<8x32xf32>
    %c0_67 = arith.constant 0 : index
    %c0_68 = arith.constant 0 : index
    %c0_69 = arith.constant 0 : index
    %105 = vector.load %arg16[%c0_67, %c0_68, %c0_69] : memref<2x8x32xf32, #tpu.memory_space<vmem>>, vector<1x8x32xf32>
    %106 = vector.shape_cast %105 : vector<1x8x32xf32> to vector<8x32xf32>
    %107 = vector.shape_cast %101 : vector<8x32xf32> to vector<1x8x32xf32>
    tpu.vector_store %arg16[%c0_67, %c0_68, %c0_69], %107 {strides = array<i32>} : memref<2x8x32xf32, #tpu.memory_space<vmem>>, vector<1x8x32xf32>,
    %c0_70 = arith.constant 0 : index
    %c0_71 = arith.constant 0 : index
    %c0_72 = arith.constant 0 : index
    %108 = vector.load %arg15[%c0_70, %c0_71, %c0_72] : memref<2x8x32xf32, #tpu.memory_space<vmem>>, vector<1x8x32xf32>
    %109 = vector.shape_cast %108 : vector<1x8x32xf32> to vector<8x32xf32>
    %110 = vector.shape_cast %104 : vector<8x32xf32> to vector<1x8x32xf32>
    tpu.vector_store %arg15[%c0_70, %c0_71, %c0_72], %110 {strides = array<i32>} : memref<2x8x32xf32, #tpu.memory_space<vmem>>, vector<1x8x32xf32>,
    %c1_73 = arith.constant 1 : index
    %c0_74 = arith.constant 0 : index
    %c0_75 = arith.constant 0 : index
    %111 = vector.load %arg15[%c1_73, %c0_74, %c0_75] : memref<2x8x32xf32, #tpu.memory_space<vmem>>, vector<1x8x32xf32>
    %112 = vector.shape_cast %111 : vector<1x8x32xf32> to vector<8x32xf32>
    %c1_76 = arith.constant 1 : index
    %c0_77 = arith.constant 0 : index
    %c0_78 = arith.constant 0 : index
    %113 = vector.load %arg16[%c1_76, %c0_77, %c0_78] : memref<2x8x32xf32, #tpu.memory_space<vmem>>, vector<1x8x32xf32>
    %114 = vector.shape_cast %113 : vector<1x8x32xf32> to vector<8x32xf32>
    %c0_79 = arith.constant 0 : index
    %c0_80 = arith.constant 0 : index
    %c0_81 = arith.constant 0 : index
    %115 = vector.load %arg15[%c0_79, %c0_80, %c0_81] : memref<2x8x32xf32, #tpu.memory_space<vmem>>, vector<1x8x32xf32>
    %116 = vector.shape_cast %115 : vector<1x8x32xf32> to vector<8x32xf32>
    %117 = tpu.concatenate %116, %112 in 1 : vector<8x32xf32>, vector<8x32xf32> -> vector<8x64xf32>
    %118 = arith.truncf %117 : vector<8x64xf32> to vector<8x64xbf16>
    %cst_82 = arith.constant dense<0.000000e+00> : vector<8x128xf32>
    %119 = tpu.matmul %118, %63, %cst_82 {dimension_numbers = #tpu.dot_dimension_numbers<[1], [0], [0], [1], [0, 0, 1, 1], [], []>} : vector<8x64xbf16>, vector<64x128xbf16>, vector<8x128xf32> -> vector<8x128xf32>
    %120 = vector.broadcast %65 : vector<1x128xf32> to vector<8x128xf32>
    %121 = arith.addf %119, %120 : vector<8x128xf32>
    %122 = arith.negf %121 : vector<8x128xf32>
    %123 = math.exp %122 : vector<8x128xf32>
    %cst_83 = arith.constant 1.000000e+00 : f32
    %124 = vector.broadcast %cst_83 : f32 to vector<8x128xf32>
    %125 = arith.addf %124, %123 : vector<8x128xf32>
    %126 = arith.divf %124, %125 : vector<8x128xf32>
    %127 = math.tanh %121 : vector<8x128xf32>
    %128 = vector.extract_strided_slice %126 {offsets = [0, 32], sizes = [8, 32], strides = [1, 1]} : vector<8x128xf32> to vector<8x32xf32>
    %129 = arith.mulf %128, %114 : vector<8x32xf32>
    %130 = vector.extract_strided_slice %126 {offsets = [0, 0], sizes = [8, 32], strides = [1, 1]} : vector<8x128xf32> to vector<8x32xf32>
    %131 = vector.extract_strided_slice %127 {offsets = [0, 64], sizes = [8, 32], strides = [1, 1]} : vector<8x128xf32> to vector<8x32xf32>
    %132 = arith.mulf %130, %131 : vector<8x32xf32>
    %133 = arith.addf %129, %132 : vector<8x32xf32>
    %134 = vector.extract_strided_slice %126 {offsets = [0, 96], sizes = [8, 32], strides = [1, 1]} : vector<8x128xf32> to vector<8x32xf32>
    %135 = math.tanh %133 : vector<8x32xf32>
    %136 = arith.mulf %134, %135 : vector<8x32xf32>
    %c1_84 = arith.constant 1 : index
    %c0_85 = arith.constant 0 : index
    %c0_86 = arith.constant 0 : index
    %137 = vector.load %arg16[%c1_84, %c0_85, %c0_86] : memref<2x8x32xf32, #tpu.memory_space<vmem>>, vector<1x8x32xf32>
    %138 = vector.shape_cast %137 : vector<1x8x32xf32> to vector<8x32xf32>
    %139 = vector.shape_cast %133 : vector<8x32xf32> to vector<1x8x32xf32>
    tpu.vector_store %arg16[%c1_84, %c0_85, %c0_86], %139 {strides = array<i32>} : memref<2x8x32xf32, #tpu.memory_space<vmem>>, vector<1x8x32xf32>,
    %c1_87 = arith.constant 1 : index
    %c0_88 = arith.constant 0 : index
    %c0_89 = arith.constant 0 : index
    %140 = vector.load %arg15[%c1_87, %c0_88, %c0_89] : memref<2x8x32xf32, #tpu.memory_space<vmem>>, vector<1x8x32xf32>
    %141 = vector.shape_cast %140 : vector<1x8x32xf32> to vector<8x32xf32>
    %142 = vector.shape_cast %136 : vector<8x32xf32> to vector<1x8x32xf32>
    tpu.vector_store %arg15[%c1_87, %c0_88, %c0_89], %142 {strides = array<i32>} : memref<2x8x32xf32, #tpu.memory_space<vmem>>, vector<1x8x32xf32>,
    %c0_90 = arith.constant 0 : index
    %c0_91 = arith.constant 0 : index
    %c0_92 = arith.constant 0 : index
    %143 = vector.load %arg15[%c0_90, %c0_91, %c0_92] : memref<2x8x32xf32, #tpu.memory_space<vmem>>, vector<1x8x32xf32>
    %144 = vector.shape_cast %143 : vector<1x8x32xf32> to vector<8x32xf32>
    %c0_93 = arith.constant 0 : index
    %c0_94 = arith.constant 0 : index
    %c0_95 = arith.constant 0 : index
    %145 = vector.load %arg16[%c0_93, %c0_94, %c0_95] : memref<2x8x32xf32, #tpu.memory_space<vmem>>, vector<1x8x32xf32>
    %146 = vector.shape_cast %145 : vector<1x8x32xf32> to vector<8x32xf32>
    %c8 = arith.constant 8 : index
    %c0_96 = arith.constant 0 : index
    %147 = vector.load %arg13[%c8, %c0_96] : memref<64x128xf32, #tpu.memory_space<vmem>>, vector<8x128xf32>
    %148 = arith.truncf %144 : vector<8x32xf32> to vector<8x32xbf16>
    %cst_97 = arith.constant dense<0.000000e+00> : vector<8x128xf32>
    %149 = tpu.matmul %148, %61, %cst_97 {dimension_numbers = #tpu.dot_dimension_numbers<[1], [0], [0], [1], [0, 0, 1, 1], [], []>} : vector<8x32xbf16>, vector<32x128xbf16>, vector<8x128xf32> -> vector<8x128xf32>
    %150 = arith.addf %147, %149 : vector<8x128xf32>
    %151 = arith.negf %150 : vector<8x128xf32>
    %152 = math.exp %151 : vector<8x128xf32>
    %cst_98 = arith.constant 1.000000e+00 : f32
    %153 = vector.broadcast %cst_98 : f32 to vector<8x128xf32>
    %154 = arith.addf %153, %152 : vector<8x128xf32>
    %155 = arith.divf %153, %154 : vector<8x128xf32>
    %156 = math.tanh %150 : vector<8x128xf32>
    %157 = vector.extract_strided_slice %155 {offsets = [0, 32], sizes = [8, 32], strides = [1, 1]} : vector<8x128xf32> to vector<8x32xf32>
    %158 = arith.mulf %157, %146 : vector<8x32xf32>
    %159 = vector.extract_strided_slice %155 {offsets = [0, 0], sizes = [8, 32], strides = [1, 1]} : vector<8x128xf32> to vector<8x32xf32>
    %160 = vector.extract_strided_slice %156 {offsets = [0, 64], sizes = [8, 32], strides = [1, 1]} : vector<8x128xf32> to vector<8x32xf32>
    %161 = arith.mulf %159, %160 : vector<8x32xf32>
    %162 = arith.addf %158, %161 : vector<8x32xf32>
    %163 = vector.extract_strided_slice %155 {offsets = [0, 96], sizes = [8, 32], strides = [1, 1]} : vector<8x128xf32> to vector<8x32xf32>
    %164 = math.tanh %162 : vector<8x32xf32>
    %165 = arith.mulf %163, %164 : vector<8x32xf32>
    %c0_99 = arith.constant 0 : index
    %c0_100 = arith.constant 0 : index
    %c0_101 = arith.constant 0 : index
    %166 = vector.load %arg16[%c0_99, %c0_100, %c0_101] : memref<2x8x32xf32, #tpu.memory_space<vmem>>, vector<1x8x32xf32>
    %167 = vector.shape_cast %166 : vector<1x8x32xf32> to vector<8x32xf32>
    %168 = vector.shape_cast %162 : vector<8x32xf32> to vector<1x8x32xf32>
    tpu.vector_store %arg16[%c0_99, %c0_100, %c0_101], %168 {strides = array<i32>} : memref<2x8x32xf32, #tpu.memory_space<vmem>>, vector<1x8x32xf32>,
    %c0_102 = arith.constant 0 : index
    %c0_103 = arith.constant 0 : index
    %c0_104 = arith.constant 0 : index
    %169 = vector.load %arg15[%c0_102, %c0_103, %c0_104] : memref<2x8x32xf32, #tpu.memory_space<vmem>>, vector<1x8x32xf32>
    %170 = vector.shape_cast %169 : vector<1x8x32xf32> to vector<8x32xf32>
    %171 = vector.shape_cast %165 : vector<8x32xf32> to vector<1x8x32xf32>
    tpu.vector_store %arg15[%c0_102, %c0_103, %c0_104], %171 {strides = array<i32>} : memref<2x8x32xf32, #tpu.memory_space<vmem>>, vector<1x8x32xf32>,
    %c1_105 = arith.constant 1 : index
    %c0_106 = arith.constant 0 : index
    %c0_107 = arith.constant 0 : index
    %172 = vector.load %arg15[%c1_105, %c0_106, %c0_107] : memref<2x8x32xf32, #tpu.memory_space<vmem>>, vector<1x8x32xf32>
    %173 = vector.shape_cast %172 : vector<1x8x32xf32> to vector<8x32xf32>
    %c1_108 = arith.constant 1 : index
    %c0_109 = arith.constant 0 : index
    %c0_110 = arith.constant 0 : index
    %174 = vector.load %arg16[%c1_108, %c0_109, %c0_110] : memref<2x8x32xf32, #tpu.memory_space<vmem>>, vector<1x8x32xf32>
    %175 = vector.shape_cast %174 : vector<1x8x32xf32> to vector<8x32xf32>
    %c0_111 = arith.constant 0 : index
    %c0_112 = arith.constant 0 : index
    %c0_113 = arith.constant 0 : index
    %176 = vector.load %arg15[%c0_111, %c0_112, %c0_113] : memref<2x8x32xf32, #tpu.memory_space<vmem>>, vector<1x8x32xf32>
    %177 = vector.shape_cast %176 : vector<1x8x32xf32> to vector<8x32xf32>
    %178 = tpu.concatenate %177, %173 in 1 : vector<8x32xf32>, vector<8x32xf32> -> vector<8x64xf32>
    %179 = arith.truncf %178 : vector<8x64xf32> to vector<8x64xbf16>
    %cst_114 = arith.constant dense<0.000000e+00> : vector<8x128xf32>
    %180 = tpu.matmul %179, %63, %cst_114 {dimension_numbers = #tpu.dot_dimension_numbers<[1], [0], [0], [1], [0, 0, 1, 1], [], []>} : vector<8x64xbf16>, vector<64x128xbf16>, vector<8x128xf32> -> vector<8x128xf32>
    %181 = vector.broadcast %65 : vector<1x128xf32> to vector<8x128xf32>
    %182 = arith.addf %180, %181 : vector<8x128xf32>
    %183 = arith.negf %182 : vector<8x128xf32>
    %184 = math.exp %183 : vector<8x128xf32>
    %cst_115 = arith.constant 1.000000e+00 : f32
    %185 = vector.broadcast %cst_115 : f32 to vector<8x128xf32>
    %186 = arith.addf %185, %184 : vector<8x128xf32>
    %187 = arith.divf %185, %186 : vector<8x128xf32>
    %188 = math.tanh %182 : vector<8x128xf32>
    %189 = vector.extract_strided_slice %187 {offsets = [0, 32], sizes = [8, 32], strides = [1, 1]} : vector<8x128xf32> to vector<8x32xf32>
    %190 = arith.mulf %189, %175 : vector<8x32xf32>
    %191 = vector.extract_strided_slice %187 {offsets = [0, 0], sizes = [8, 32], strides = [1, 1]} : vector<8x128xf32> to vector<8x32xf32>
    %192 = vector.extract_strided_slice %188 {offsets = [0, 64], sizes = [8, 32], strides = [1, 1]} : vector<8x128xf32> to vector<8x32xf32>
    %193 = arith.mulf %191, %192 : vector<8x32xf32>
    %194 = arith.addf %190, %193 : vector<8x32xf32>
    %195 = vector.extract_strided_slice %187 {offsets = [0, 96], sizes = [8, 32], strides = [1, 1]} : vector<8x128xf32> to vector<8x32xf32>
    %196 = math.tanh %194 : vector<8x32xf32>
    %197 = arith.mulf %195, %196 : vector<8x32xf32>
    %c1_116 = arith.constant 1 : index
    %c0_117 = arith.constant 0 : index
    %c0_118 = arith.constant 0 : index
    %198 = vector.load %arg16[%c1_116, %c0_117, %c0_118] : memref<2x8x32xf32, #tpu.memory_space<vmem>>, vector<1x8x32xf32>
    %199 = vector.shape_cast %198 : vector<1x8x32xf32> to vector<8x32xf32>
    %200 = vector.shape_cast %194 : vector<8x32xf32> to vector<1x8x32xf32>
    tpu.vector_store %arg16[%c1_116, %c0_117, %c0_118], %200 {strides = array<i32>} : memref<2x8x32xf32, #tpu.memory_space<vmem>>, vector<1x8x32xf32>,
    %c1_119 = arith.constant 1 : index
    %c0_120 = arith.constant 0 : index
    %c0_121 = arith.constant 0 : index
    %201 = vector.load %arg15[%c1_119, %c0_120, %c0_121] : memref<2x8x32xf32, #tpu.memory_space<vmem>>, vector<1x8x32xf32>
    %202 = vector.shape_cast %201 : vector<1x8x32xf32> to vector<8x32xf32>
    %203 = vector.shape_cast %197 : vector<8x32xf32> to vector<1x8x32xf32>
    tpu.vector_store %arg15[%c1_119, %c0_120, %c0_121], %203 {strides = array<i32>} : memref<2x8x32xf32, #tpu.memory_space<vmem>>, vector<1x8x32xf32>,
    %c0_122 = arith.constant 0 : index
    %c0_123 = arith.constant 0 : index
    %c0_124 = arith.constant 0 : index
    %204 = vector.load %arg15[%c0_122, %c0_123, %c0_124] : memref<2x8x32xf32, #tpu.memory_space<vmem>>, vector<1x8x32xf32>
    %205 = vector.shape_cast %204 : vector<1x8x32xf32> to vector<8x32xf32>
    %c0_125 = arith.constant 0 : index
    %c0_126 = arith.constant 0 : index
    %c0_127 = arith.constant 0 : index
    %206 = vector.load %arg16[%c0_125, %c0_126, %c0_127] : memref<2x8x32xf32, #tpu.memory_space<vmem>>, vector<1x8x32xf32>
    %207 = vector.shape_cast %206 : vector<1x8x32xf32> to vector<8x32xf32>
    %c16 = arith.constant 16 : index
    %c0_128 = arith.constant 0 : index
    %208 = vector.load %arg13[%c16, %c0_128] : memref<64x128xf32, #tpu.memory_space<vmem>>, vector<8x128xf32>
    %209 = arith.truncf %205 : vector<8x32xf32> to vector<8x32xbf16>
    %cst_129 = arith.constant dense<0.000000e+00> : vector<8x128xf32>
    %210 = tpu.matmul %209, %61, %cst_129 {dimension_numbers = #tpu.dot_dimension_numbers<[1], [0], [0], [1], [0, 0, 1, 1], [], []>} : vector<8x32xbf16>, vector<32x128xbf16>, vector<8x128xf32> -> vector<8x128xf32>
    %211 = arith.addf %208, %210 : vector<8x128xf32>
    %212 = arith.negf %211 : vector<8x128xf32>
    %213 = math.exp %212 : vector<8x128xf32>
    %cst_130 = arith.constant 1.000000e+00 : f32
    %214 = vector.broadcast %cst_130 : f32 to vector<8x128xf32>
    %215 = arith.addf %214, %213 : vector<8x128xf32>
    %216 = arith.divf %214, %215 : vector<8x128xf32>
    %217 = math.tanh %211 : vector<8x128xf32>
    %218 = vector.extract_strided_slice %216 {offsets = [0, 32], sizes = [8, 32], strides = [1, 1]} : vector<8x128xf32> to vector<8x32xf32>
    %219 = arith.mulf %218, %207 : vector<8x32xf32>
    %220 = vector.extract_strided_slice %216 {offsets = [0, 0], sizes = [8, 32], strides = [1, 1]} : vector<8x128xf32> to vector<8x32xf32>
    %221 = vector.extract_strided_slice %217 {offsets = [0, 64], sizes = [8, 32], strides = [1, 1]} : vector<8x128xf32> to vector<8x32xf32>
    %222 = arith.mulf %220, %221 : vector<8x32xf32>
    %223 = arith.addf %219, %222 : vector<8x32xf32>
    %224 = vector.extract_strided_slice %216 {offsets = [0, 96], sizes = [8, 32], strides = [1, 1]} : vector<8x128xf32> to vector<8x32xf32>
    %225 = math.tanh %223 : vector<8x32xf32>
    %226 = arith.mulf %224, %225 : vector<8x32xf32>
    %c0_131 = arith.constant 0 : index
    %c0_132 = arith.constant 0 : index
    %c0_133 = arith.constant 0 : index
    %227 = vector.load %arg16[%c0_131, %c0_132, %c0_133] : memref<2x8x32xf32, #tpu.memory_space<vmem>>, vector<1x8x32xf32>
    %228 = vector.shape_cast %227 : vector<1x8x32xf32> to vector<8x32xf32>
    %229 = vector.shape_cast %223 : vector<8x32xf32> to vector<1x8x32xf32>
    tpu.vector_store %arg16[%c0_131, %c0_132, %c0_133], %229 {strides = array<i32>} : memref<2x8x32xf32, #tpu.memory_space<vmem>>, vector<1x8x32xf32>,
    %c0_134 = arith.constant 0 : index
    %c0_135 = arith.constant 0 : index
    %c0_136 = arith.constant 0 : index
    %230 = vector.load %arg15[%c0_134, %c0_135, %c0_136] : memref<2x8x32xf32, #tpu.memory_space<vmem>>, vector<1x8x32xf32>
    %231 = vector.shape_cast %230 : vector<1x8x32xf32> to vector<8x32xf32>
    %232 = vector.shape_cast %226 : vector<8x32xf32> to vector<1x8x32xf32>
    tpu.vector_store %arg15[%c0_134, %c0_135, %c0_136], %232 {strides = array<i32>} : memref<2x8x32xf32, #tpu.memory_space<vmem>>, vector<1x8x32xf32>,
    %c1_137 = arith.constant 1 : index
    %c0_138 = arith.constant 0 : index
    %c0_139 = arith.constant 0 : index
    %233 = vector.load %arg15[%c1_137, %c0_138, %c0_139] : memref<2x8x32xf32, #tpu.memory_space<vmem>>, vector<1x8x32xf32>
    %234 = vector.shape_cast %233 : vector<1x8x32xf32> to vector<8x32xf32>
    %c1_140 = arith.constant 1 : index
    %c0_141 = arith.constant 0 : index
    %c0_142 = arith.constant 0 : index
    %235 = vector.load %arg16[%c1_140, %c0_141, %c0_142] : memref<2x8x32xf32, #tpu.memory_space<vmem>>, vector<1x8x32xf32>
    %236 = vector.shape_cast %235 : vector<1x8x32xf32> to vector<8x32xf32>
    %c0_143 = arith.constant 0 : index
    %c0_144 = arith.constant 0 : index
    %c0_145 = arith.constant 0 : index
    %237 = vector.load %arg15[%c0_143, %c0_144, %c0_145] : memref<2x8x32xf32, #tpu.memory_space<vmem>>, vector<1x8x32xf32>
    %238 = vector.shape_cast %237 : vector<1x8x32xf32> to vector<8x32xf32>
    %239 = tpu.concatenate %238, %234 in 1 : vector<8x32xf32>, vector<8x32xf32> -> vector<8x64xf32>
    %240 = arith.truncf %239 : vector<8x64xf32> to vector<8x64xbf16>
    %cst_146 = arith.constant dense<0.000000e+00> : vector<8x128xf32>
    %241 = tpu.matmul %240, %63, %cst_146 {dimension_numbers = #tpu.dot_dimension_numbers<[1], [0], [0], [1], [0, 0, 1, 1], [], []>} : vector<8x64xbf16>, vector<64x128xbf16>, vector<8x128xf32> -> vector<8x128xf32>
    %242 = vector.broadcast %65 : vector<1x128xf32> to vector<8x128xf32>
    %243 = arith.addf %241, %242 : vector<8x128xf32>
    %244 = arith.negf %243 : vector<8x128xf32>
    %245 = math.exp %244 : vector<8x128xf32>
    %cst_147 = arith.constant 1.000000e+00 : f32
    %246 = vector.broadcast %cst_147 : f32 to vector<8x128xf32>
    %247 = arith.addf %246, %245 : vector<8x128xf32>
    %248 = arith.divf %246, %247 : vector<8x128xf32>
    %249 = math.tanh %243 : vector<8x128xf32>
    %250 = vector.extract_strided_slice %248 {offsets = [0, 32], sizes = [8, 32], strides = [1, 1]} : vector<8x128xf32> to vector<8x32xf32>
    %251 = arith.mulf %250, %236 : vector<8x32xf32>
    %252 = vector.extract_strided_slice %248 {offsets = [0, 0], sizes = [8, 32], strides = [1, 1]} : vector<8x128xf32> to vector<8x32xf32>
    %253 = vector.extract_strided_slice %249 {offsets = [0, 64], sizes = [8, 32], strides = [1, 1]} : vector<8x128xf32> to vector<8x32xf32>
    %254 = arith.mulf %252, %253 : vector<8x32xf32>
    %255 = arith.addf %251, %254 : vector<8x32xf32>
    %256 = vector.extract_strided_slice %248 {offsets = [0, 96], sizes = [8, 32], strides = [1, 1]} : vector<8x128xf32> to vector<8x32xf32>
    %257 = math.tanh %255 : vector<8x32xf32>
    %258 = arith.mulf %256, %257 : vector<8x32xf32>
    %c1_148 = arith.constant 1 : index
    %c0_149 = arith.constant 0 : index
    %c0_150 = arith.constant 0 : index
    %259 = vector.load %arg16[%c1_148, %c0_149, %c0_150] : memref<2x8x32xf32, #tpu.memory_space<vmem>>, vector<1x8x32xf32>
    %260 = vector.shape_cast %259 : vector<1x8x32xf32> to vector<8x32xf32>
    %261 = vector.shape_cast %255 : vector<8x32xf32> to vector<1x8x32xf32>
    tpu.vector_store %arg16[%c1_148, %c0_149, %c0_150], %261 {strides = array<i32>} : memref<2x8x32xf32, #tpu.memory_space<vmem>>, vector<1x8x32xf32>,
    %c1_151 = arith.constant 1 : index
    %c0_152 = arith.constant 0 : index
    %c0_153 = arith.constant 0 : index
    %262 = vector.load %arg15[%c1_151, %c0_152, %c0_153] : memref<2x8x32xf32, #tpu.memory_space<vmem>>, vector<1x8x32xf32>
    %263 = vector.shape_cast %262 : vector<1x8x32xf32> to vector<8x32xf32>
    %264 = vector.shape_cast %258 : vector<8x32xf32> to vector<1x8x32xf32>
    tpu.vector_store %arg15[%c1_151, %c0_152, %c0_153], %264 {strides = array<i32>} : memref<2x8x32xf32, #tpu.memory_space<vmem>>, vector<1x8x32xf32>,
    %c0_154 = arith.constant 0 : index
    %c0_155 = arith.constant 0 : index
    %c0_156 = arith.constant 0 : index
    %265 = vector.load %arg15[%c0_154, %c0_155, %c0_156] : memref<2x8x32xf32, #tpu.memory_space<vmem>>, vector<1x8x32xf32>
    %266 = vector.shape_cast %265 : vector<1x8x32xf32> to vector<8x32xf32>
    %c0_157 = arith.constant 0 : index
    %c0_158 = arith.constant 0 : index
    %c0_159 = arith.constant 0 : index
    %267 = vector.load %arg16[%c0_157, %c0_158, %c0_159] : memref<2x8x32xf32, #tpu.memory_space<vmem>>, vector<1x8x32xf32>
    %268 = vector.shape_cast %267 : vector<1x8x32xf32> to vector<8x32xf32>
    %c24 = arith.constant 24 : index
    %c0_160 = arith.constant 0 : index
    %269 = vector.load %arg13[%c24, %c0_160] : memref<64x128xf32, #tpu.memory_space<vmem>>, vector<8x128xf32>
    %270 = arith.truncf %266 : vector<8x32xf32> to vector<8x32xbf16>
    %cst_161 = arith.constant dense<0.000000e+00> : vector<8x128xf32>
    %271 = tpu.matmul %270, %61, %cst_161 {dimension_numbers = #tpu.dot_dimension_numbers<[1], [0], [0], [1], [0, 0, 1, 1], [], []>} : vector<8x32xbf16>, vector<32x128xbf16>, vector<8x128xf32> -> vector<8x128xf32>
    %272 = arith.addf %269, %271 : vector<8x128xf32>
    %273 = arith.negf %272 : vector<8x128xf32>
    %274 = math.exp %273 : vector<8x128xf32>
    %cst_162 = arith.constant 1.000000e+00 : f32
    %275 = vector.broadcast %cst_162 : f32 to vector<8x128xf32>
    %276 = arith.addf %275, %274 : vector<8x128xf32>
    %277 = arith.divf %275, %276 : vector<8x128xf32>
    %278 = math.tanh %272 : vector<8x128xf32>
    %279 = vector.extract_strided_slice %277 {offsets = [0, 32], sizes = [8, 32], strides = [1, 1]} : vector<8x128xf32> to vector<8x32xf32>
    %280 = arith.mulf %279, %268 : vector<8x32xf32>
    %281 = vector.extract_strided_slice %277 {offsets = [0, 0], sizes = [8, 32], strides = [1, 1]} : vector<8x128xf32> to vector<8x32xf32>
    %282 = vector.extract_strided_slice %278 {offsets = [0, 64], sizes = [8, 32], strides = [1, 1]} : vector<8x128xf32> to vector<8x32xf32>
    %283 = arith.mulf %281, %282 : vector<8x32xf32>
    %284 = arith.addf %280, %283 : vector<8x32xf32>
    %285 = vector.extract_strided_slice %277 {offsets = [0, 96], sizes = [8, 32], strides = [1, 1]} : vector<8x128xf32> to vector<8x32xf32>
    %286 = math.tanh %284 : vector<8x32xf32>
    %287 = arith.mulf %285, %286 : vector<8x32xf32>
    %c0_163 = arith.constant 0 : index
    %c0_164 = arith.constant 0 : index
    %c0_165 = arith.constant 0 : index
    %288 = vector.load %arg16[%c0_163, %c0_164, %c0_165] : memref<2x8x32xf32, #tpu.memory_space<vmem>>, vector<1x8x32xf32>
    %289 = vector.shape_cast %288 : vector<1x8x32xf32> to vector<8x32xf32>
    %290 = vector.shape_cast %284 : vector<8x32xf32> to vector<1x8x32xf32>
    tpu.vector_store %arg16[%c0_163, %c0_164, %c0_165], %290 {strides = array<i32>} : memref<2x8x32xf32, #tpu.memory_space<vmem>>, vector<1x8x32xf32>,
    %c0_166 = arith.constant 0 : index
    %c0_167 = arith.constant 0 : index
    %c0_168 = arith.constant 0 : index
    %291 = vector.load %arg15[%c0_166, %c0_167, %c0_168] : memref<2x8x32xf32, #tpu.memory_space<vmem>>, vector<1x8x32xf32>
    %292 = vector.shape_cast %291 : vector<1x8x32xf32> to vector<8x32xf32>
    %293 = vector.shape_cast %287 : vector<8x32xf32> to vector<1x8x32xf32>
    tpu.vector_store %arg15[%c0_166, %c0_167, %c0_168], %293 {strides = array<i32>} : memref<2x8x32xf32, #tpu.memory_space<vmem>>, vector<1x8x32xf32>,
    %c1_169 = arith.constant 1 : index
    %c0_170 = arith.constant 0 : index
    %c0_171 = arith.constant 0 : index
    %294 = vector.load %arg15[%c1_169, %c0_170, %c0_171] : memref<2x8x32xf32, #tpu.memory_space<vmem>>, vector<1x8x32xf32>
    %295 = vector.shape_cast %294 : vector<1x8x32xf32> to vector<8x32xf32>
    %c1_172 = arith.constant 1 : index
    %c0_173 = arith.constant 0 : index
    %c0_174 = arith.constant 0 : index
    %296 = vector.load %arg16[%c1_172, %c0_173, %c0_174] : memref<2x8x32xf32, #tpu.memory_space<vmem>>, vector<1x8x32xf32>
    %297 = vector.shape_cast %296 : vector<1x8x32xf32> to vector<8x32xf32>
    %c0_175 = arith.constant 0 : index
    %c0_176 = arith.constant 0 : index
    %c0_177 = arith.constant 0 : index
    %298 = vector.load %arg15[%c0_175, %c0_176, %c0_177] : memref<2x8x32xf32, #tpu.memory_space<vmem>>, vector<1x8x32xf32>
    %299 = vector.shape_cast %298 : vector<1x8x32xf32> to vector<8x32xf32>
    %300 = tpu.concatenate %299, %295 in 1 : vector<8x32xf32>, vector<8x32xf32> -> vector<8x64xf32>
    %301 = arith.truncf %300 : vector<8x64xf32> to vector<8x64xbf16>
    %cst_178 = arith.constant dense<0.000000e+00> : vector<8x128xf32>
    %302 = tpu.matmul %301, %63, %cst_178 {dimension_numbers = #tpu.dot_dimension_numbers<[1], [0], [0], [1], [0, 0, 1, 1], [], []>} : vector<8x64xbf16>, vector<64x128xbf16>, vector<8x128xf32> -> vector<8x128xf32>
    %303 = vector.broadcast %65 : vector<1x128xf32> to vector<8x128xf32>
    %304 = arith.addf %302, %303 : vector<8x128xf32>
    %305 = arith.negf %304 : vector<8x128xf32>
    %306 = math.exp %305 : vector<8x128xf32>
    %cst_179 = arith.constant 1.000000e+00 : f32
    %307 = vector.broadcast %cst_179 : f32 to vector<8x128xf32>
    %308 = arith.addf %307, %306 : vector<8x128xf32>
    %309 = arith.divf %307, %308 : vector<8x128xf32>
    %310 = math.tanh %304 : vector<8x128xf32>
    %311 = vector.extract_strided_slice %309 {offsets = [0, 32], sizes = [8, 32], strides = [1, 1]} : vector<8x128xf32> to vector<8x32xf32>
    %312 = arith.mulf %311, %297 : vector<8x32xf32>
    %313 = vector.extract_strided_slice %309 {offsets = [0, 0], sizes = [8, 32], strides = [1, 1]} : vector<8x128xf32> to vector<8x32xf32>
    %314 = vector.extract_strided_slice %310 {offsets = [0, 64], sizes = [8, 32], strides = [1, 1]} : vector<8x128xf32> to vector<8x32xf32>
    %315 = arith.mulf %313, %314 : vector<8x32xf32>
    %316 = arith.addf %312, %315 : vector<8x32xf32>
    %317 = vector.extract_strided_slice %309 {offsets = [0, 96], sizes = [8, 32], strides = [1, 1]} : vector<8x128xf32> to vector<8x32xf32>
    %318 = math.tanh %316 : vector<8x32xf32>
    %319 = arith.mulf %317, %318 : vector<8x32xf32>
    %c1_180 = arith.constant 1 : index
    %c0_181 = arith.constant 0 : index
    %c0_182 = arith.constant 0 : index
    %320 = vector.load %arg16[%c1_180, %c0_181, %c0_182] : memref<2x8x32xf32, #tpu.memory_space<vmem>>, vector<1x8x32xf32>
    %321 = vector.shape_cast %320 : vector<1x8x32xf32> to vector<8x32xf32>
    %322 = vector.shape_cast %316 : vector<8x32xf32> to vector<1x8x32xf32>
    tpu.vector_store %arg16[%c1_180, %c0_181, %c0_182], %322 {strides = array<i32>} : memref<2x8x32xf32, #tpu.memory_space<vmem>>, vector<1x8x32xf32>,
    %c1_183 = arith.constant 1 : index
    %c0_184 = arith.constant 0 : index
    %c0_185 = arith.constant 0 : index
    %323 = vector.load %arg15[%c1_183, %c0_184, %c0_185] : memref<2x8x32xf32, #tpu.memory_space<vmem>>, vector<1x8x32xf32>
    %324 = vector.shape_cast %323 : vector<1x8x32xf32> to vector<8x32xf32>
    %325 = vector.shape_cast %319 : vector<8x32xf32> to vector<1x8x32xf32>
    tpu.vector_store %arg15[%c1_183, %c0_184, %c0_185], %325 {strides = array<i32>} : memref<2x8x32xf32, #tpu.memory_space<vmem>>, vector<1x8x32xf32>,
    %c0_186 = arith.constant 0 : index
    %c0_187 = arith.constant 0 : index
    %c0_188 = arith.constant 0 : index
    %326 = vector.load %arg15[%c0_186, %c0_187, %c0_188] : memref<2x8x32xf32, #tpu.memory_space<vmem>>, vector<1x8x32xf32>
    %327 = vector.shape_cast %326 : vector<1x8x32xf32> to vector<8x32xf32>
    %c0_189 = arith.constant 0 : index
    %c0_190 = arith.constant 0 : index
    %c0_191 = arith.constant 0 : index
    %328 = vector.load %arg16[%c0_189, %c0_190, %c0_191] : memref<2x8x32xf32, #tpu.memory_space<vmem>>, vector<1x8x32xf32>
    %329 = vector.shape_cast %328 : vector<1x8x32xf32> to vector<8x32xf32>
    %c32_192 = arith.constant 32 : index
    %c0_193 = arith.constant 0 : index
    %330 = vector.load %arg13[%c32_192, %c0_193] : memref<64x128xf32, #tpu.memory_space<vmem>>, vector<8x128xf32>
    %331 = arith.truncf %327 : vector<8x32xf32> to vector<8x32xbf16>
    %cst_194 = arith.constant dense<0.000000e+00> : vector<8x128xf32>
    %332 = tpu.matmul %331, %61, %cst_194 {dimension_numbers = #tpu.dot_dimension_numbers<[1], [0], [0], [1], [0, 0, 1, 1], [], []>} : vector<8x32xbf16>, vector<32x128xbf16>, vector<8x128xf32> -> vector<8x128xf32>
    %333 = arith.addf %330, %332 : vector<8x128xf32>
    %334 = arith.negf %333 : vector<8x128xf32>
    %335 = math.exp %334 : vector<8x128xf32>
    %cst_195 = arith.constant 1.000000e+00 : f32
    %336 = vector.broadcast %cst_195 : f32 to vector<8x128xf32>
    %337 = arith.addf %336, %335 : vector<8x128xf32>
    %338 = arith.divf %336, %337 : vector<8x128xf32>
    %339 = math.tanh %333 : vector<8x128xf32>
    %340 = vector.extract_strided_slice %338 {offsets = [0, 32], sizes = [8, 32], strides = [1, 1]} : vector<8x128xf32> to vector<8x32xf32>
    %341 = arith.mulf %340, %329 : vector<8x32xf32>
    %342 = vector.extract_strided_slice %338 {offsets = [0, 0], sizes = [8, 32], strides = [1, 1]} : vector<8x128xf32> to vector<8x32xf32>
    %343 = vector.extract_strided_slice %339 {offsets = [0, 64], sizes = [8, 32], strides = [1, 1]} : vector<8x128xf32> to vector<8x32xf32>
    %344 = arith.mulf %342, %343 : vector<8x32xf32>
    %345 = arith.addf %341, %344 : vector<8x32xf32>
    %346 = vector.extract_strided_slice %338 {offsets = [0, 96], sizes = [8, 32], strides = [1, 1]} : vector<8x128xf32> to vector<8x32xf32>
    %347 = math.tanh %345 : vector<8x32xf32>
    %348 = arith.mulf %346, %347 : vector<8x32xf32>
    %c0_196 = arith.constant 0 : index
    %c0_197 = arith.constant 0 : index
    %c0_198 = arith.constant 0 : index
    %349 = vector.load %arg16[%c0_196, %c0_197, %c0_198] : memref<2x8x32xf32, #tpu.memory_space<vmem>>, vector<1x8x32xf32>
    %350 = vector.shape_cast %349 : vector<1x8x32xf32> to vector<8x32xf32>
    %351 = vector.shape_cast %345 : vector<8x32xf32> to vector<1x8x32xf32>
    tpu.vector_store %arg16[%c0_196, %c0_197, %c0_198], %351 {strides = array<i32>} : memref<2x8x32xf32, #tpu.memory_space<vmem>>, vector<1x8x32xf32>,
    %c0_199 = arith.constant 0 : index
    %c0_200 = arith.constant 0 : index
    %c0_201 = arith.constant 0 : index
    %352 = vector.load %arg15[%c0_199, %c0_200, %c0_201] : memref<2x8x32xf32, #tpu.memory_space<vmem>>, vector<1x8x32xf32>
    %353 = vector.shape_cast %352 : vector<1x8x32xf32> to vector<8x32xf32>
    %354 = vector.shape_cast %348 : vector<8x32xf32> to vector<1x8x32xf32>
    tpu.vector_store %arg15[%c0_199, %c0_200, %c0_201], %354 {strides = array<i32>} : memref<2x8x32xf32, #tpu.memory_space<vmem>>, vector<1x8x32xf32>,
    %c1_202 = arith.constant 1 : index
    %c0_203 = arith.constant 0 : index
    %c0_204 = arith.constant 0 : index
    %355 = vector.load %arg15[%c1_202, %c0_203, %c0_204] : memref<2x8x32xf32, #tpu.memory_space<vmem>>, vector<1x8x32xf32>
    %356 = vector.shape_cast %355 : vector<1x8x32xf32> to vector<8x32xf32>
    %c1_205 = arith.constant 1 : index
    %c0_206 = arith.constant 0 : index
    %c0_207 = arith.constant 0 : index
    %357 = vector.load %arg16[%c1_205, %c0_206, %c0_207] : memref<2x8x32xf32, #tpu.memory_space<vmem>>, vector<1x8x32xf32>
    %358 = vector.shape_cast %357 : vector<1x8x32xf32> to vector<8x32xf32>
    %c0_208 = arith.constant 0 : index
    %c0_209 = arith.constant 0 : index
    %c0_210 = arith.constant 0 : index
    %359 = vector.load %arg15[%c0_208, %c0_209, %c0_210] : memref<2x8x32xf32, #tpu.memory_space<vmem>>, vector<1x8x32xf32>
    %360 = vector.shape_cast %359 : vector<1x8x32xf32> to vector<8x32xf32>
    %361 = tpu.concatenate %360, %356 in 1 : vector<8x32xf32>, vector<8x32xf32> -> vector<8x64xf32>
    %362 = arith.truncf %361 : vector<8x64xf32> to vector<8x64xbf16>
    %cst_211 = arith.constant dense<0.000000e+00> : vector<8x128xf32>
    %363 = tpu.matmul %362, %63, %cst_211 {dimension_numbers = #tpu.dot_dimension_numbers<[1], [0], [0], [1], [0, 0, 1, 1], [], []>} : vector<8x64xbf16>, vector<64x128xbf16>, vector<8x128xf32> -> vector<8x128xf32>
    %364 = vector.broadcast %65 : vector<1x128xf32> to vector<8x128xf32>
    %365 = arith.addf %363, %364 : vector<8x128xf32>
    %366 = arith.negf %365 : vector<8x128xf32>
    %367 = math.exp %366 : vector<8x128xf32>
    %cst_212 = arith.constant 1.000000e+00 : f32
    %368 = vector.broadcast %cst_212 : f32 to vector<8x128xf32>
    %369 = arith.addf %368, %367 : vector<8x128xf32>
    %370 = arith.divf %368, %369 : vector<8x128xf32>
    %371 = math.tanh %365 : vector<8x128xf32>
    %372 = vector.extract_strided_slice %370 {offsets = [0, 32], sizes = [8, 32], strides = [1, 1]} : vector<8x128xf32> to vector<8x32xf32>
    %373 = arith.mulf %372, %358 : vector<8x32xf32>
    %374 = vector.extract_strided_slice %370 {offsets = [0, 0], sizes = [8, 32], strides = [1, 1]} : vector<8x128xf32> to vector<8x32xf32>
    %375 = vector.extract_strided_slice %371 {offsets = [0, 64], sizes = [8, 32], strides = [1, 1]} : vector<8x128xf32> to vector<8x32xf32>
    %376 = arith.mulf %374, %375 : vector<8x32xf32>
    %377 = arith.addf %373, %376 : vector<8x32xf32>
    %378 = vector.extract_strided_slice %370 {offsets = [0, 96], sizes = [8, 32], strides = [1, 1]} : vector<8x128xf32> to vector<8x32xf32>
    %379 = math.tanh %377 : vector<8x32xf32>
    %380 = arith.mulf %378, %379 : vector<8x32xf32>
    %c1_213 = arith.constant 1 : index
    %c0_214 = arith.constant 0 : index
    %c0_215 = arith.constant 0 : index
    %381 = vector.load %arg16[%c1_213, %c0_214, %c0_215] : memref<2x8x32xf32, #tpu.memory_space<vmem>>, vector<1x8x32xf32>
    %382 = vector.shape_cast %381 : vector<1x8x32xf32> to vector<8x32xf32>
    %383 = vector.shape_cast %377 : vector<8x32xf32> to vector<1x8x32xf32>
    tpu.vector_store %arg16[%c1_213, %c0_214, %c0_215], %383 {strides = array<i32>} : memref<2x8x32xf32, #tpu.memory_space<vmem>>, vector<1x8x32xf32>,
    %c1_216 = arith.constant 1 : index
    %c0_217 = arith.constant 0 : index
    %c0_218 = arith.constant 0 : index
    %384 = vector.load %arg15[%c1_216, %c0_217, %c0_218] : memref<2x8x32xf32, #tpu.memory_space<vmem>>, vector<1x8x32xf32>
    %385 = vector.shape_cast %384 : vector<1x8x32xf32> to vector<8x32xf32>
    %386 = vector.shape_cast %380 : vector<8x32xf32> to vector<1x8x32xf32>
    tpu.vector_store %arg15[%c1_216, %c0_217, %c0_218], %386 {strides = array<i32>} : memref<2x8x32xf32, #tpu.memory_space<vmem>>, vector<1x8x32xf32>,
    %c0_219 = arith.constant 0 : index
    %c0_220 = arith.constant 0 : index
    %c0_221 = arith.constant 0 : index
    %387 = vector.load %arg15[%c0_219, %c0_220, %c0_221] : memref<2x8x32xf32, #tpu.memory_space<vmem>>, vector<1x8x32xf32>
    %388 = vector.shape_cast %387 : vector<1x8x32xf32> to vector<8x32xf32>
    %c0_222 = arith.constant 0 : index
    %c0_223 = arith.constant 0 : index
    %c0_224 = arith.constant 0 : index
    %389 = vector.load %arg16[%c0_222, %c0_223, %c0_224] : memref<2x8x32xf32, #tpu.memory_space<vmem>>, vector<1x8x32xf32>
    %390 = vector.shape_cast %389 : vector<1x8x32xf32> to vector<8x32xf32>
    %c40 = arith.constant 40 : index
    %c0_225 = arith.constant 0 : index
    %391 = vector.load %arg13[%c40, %c0_225] : memref<64x128xf32, #tpu.memory_space<vmem>>, vector<8x128xf32>
    %392 = arith.truncf %388 : vector<8x32xf32> to vector<8x32xbf16>
    %cst_226 = arith.constant dense<0.000000e+00> : vector<8x128xf32>
    %393 = tpu.matmul %392, %61, %cst_226 {dimension_numbers = #tpu.dot_dimension_numbers<[1], [0], [0], [1], [0, 0, 1, 1], [], []>} : vector<8x32xbf16>, vector<32x128xbf16>, vector<8x128xf32> -> vector<8x128xf32>
    %394 = arith.addf %391, %393 : vector<8x128xf32>
    %395 = arith.negf %394 : vector<8x128xf32>
    %396 = math.exp %395 : vector<8x128xf32>
    %cst_227 = arith.constant 1.000000e+00 : f32
    %397 = vector.broadcast %cst_227 : f32 to vector<8x128xf32>
    %398 = arith.addf %397, %396 : vector<8x128xf32>
    %399 = arith.divf %397, %398 : vector<8x128xf32>
    %400 = math.tanh %394 : vector<8x128xf32>
    %401 = vector.extract_strided_slice %399 {offsets = [0, 32], sizes = [8, 32], strides = [1, 1]} : vector<8x128xf32> to vector<8x32xf32>
    %402 = arith.mulf %401, %390 : vector<8x32xf32>
    %403 = vector.extract_strided_slice %399 {offsets = [0, 0], sizes = [8, 32], strides = [1, 1]} : vector<8x128xf32> to vector<8x32xf32>
    %404 = vector.extract_strided_slice %400 {offsets = [0, 64], sizes = [8, 32], strides = [1, 1]} : vector<8x128xf32> to vector<8x32xf32>
    %405 = arith.mulf %403, %404 : vector<8x32xf32>
    %406 = arith.addf %402, %405 : vector<8x32xf32>
    %407 = vector.extract_strided_slice %399 {offsets = [0, 96], sizes = [8, 32], strides = [1, 1]} : vector<8x128xf32> to vector<8x32xf32>
    %408 = math.tanh %406 : vector<8x32xf32>
    %409 = arith.mulf %407, %408 : vector<8x32xf32>
    %c0_228 = arith.constant 0 : index
    %c0_229 = arith.constant 0 : index
    %c0_230 = arith.constant 0 : index
    %410 = vector.load %arg16[%c0_228, %c0_229, %c0_230] : memref<2x8x32xf32, #tpu.memory_space<vmem>>, vector<1x8x32xf32>
    %411 = vector.shape_cast %410 : vector<1x8x32xf32> to vector<8x32xf32>
    %412 = vector.shape_cast %406 : vector<8x32xf32> to vector<1x8x32xf32>
    tpu.vector_store %arg16[%c0_228, %c0_229, %c0_230], %412 {strides = array<i32>} : memref<2x8x32xf32, #tpu.memory_space<vmem>>, vector<1x8x32xf32>,
    %c0_231 = arith.constant 0 : index
    %c0_232 = arith.constant 0 : index
    %c0_233 = arith.constant 0 : index
    %413 = vector.load %arg15[%c0_231, %c0_232, %c0_233] : memref<2x8x32xf32, #tpu.memory_space<vmem>>, vector<1x8x32xf32>
    %414 = vector.shape_cast %413 : vector<1x8x32xf32> to vector<8x32xf32>
    %415 = vector.shape_cast %409 : vector<8x32xf32> to vector<1x8x32xf32>
    tpu.vector_store %arg15[%c0_231, %c0_232, %c0_233], %415 {strides = array<i32>} : memref<2x8x32xf32, #tpu.memory_space<vmem>>, vector<1x8x32xf32>,
    %c1_234 = arith.constant 1 : index
    %c0_235 = arith.constant 0 : index
    %c0_236 = arith.constant 0 : index
    %416 = vector.load %arg15[%c1_234, %c0_235, %c0_236] : memref<2x8x32xf32, #tpu.memory_space<vmem>>, vector<1x8x32xf32>
    %417 = vector.shape_cast %416 : vector<1x8x32xf32> to vector<8x32xf32>
    %c1_237 = arith.constant 1 : index
    %c0_238 = arith.constant 0 : index
    %c0_239 = arith.constant 0 : index
    %418 = vector.load %arg16[%c1_237, %c0_238, %c0_239] : memref<2x8x32xf32, #tpu.memory_space<vmem>>, vector<1x8x32xf32>
    %419 = vector.shape_cast %418 : vector<1x8x32xf32> to vector<8x32xf32>
    %c0_240 = arith.constant 0 : index
    %c0_241 = arith.constant 0 : index
    %c0_242 = arith.constant 0 : index
    %420 = vector.load %arg15[%c0_240, %c0_241, %c0_242] : memref<2x8x32xf32, #tpu.memory_space<vmem>>, vector<1x8x32xf32>
    %421 = vector.shape_cast %420 : vector<1x8x32xf32> to vector<8x32xf32>
    %422 = tpu.concatenate %421, %417 in 1 : vector<8x32xf32>, vector<8x32xf32> -> vector<8x64xf32>
    %423 = arith.truncf %422 : vector<8x64xf32> to vector<8x64xbf16>
    %cst_243 = arith.constant dense<0.000000e+00> : vector<8x128xf32>
    %424 = tpu.matmul %423, %63, %cst_243 {dimension_numbers = #tpu.dot_dimension_numbers<[1], [0], [0], [1], [0, 0, 1, 1], [], []>} : vector<8x64xbf16>, vector<64x128xbf16>, vector<8x128xf32> -> vector<8x128xf32>
    %425 = vector.broadcast %65 : vector<1x128xf32> to vector<8x128xf32>
    %426 = arith.addf %424, %425 : vector<8x128xf32>
    %427 = arith.negf %426 : vector<8x128xf32>
    %428 = math.exp %427 : vector<8x128xf32>
    %cst_244 = arith.constant 1.000000e+00 : f32
    %429 = vector.broadcast %cst_244 : f32 to vector<8x128xf32>
    %430 = arith.addf %429, %428 : vector<8x128xf32>
    %431 = arith.divf %429, %430 : vector<8x128xf32>
    %432 = math.tanh %426 : vector<8x128xf32>
    %433 = vector.extract_strided_slice %431 {offsets = [0, 32], sizes = [8, 32], strides = [1, 1]} : vector<8x128xf32> to vector<8x32xf32>
    %434 = arith.mulf %433, %419 : vector<8x32xf32>
    %435 = vector.extract_strided_slice %431 {offsets = [0, 0], sizes = [8, 32], strides = [1, 1]} : vector<8x128xf32> to vector<8x32xf32>
    %436 = vector.extract_strided_slice %432 {offsets = [0, 64], sizes = [8, 32], strides = [1, 1]} : vector<8x128xf32> to vector<8x32xf32>
    %437 = arith.mulf %435, %436 : vector<8x32xf32>
    %438 = arith.addf %434, %437 : vector<8x32xf32>
    %439 = vector.extract_strided_slice %431 {offsets = [0, 96], sizes = [8, 32], strides = [1, 1]} : vector<8x128xf32> to vector<8x32xf32>
    %440 = math.tanh %438 : vector<8x32xf32>
    %441 = arith.mulf %439, %440 : vector<8x32xf32>
    %c1_245 = arith.constant 1 : index
    %c0_246 = arith.constant 0 : index
    %c0_247 = arith.constant 0 : index
    %442 = vector.load %arg16[%c1_245, %c0_246, %c0_247] : memref<2x8x32xf32, #tpu.memory_space<vmem>>, vector<1x8x32xf32>
    %443 = vector.shape_cast %442 : vector<1x8x32xf32> to vector<8x32xf32>
    %444 = vector.shape_cast %438 : vector<8x32xf32> to vector<1x8x32xf32>
    tpu.vector_store %arg16[%c1_245, %c0_246, %c0_247], %444 {strides = array<i32>} : memref<2x8x32xf32, #tpu.memory_space<vmem>>, vector<1x8x32xf32>,
    %c1_248 = arith.constant 1 : index
    %c0_249 = arith.constant 0 : index
    %c0_250 = arith.constant 0 : index
    %445 = vector.load %arg15[%c1_248, %c0_249, %c0_250] : memref<2x8x32xf32, #tpu.memory_space<vmem>>, vector<1x8x32xf32>
    %446 = vector.shape_cast %445 : vector<1x8x32xf32> to vector<8x32xf32>
    %447 = vector.shape_cast %441 : vector<8x32xf32> to vector<1x8x32xf32>
    tpu.vector_store %arg15[%c1_248, %c0_249, %c0_250], %447 {strides = array<i32>} : memref<2x8x32xf32, #tpu.memory_space<vmem>>, vector<1x8x32xf32>,
    %c0_251 = arith.constant 0 : index
    %c0_252 = arith.constant 0 : index
    %c0_253 = arith.constant 0 : index
    %448 = vector.load %arg15[%c0_251, %c0_252, %c0_253] : memref<2x8x32xf32, #tpu.memory_space<vmem>>, vector<1x8x32xf32>
    %449 = vector.shape_cast %448 : vector<1x8x32xf32> to vector<8x32xf32>
    %c0_254 = arith.constant 0 : index
    %c0_255 = arith.constant 0 : index
    %c0_256 = arith.constant 0 : index
    %450 = vector.load %arg16[%c0_254, %c0_255, %c0_256] : memref<2x8x32xf32, #tpu.memory_space<vmem>>, vector<1x8x32xf32>
    %451 = vector.shape_cast %450 : vector<1x8x32xf32> to vector<8x32xf32>
    %c48 = arith.constant 48 : index
    %c0_257 = arith.constant 0 : index
    %452 = vector.load %arg13[%c48, %c0_257] : memref<64x128xf32, #tpu.memory_space<vmem>>, vector<8x128xf32>
    %453 = arith.truncf %449 : vector<8x32xf32> to vector<8x32xbf16>
    %cst_258 = arith.constant dense<0.000000e+00> : vector<8x128xf32>
    %454 = tpu.matmul %453, %61, %cst_258 {dimension_numbers = #tpu.dot_dimension_numbers<[1], [0], [0], [1], [0, 0, 1, 1], [], []>} : vector<8x32xbf16>, vector<32x128xbf16>, vector<8x128xf32> -> vector<8x128xf32>
    %455 = arith.addf %452, %454 : vector<8x128xf32>
    %456 = arith.negf %455 : vector<8x128xf32>
    %457 = math.exp %456 : vector<8x128xf32>
    %cst_259 = arith.constant 1.000000e+00 : f32
    %458 = vector.broadcast %cst_259 : f32 to vector<8x128xf32>
    %459 = arith.addf %458, %457 : vector<8x128xf32>
    %460 = arith.divf %458, %459 : vector<8x128xf32>
    %461 = math.tanh %455 : vector<8x128xf32>
    %462 = vector.extract_strided_slice %460 {offsets = [0, 32], sizes = [8, 32], strides = [1, 1]} : vector<8x128xf32> to vector<8x32xf32>
    %463 = arith.mulf %462, %451 : vector<8x32xf32>
    %464 = vector.extract_strided_slice %460 {offsets = [0, 0], sizes = [8, 32], strides = [1, 1]} : vector<8x128xf32> to vector<8x32xf32>
    %465 = vector.extract_strided_slice %461 {offsets = [0, 64], sizes = [8, 32], strides = [1, 1]} : vector<8x128xf32> to vector<8x32xf32>
    %466 = arith.mulf %464, %465 : vector<8x32xf32>
    %467 = arith.addf %463, %466 : vector<8x32xf32>
    %468 = vector.extract_strided_slice %460 {offsets = [0, 96], sizes = [8, 32], strides = [1, 1]} : vector<8x128xf32> to vector<8x32xf32>
    %469 = math.tanh %467 : vector<8x32xf32>
    %470 = arith.mulf %468, %469 : vector<8x32xf32>
    %c0_260 = arith.constant 0 : index
    %c0_261 = arith.constant 0 : index
    %c0_262 = arith.constant 0 : index
    %471 = vector.load %arg16[%c0_260, %c0_261, %c0_262] : memref<2x8x32xf32, #tpu.memory_space<vmem>>, vector<1x8x32xf32>
    %472 = vector.shape_cast %471 : vector<1x8x32xf32> to vector<8x32xf32>
    %473 = vector.shape_cast %467 : vector<8x32xf32> to vector<1x8x32xf32>
    tpu.vector_store %arg16[%c0_260, %c0_261, %c0_262], %473 {strides = array<i32>} : memref<2x8x32xf32, #tpu.memory_space<vmem>>, vector<1x8x32xf32>,
    %c0_263 = arith.constant 0 : index
    %c0_264 = arith.constant 0 : index
    %c0_265 = arith.constant 0 : index
    %474 = vector.load %arg15[%c0_263, %c0_264, %c0_265] : memref<2x8x32xf32, #tpu.memory_space<vmem>>, vector<1x8x32xf32>
    %475 = vector.shape_cast %474 : vector<1x8x32xf32> to vector<8x32xf32>
    %476 = vector.shape_cast %470 : vector<8x32xf32> to vector<1x8x32xf32>
    tpu.vector_store %arg15[%c0_263, %c0_264, %c0_265], %476 {strides = array<i32>} : memref<2x8x32xf32, #tpu.memory_space<vmem>>, vector<1x8x32xf32>,
    %c1_266 = arith.constant 1 : index
    %c0_267 = arith.constant 0 : index
    %c0_268 = arith.constant 0 : index
    %477 = vector.load %arg15[%c1_266, %c0_267, %c0_268] : memref<2x8x32xf32, #tpu.memory_space<vmem>>, vector<1x8x32xf32>
    %478 = vector.shape_cast %477 : vector<1x8x32xf32> to vector<8x32xf32>
    %c1_269 = arith.constant 1 : index
    %c0_270 = arith.constant 0 : index
    %c0_271 = arith.constant 0 : index
    %479 = vector.load %arg16[%c1_269, %c0_270, %c0_271] : memref<2x8x32xf32, #tpu.memory_space<vmem>>, vector<1x8x32xf32>
    %480 = vector.shape_cast %479 : vector<1x8x32xf32> to vector<8x32xf32>
    %c0_272 = arith.constant 0 : index
    %c0_273 = arith.constant 0 : index
    %c0_274 = arith.constant 0 : index
    %481 = vector.load %arg15[%c0_272, %c0_273, %c0_274] : memref<2x8x32xf32, #tpu.memory_space<vmem>>, vector<1x8x32xf32>
    %482 = vector.shape_cast %481 : vector<1x8x32xf32> to vector<8x32xf32>
    %483 = tpu.concatenate %482, %478 in 1 : vector<8x32xf32>, vector<8x32xf32> -> vector<8x64xf32>
    %484 = arith.truncf %483 : vector<8x64xf32> to vector<8x64xbf16>
    %cst_275 = arith.constant dense<0.000000e+00> : vector<8x128xf32>
    %485 = tpu.matmul %484, %63, %cst_275 {dimension_numbers = #tpu.dot_dimension_numbers<[1], [0], [0], [1], [0, 0, 1, 1], [], []>} : vector<8x64xbf16>, vector<64x128xbf16>, vector<8x128xf32> -> vector<8x128xf32>
    %486 = vector.broadcast %65 : vector<1x128xf32> to vector<8x128xf32>
    %487 = arith.addf %485, %486 : vector<8x128xf32>
    %488 = arith.negf %487 : vector<8x128xf32>
    %489 = math.exp %488 : vector<8x128xf32>
    %cst_276 = arith.constant 1.000000e+00 : f32
    %490 = vector.broadcast %cst_276 : f32 to vector<8x128xf32>
    %491 = arith.addf %490, %489 : vector<8x128xf32>
    %492 = arith.divf %490, %491 : vector<8x128xf32>
    %493 = math.tanh %487 : vector<8x128xf32>
    %494 = vector.extract_strided_slice %492 {offsets = [0, 32], sizes = [8, 32], strides = [1, 1]} : vector<8x128xf32> to vector<8x32xf32>
    %495 = arith.mulf %494, %480 : vector<8x32xf32>
    %496 = vector.extract_strided_slice %492 {offsets = [0, 0], sizes = [8, 32], strides = [1, 1]} : vector<8x128xf32> to vector<8x32xf32>
    %497 = vector.extract_strided_slice %493 {offsets = [0, 64], sizes = [8, 32], strides = [1, 1]} : vector<8x128xf32> to vector<8x32xf32>
    %498 = arith.mulf %496, %497 : vector<8x32xf32>
    %499 = arith.addf %495, %498 : vector<8x32xf32>
    %500 = vector.extract_strided_slice %492 {offsets = [0, 96], sizes = [8, 32], strides = [1, 1]} : vector<8x128xf32> to vector<8x32xf32>
    %501 = math.tanh %499 : vector<8x32xf32>
    %502 = arith.mulf %500, %501 : vector<8x32xf32>
    %c1_277 = arith.constant 1 : index
    %c0_278 = arith.constant 0 : index
    %c0_279 = arith.constant 0 : index
    %503 = vector.load %arg16[%c1_277, %c0_278, %c0_279] : memref<2x8x32xf32, #tpu.memory_space<vmem>>, vector<1x8x32xf32>
    %504 = vector.shape_cast %503 : vector<1x8x32xf32> to vector<8x32xf32>
    %505 = vector.shape_cast %499 : vector<8x32xf32> to vector<1x8x32xf32>
    tpu.vector_store %arg16[%c1_277, %c0_278, %c0_279], %505 {strides = array<i32>} : memref<2x8x32xf32, #tpu.memory_space<vmem>>, vector<1x8x32xf32>,
    %c1_280 = arith.constant 1 : index
    %c0_281 = arith.constant 0 : index
    %c0_282 = arith.constant 0 : index
    %506 = vector.load %arg15[%c1_280, %c0_281, %c0_282] : memref<2x8x32xf32, #tpu.memory_space<vmem>>, vector<1x8x32xf32>
    %507 = vector.shape_cast %506 : vector<1x8x32xf32> to vector<8x32xf32>
    %508 = vector.shape_cast %502 : vector<8x32xf32> to vector<1x8x32xf32>
    tpu.vector_store %arg15[%c1_280, %c0_281, %c0_282], %508 {strides = array<i32>} : memref<2x8x32xf32, #tpu.memory_space<vmem>>, vector<1x8x32xf32>,
    %c0_283 = arith.constant 0 : index
    %c0_284 = arith.constant 0 : index
    %c0_285 = arith.constant 0 : index
    %509 = vector.load %arg15[%c0_283, %c0_284, %c0_285] : memref<2x8x32xf32, #tpu.memory_space<vmem>>, vector<1x8x32xf32>
    %510 = vector.shape_cast %509 : vector<1x8x32xf32> to vector<8x32xf32>
    %c0_286 = arith.constant 0 : index
    %c0_287 = arith.constant 0 : index
    %c0_288 = arith.constant 0 : index
    %511 = vector.load %arg16[%c0_286, %c0_287, %c0_288] : memref<2x8x32xf32, #tpu.memory_space<vmem>>, vector<1x8x32xf32>
    %512 = vector.shape_cast %511 : vector<1x8x32xf32> to vector<8x32xf32>
    %c56 = arith.constant 56 : index
    %c0_289 = arith.constant 0 : index
    %513 = vector.load %arg13[%c56, %c0_289] : memref<64x128xf32, #tpu.memory_space<vmem>>, vector<8x128xf32>
    %514 = arith.truncf %510 : vector<8x32xf32> to vector<8x32xbf16>
    %cst_290 = arith.constant dense<0.000000e+00> : vector<8x128xf32>
    %515 = tpu.matmul %514, %61, %cst_290 {dimension_numbers = #tpu.dot_dimension_numbers<[1], [0], [0], [1], [0, 0, 1, 1], [], []>} : vector<8x32xbf16>, vector<32x128xbf16>, vector<8x128xf32> -> vector<8x128xf32>
    %516 = arith.addf %513, %515 : vector<8x128xf32>
    %517 = arith.negf %516 : vector<8x128xf32>
    %518 = math.exp %517 : vector<8x128xf32>
    %cst_291 = arith.constant 1.000000e+00 : f32
    %519 = vector.broadcast %cst_291 : f32 to vector<8x128xf32>
    %520 = arith.addf %519, %518 : vector<8x128xf32>
    %521 = arith.divf %519, %520 : vector<8x128xf32>
    %522 = math.tanh %516 : vector<8x128xf32>
    %523 = vector.extract_strided_slice %521 {offsets = [0, 32], sizes = [8, 32], strides = [1, 1]} : vector<8x128xf32> to vector<8x32xf32>
    %524 = arith.mulf %523, %512 : vector<8x32xf32>
    %525 = vector.extract_strided_slice %521 {offsets = [0, 0], sizes = [8, 32], strides = [1, 1]} : vector<8x128xf32> to vector<8x32xf32>
    %526 = vector.extract_strided_slice %522 {offsets = [0, 64], sizes = [8, 32], strides = [1, 1]} : vector<8x128xf32> to vector<8x32xf32>
    %527 = arith.mulf %525, %526 : vector<8x32xf32>
    %528 = arith.addf %524, %527 : vector<8x32xf32>
    %529 = vector.extract_strided_slice %521 {offsets = [0, 96], sizes = [8, 32], strides = [1, 1]} : vector<8x128xf32> to vector<8x32xf32>
    %530 = math.tanh %528 : vector<8x32xf32>
    %531 = arith.mulf %529, %530 : vector<8x32xf32>
    %c0_292 = arith.constant 0 : index
    %c0_293 = arith.constant 0 : index
    %c0_294 = arith.constant 0 : index
    %532 = vector.load %arg16[%c0_292, %c0_293, %c0_294] : memref<2x8x32xf32, #tpu.memory_space<vmem>>, vector<1x8x32xf32>
    %533 = vector.shape_cast %532 : vector<1x8x32xf32> to vector<8x32xf32>
    %534 = vector.shape_cast %528 : vector<8x32xf32> to vector<1x8x32xf32>
    tpu.vector_store %arg16[%c0_292, %c0_293, %c0_294], %534 {strides = array<i32>} : memref<2x8x32xf32, #tpu.memory_space<vmem>>, vector<1x8x32xf32>,
    %c0_295 = arith.constant 0 : index
    %c0_296 = arith.constant 0 : index
    %c0_297 = arith.constant 0 : index
    %535 = vector.load %arg15[%c0_295, %c0_296, %c0_297] : memref<2x8x32xf32, #tpu.memory_space<vmem>>, vector<1x8x32xf32>
    %536 = vector.shape_cast %535 : vector<1x8x32xf32> to vector<8x32xf32>
    %537 = vector.shape_cast %531 : vector<8x32xf32> to vector<1x8x32xf32>
    tpu.vector_store %arg15[%c0_295, %c0_296, %c0_297], %537 {strides = array<i32>} : memref<2x8x32xf32, #tpu.memory_space<vmem>>, vector<1x8x32xf32>,
    %c1_298 = arith.constant 1 : index
    %c0_299 = arith.constant 0 : index
    %c0_300 = arith.constant 0 : index
    %538 = vector.load %arg15[%c1_298, %c0_299, %c0_300] : memref<2x8x32xf32, #tpu.memory_space<vmem>>, vector<1x8x32xf32>
    %539 = vector.shape_cast %538 : vector<1x8x32xf32> to vector<8x32xf32>
    %c1_301 = arith.constant 1 : index
    %c0_302 = arith.constant 0 : index
    %c0_303 = arith.constant 0 : index
    %540 = vector.load %arg16[%c1_301, %c0_302, %c0_303] : memref<2x8x32xf32, #tpu.memory_space<vmem>>, vector<1x8x32xf32>
    %541 = vector.shape_cast %540 : vector<1x8x32xf32> to vector<8x32xf32>
    %c0_304 = arith.constant 0 : index
    %c0_305 = arith.constant 0 : index
    %c0_306 = arith.constant 0 : index
    %542 = vector.load %arg15[%c0_304, %c0_305, %c0_306] : memref<2x8x32xf32, #tpu.memory_space<vmem>>, vector<1x8x32xf32>
    %543 = vector.shape_cast %542 : vector<1x8x32xf32> to vector<8x32xf32>
    %544 = tpu.concatenate %543, %539 in 1 : vector<8x32xf32>, vector<8x32xf32> -> vector<8x64xf32>
    %545 = arith.truncf %544 : vector<8x64xf32> to vector<8x64xbf16>
    %cst_307 = arith.constant dense<0.000000e+00> : vector<8x128xf32>
    %546 = tpu.matmul %545, %63, %cst_307 {dimension_numbers = #tpu.dot_dimension_numbers<[1], [0], [0], [1], [0, 0, 1, 1], [], []>} : vector<8x64xbf16>, vector<64x128xbf16>, vector<8x128xf32> -> vector<8x128xf32>
    %547 = vector.broadcast %65 : vector<1x128xf32> to vector<8x128xf32>
    %548 = arith.addf %546, %547 : vector<8x128xf32>
    %549 = arith.negf %548 : vector<8x128xf32>
    %550 = math.exp %549 : vector<8x128xf32>
    %cst_308 = arith.constant 1.000000e+00 : f32
    %551 = vector.broadcast %cst_308 : f32 to vector<8x128xf32>
    %552 = arith.addf %551, %550 : vector<8x128xf32>
    %553 = arith.divf %551, %552 : vector<8x128xf32>
    %554 = math.tanh %548 : vector<8x128xf32>
    %555 = vector.extract_strided_slice %553 {offsets = [0, 32], sizes = [8, 32], strides = [1, 1]} : vector<8x128xf32> to vector<8x32xf32>
    %556 = arith.mulf %555, %541 : vector<8x32xf32>
    %557 = vector.extract_strided_slice %553 {offsets = [0, 0], sizes = [8, 32], strides = [1, 1]} : vector<8x128xf32> to vector<8x32xf32>
    %558 = vector.extract_strided_slice %554 {offsets = [0, 64], sizes = [8, 32], strides = [1, 1]} : vector<8x128xf32> to vector<8x32xf32>
    %559 = arith.mulf %557, %558 : vector<8x32xf32>
    %560 = arith.addf %556, %559 : vector<8x32xf32>
    %561 = vector.extract_strided_slice %553 {offsets = [0, 96], sizes = [8, 32], strides = [1, 1]} : vector<8x128xf32> to vector<8x32xf32>
    %562 = math.tanh %560 : vector<8x32xf32>
    %563 = arith.mulf %561, %562 : vector<8x32xf32>
    %c1_309 = arith.constant 1 : index
    %c0_310 = arith.constant 0 : index
    %c0_311 = arith.constant 0 : index
    %564 = vector.load %arg16[%c1_309, %c0_310, %c0_311] : memref<2x8x32xf32, #tpu.memory_space<vmem>>, vector<1x8x32xf32>
    %565 = vector.shape_cast %564 : vector<1x8x32xf32> to vector<8x32xf32>
    %566 = vector.shape_cast %560 : vector<8x32xf32> to vector<1x8x32xf32>
    tpu.vector_store %arg16[%c1_309, %c0_310, %c0_311], %566 {strides = array<i32>} : memref<2x8x32xf32, #tpu.memory_space<vmem>>, vector<1x8x32xf32>,
    %c1_312 = arith.constant 1 : index
    %c0_313 = arith.constant 0 : index
    %c0_314 = arith.constant 0 : index
    %567 = vector.load %arg15[%c1_312, %c0_313, %c0_314] : memref<2x8x32xf32, #tpu.memory_space<vmem>>, vector<1x8x32xf32>
    %568 = vector.shape_cast %567 : vector<1x8x32xf32> to vector<8x32xf32>
    %569 = vector.shape_cast %563 : vector<8x32xf32> to vector<1x8x32xf32>
    tpu.vector_store %arg15[%c1_312, %c0_313, %c0_314], %569 {strides = array<i32>} : memref<2x8x32xf32, #tpu.memory_space<vmem>>, vector<1x8x32xf32>,
    %c0_315 = arith.constant 0 : index
    %c32_316 = arith.constant 32 : index
    %c0_317 = arith.constant 0 : index
    %570 = vector.load %arg8[%c0_315, %c32_316, %c0_317] : memref<2x64x128xbf16, #tpu.memory_space<vmem>>, vector<1x32x128xbf16>
    %571 = vector.shape_cast %570 : vector<1x32x128xbf16> to vector<32x128xbf16>
    %c1_318 = arith.constant 1 : index
    %c0_319 = arith.constant 0 : index
    %c0_320 = arith.constant 0 : index
    %572 = vector.load %arg8[%c1_318, %c0_319, %c0_320] : memref<2x64x128xbf16, #tpu.memory_space<vmem>>, vector<1x64x128xbf16>
    %573 = vector.shape_cast %572 : vector<1x64x128xbf16> to vector<64x128xbf16>
    %c1_321 = arith.constant 1 : index
    %c0_322 = arith.constant 0 : index
    %c0_323 = arith.constant 0 : index
    %574 = vector.load %arg9[%c1_321, %c0_322, %c0_323] : memref<2x1x128xf32, #tpu.memory_space<vmem>>, vector<1x1x128xf32>
    %575 = vector.shape_cast %574 : vector<1x1x128xf32> to vector<1x128xf32>
    %c0_324 = arith.constant 0 : index
    %c0_325 = arith.constant 0 : index
    %576 = vector.load %arg10[%c0_324, %c0_325] : memref<32x128xbf16, #tpu.memory_space<vmem>>, vector<32x128xbf16>
    %c0_326 = arith.constant 0 : index
    %c0_327 = arith.constant 0 : index
    %577 = vector.load %arg11[%c0_326, %c0_327] : memref<1x128xf32, #tpu.memory_space<vmem>>, vector<1x128xf32>
    %c0_328 = arith.constant 0 : index
    %c0_329 = arith.constant 0 : index
    %c0_330 = arith.constant 0 : index
    %578 = vector.load %arg15[%c0_328, %c0_329, %c0_330] : memref<2x8x32xf32, #tpu.memory_space<vmem>>, vector<1x8x32xf32>
    %579 = vector.shape_cast %578 : vector<1x8x32xf32> to vector<8x32xf32>
    %c0_331 = arith.constant 0 : index
    %c0_332 = arith.constant 0 : index
    %c0_333 = arith.constant 0 : index
    %580 = vector.load %arg16[%c0_331, %c0_332, %c0_333] : memref<2x8x32xf32, #tpu.memory_space<vmem>>, vector<1x8x32xf32>
    %581 = vector.shape_cast %580 : vector<1x8x32xf32> to vector<8x32xf32>
    %c0_334 = arith.constant 0 : index
    %c0_335 = arith.constant 0 : index
    %582 = vector.load %arg14[%c0_334, %c0_335] : memref<64x128xf32, #tpu.memory_space<vmem>>, vector<8x128xf32>
    %583 = arith.truncf %579 : vector<8x32xf32> to vector<8x32xbf16>
    %cst_336 = arith.constant dense<0.000000e+00> : vector<8x128xf32>
    %584 = tpu.matmul %583, %571, %cst_336 {dimension_numbers = #tpu.dot_dimension_numbers<[1], [0], [0], [1], [0, 0, 1, 1], [], []>} : vector<8x32xbf16>, vector<32x128xbf16>, vector<8x128xf32> -> vector<8x128xf32>
    %585 = arith.addf %582, %584 : vector<8x128xf32>
    %586 = arith.negf %585 : vector<8x128xf32>
    %587 = math.exp %586 : vector<8x128xf32>
    %cst_337 = arith.constant 1.000000e+00 : f32
    %588 = vector.broadcast %cst_337 : f32 to vector<8x128xf32>
    %589 = arith.addf %588, %587 : vector<8x128xf32>
    %590 = arith.divf %588, %589 : vector<8x128xf32>
    %591 = math.tanh %585 : vector<8x128xf32>
    %592 = vector.extract_strided_slice %590 {offsets = [0, 32], sizes = [8, 32], strides = [1, 1]} : vector<8x128xf32> to vector<8x32xf32>
    %593 = arith.mulf %592, %581 : vector<8x32xf32>
    %594 = vector.extract_strided_slice %590 {offsets = [0, 0], sizes = [8, 32], strides = [1, 1]} : vector<8x128xf32> to vector<8x32xf32>
    %595 = vector.extract_strided_slice %591 {offsets = [0, 64], sizes = [8, 32], strides = [1, 1]} : vector<8x128xf32> to vector<8x32xf32>
    %596 = arith.mulf %594, %595 : vector<8x32xf32>
    %597 = arith.addf %593, %596 : vector<8x32xf32>
    %598 = vector.extract_strided_slice %590 {offsets = [0, 96], sizes = [8, 32], strides = [1, 1]} : vector<8x128xf32> to vector<8x32xf32>
    %599 = math.tanh %597 : vector<8x32xf32>
    %600 = arith.mulf %598, %599 : vector<8x32xf32>
    %c0_338 = arith.constant 0 : index
    %c0_339 = arith.constant 0 : index
    %c0_340 = arith.constant 0 : index
    %601 = vector.load %arg16[%c0_338, %c0_339, %c0_340] : memref<2x8x32xf32, #tpu.memory_space<vmem>>, vector<1x8x32xf32>
    %602 = vector.shape_cast %601 : vector<1x8x32xf32> to vector<8x32xf32>
    %603 = vector.shape_cast %597 : vector<8x32xf32> to vector<1x8x32xf32>
    tpu.vector_store %arg16[%c0_338, %c0_339, %c0_340], %603 {strides = array<i32>} : memref<2x8x32xf32, #tpu.memory_space<vmem>>, vector<1x8x32xf32>,
    %c0_341 = arith.constant 0 : index
    %c0_342 = arith.constant 0 : index
    %c0_343 = arith.constant 0 : index
    %604 = vector.load %arg15[%c0_341, %c0_342, %c0_343] : memref<2x8x32xf32, #tpu.memory_space<vmem>>, vector<1x8x32xf32>
    %605 = vector.shape_cast %604 : vector<1x8x32xf32> to vector<8x32xf32>
    %606 = vector.shape_cast %600 : vector<8x32xf32> to vector<1x8x32xf32>
    tpu.vector_store %arg15[%c0_341, %c0_342, %c0_343], %606 {strides = array<i32>} : memref<2x8x32xf32, #tpu.memory_space<vmem>>, vector<1x8x32xf32>,
    %c1_344 = arith.constant 1 : index
    %c0_345 = arith.constant 0 : index
    %c0_346 = arith.constant 0 : index
    %607 = vector.load %arg15[%c1_344, %c0_345, %c0_346] : memref<2x8x32xf32, #tpu.memory_space<vmem>>, vector<1x8x32xf32>
    %608 = vector.shape_cast %607 : vector<1x8x32xf32> to vector<8x32xf32>
    %c1_347 = arith.constant 1 : index
    %c0_348 = arith.constant 0 : index
    %c0_349 = arith.constant 0 : index
    %609 = vector.load %arg16[%c1_347, %c0_348, %c0_349] : memref<2x8x32xf32, #tpu.memory_space<vmem>>, vector<1x8x32xf32>
    %610 = vector.shape_cast %609 : vector<1x8x32xf32> to vector<8x32xf32>
    %c0_350 = arith.constant 0 : index
    %c0_351 = arith.constant 0 : index
    %c0_352 = arith.constant 0 : index
    %611 = vector.load %arg15[%c0_350, %c0_351, %c0_352] : memref<2x8x32xf32, #tpu.memory_space<vmem>>, vector<1x8x32xf32>
    %612 = vector.shape_cast %611 : vector<1x8x32xf32> to vector<8x32xf32>
    %613 = tpu.concatenate %612, %608 in 1 : vector<8x32xf32>, vector<8x32xf32> -> vector<8x64xf32>
    %614 = arith.truncf %613 : vector<8x64xf32> to vector<8x64xbf16>
    %cst_353 = arith.constant dense<0.000000e+00> : vector<8x128xf32>
    %615 = tpu.matmul %614, %573, %cst_353 {dimension_numbers = #tpu.dot_dimension_numbers<[1], [0], [0], [1], [0, 0, 1, 1], [], []>} : vector<8x64xbf16>, vector<64x128xbf16>, vector<8x128xf32> -> vector<8x128xf32>
    %616 = vector.broadcast %575 : vector<1x128xf32> to vector<8x128xf32>
    %617 = arith.addf %615, %616 : vector<8x128xf32>
    %618 = arith.negf %617 : vector<8x128xf32>
    %619 = math.exp %618 : vector<8x128xf32>
    %cst_354 = arith.constant 1.000000e+00 : f32
    %620 = vector.broadcast %cst_354 : f32 to vector<8x128xf32>
    %621 = arith.addf %620, %619 : vector<8x128xf32>
    %622 = arith.divf %620, %621 : vector<8x128xf32>
    %623 = math.tanh %617 : vector<8x128xf32>
    %624 = vector.extract_strided_slice %622 {offsets = [0, 32], sizes = [8, 32], strides = [1, 1]} : vector<8x128xf32> to vector<8x32xf32>
    %625 = arith.mulf %624, %610 : vector<8x32xf32>
    %626 = vector.extract_strided_slice %622 {offsets = [0, 0], sizes = [8, 32], strides = [1, 1]} : vector<8x128xf32> to vector<8x32xf32>
    %627 = vector.extract_strided_slice %623 {offsets = [0, 64], sizes = [8, 32], strides = [1, 1]} : vector<8x128xf32> to vector<8x32xf32>
    %628 = arith.mulf %626, %627 : vector<8x32xf32>
    %629 = arith.addf %625, %628 : vector<8x32xf32>
    %630 = vector.extract_strided_slice %622 {offsets = [0, 96], sizes = [8, 32], strides = [1, 1]} : vector<8x128xf32> to vector<8x32xf32>
    %631 = math.tanh %629 : vector<8x32xf32>
    %632 = arith.mulf %630, %631 : vector<8x32xf32>
    %c1_355 = arith.constant 1 : index
    %c0_356 = arith.constant 0 : index
    %c0_357 = arith.constant 0 : index
    %633 = vector.load %arg16[%c1_355, %c0_356, %c0_357] : memref<2x8x32xf32, #tpu.memory_space<vmem>>, vector<1x8x32xf32>
    %634 = vector.shape_cast %633 : vector<1x8x32xf32> to vector<8x32xf32>
    %635 = vector.shape_cast %629 : vector<8x32xf32> to vector<1x8x32xf32>
    tpu.vector_store %arg16[%c1_355, %c0_356, %c0_357], %635 {strides = array<i32>} : memref<2x8x32xf32, #tpu.memory_space<vmem>>, vector<1x8x32xf32>,
    %c1_358 = arith.constant 1 : index
    %c0_359 = arith.constant 0 : index
    %c0_360 = arith.constant 0 : index
    %636 = vector.load %arg15[%c1_358, %c0_359, %c0_360] : memref<2x8x32xf32, #tpu.memory_space<vmem>>, vector<1x8x32xf32>
    %637 = vector.shape_cast %636 : vector<1x8x32xf32> to vector<8x32xf32>
    %638 = vector.shape_cast %632 : vector<8x32xf32> to vector<1x8x32xf32>
    tpu.vector_store %arg15[%c1_358, %c0_359, %c0_360], %638 {strides = array<i32>} : memref<2x8x32xf32, #tpu.memory_space<vmem>>, vector<1x8x32xf32>,
    %639 = arith.truncf %632 : vector<8x32xf32> to vector<8x32xbf16>
    %cst_361 = arith.constant dense<0.000000e+00> : vector<8x128xf32>
    %640 = tpu.matmul %639, %576, %cst_361 {dimension_numbers = #tpu.dot_dimension_numbers<[1], [0], [0], [1], [0, 0, 1, 1], [], []>} : vector<8x32xbf16>, vector<32x128xbf16>, vector<8x128xf32> -> vector<8x128xf32>
    %641 = vector.broadcast %577 : vector<1x128xf32> to vector<8x128xf32>
    %642 = arith.addf %640, %641 : vector<8x128xf32>
    %c0_362 = arith.constant 0 : index
    %c0_363 = arith.constant 0 : index
    %643 = vector.load %arg12[%c0_362, %c0_363] : memref<64x128xf32, #tpu.memory_space<vmem>>, vector<8x128xf32>
    tpu.vector_store %arg12[%c0_362, %c0_363], %642 {strides = array<i32>} : memref<64x128xf32, #tpu.memory_space<vmem>>, vector<8x128xf32>,
    %c0_364 = arith.constant 0 : index
    %c0_365 = arith.constant 0 : index
    %c0_366 = arith.constant 0 : index
    %644 = vector.load %arg15[%c0_364, %c0_365, %c0_366] : memref<2x8x32xf32, #tpu.memory_space<vmem>>, vector<1x8x32xf32>
    %645 = vector.shape_cast %644 : vector<1x8x32xf32> to vector<8x32xf32>
    %c0_367 = arith.constant 0 : index
    %c0_368 = arith.constant 0 : index
    %c0_369 = arith.constant 0 : index
    %646 = vector.load %arg16[%c0_367, %c0_368, %c0_369] : memref<2x8x32xf32, #tpu.memory_space<vmem>>, vector<1x8x32xf32>
    %647 = vector.shape_cast %646 : vector<1x8x32xf32> to vector<8x32xf32>
    %c8_370 = arith.constant 8 : index
    %c0_371 = arith.constant 0 : index
    %648 = vector.load %arg14[%c8_370, %c0_371] : memref<64x128xf32, #tpu.memory_space<vmem>>, vector<8x128xf32>
    %649 = arith.truncf %645 : vector<8x32xf32> to vector<8x32xbf16>
    %cst_372 = arith.constant dense<0.000000e+00> : vector<8x128xf32>
    %650 = tpu.matmul %649, %571, %cst_372 {dimension_numbers = #tpu.dot_dimension_numbers<[1], [0], [0], [1], [0, 0, 1, 1], [], []>} : vector<8x32xbf16>, vector<32x128xbf16>, vector<8x128xf32> -> vector<8x128xf32>
    %651 = arith.addf %648, %650 : vector<8x128xf32>
    %652 = arith.negf %651 : vector<8x128xf32>
    %653 = math.exp %652 : vector<8x128xf32>
    %cst_373 = arith.constant 1.000000e+00 : f32
    %654 = vector.broadcast %cst_373 : f32 to vector<8x128xf32>
    %655 = arith.addf %654, %653 : vector<8x128xf32>
    %656 = arith.divf %654, %655 : vector<8x128xf32>
    %657 = math.tanh %651 : vector<8x128xf32>
    %658 = vector.extract_strided_slice %656 {offsets = [0, 32], sizes = [8, 32], strides = [1, 1]} : vector<8x128xf32> to vector<8x32xf32>
    %659 = arith.mulf %658, %647 : vector<8x32xf32>
    %660 = vector.extract_strided_slice %656 {offsets = [0, 0], sizes = [8, 32], strides = [1, 1]} : vector<8x128xf32> to vector<8x32xf32>
    %661 = vector.extract_strided_slice %657 {offsets = [0, 64], sizes = [8, 32], strides = [1, 1]} : vector<8x128xf32> to vector<8x32xf32>
    %662 = arith.mulf %660, %661 : vector<8x32xf32>
    %663 = arith.addf %659, %662 : vector<8x32xf32>
    %664 = vector.extract_strided_slice %656 {offsets = [0, 96], sizes = [8, 32], strides = [1, 1]} : vector<8x128xf32> to vector<8x32xf32>
    %665 = math.tanh %663 : vector<8x32xf32>
    %666 = arith.mulf %664, %665 : vector<8x32xf32>
    %c0_374 = arith.constant 0 : index
    %c0_375 = arith.constant 0 : index
    %c0_376 = arith.constant 0 : index
    %667 = vector.load %arg16[%c0_374, %c0_375, %c0_376] : memref<2x8x32xf32, #tpu.memory_space<vmem>>, vector<1x8x32xf32>
    %668 = vector.shape_cast %667 : vector<1x8x32xf32> to vector<8x32xf32>
    %669 = vector.shape_cast %663 : vector<8x32xf32> to vector<1x8x32xf32>
    tpu.vector_store %arg16[%c0_374, %c0_375, %c0_376], %669 {strides = array<i32>} : memref<2x8x32xf32, #tpu.memory_space<vmem>>, vector<1x8x32xf32>,
    %c0_377 = arith.constant 0 : index
    %c0_378 = arith.constant 0 : index
    %c0_379 = arith.constant 0 : index
    %670 = vector.load %arg15[%c0_377, %c0_378, %c0_379] : memref<2x8x32xf32, #tpu.memory_space<vmem>>, vector<1x8x32xf32>
    %671 = vector.shape_cast %670 : vector<1x8x32xf32> to vector<8x32xf32>
    %672 = vector.shape_cast %666 : vector<8x32xf32> to vector<1x8x32xf32>
    tpu.vector_store %arg15[%c0_377, %c0_378, %c0_379], %672 {strides = array<i32>} : memref<2x8x32xf32, #tpu.memory_space<vmem>>, vector<1x8x32xf32>,
    %c1_380 = arith.constant 1 : index
    %c0_381 = arith.constant 0 : index
    %c0_382 = arith.constant 0 : index
    %673 = vector.load %arg15[%c1_380, %c0_381, %c0_382] : memref<2x8x32xf32, #tpu.memory_space<vmem>>, vector<1x8x32xf32>
    %674 = vector.shape_cast %673 : vector<1x8x32xf32> to vector<8x32xf32>
    %c1_383 = arith.constant 1 : index
    %c0_384 = arith.constant 0 : index
    %c0_385 = arith.constant 0 : index
    %675 = vector.load %arg16[%c1_383, %c0_384, %c0_385] : memref<2x8x32xf32, #tpu.memory_space<vmem>>, vector<1x8x32xf32>
    %676 = vector.shape_cast %675 : vector<1x8x32xf32> to vector<8x32xf32>
    %c0_386 = arith.constant 0 : index
    %c0_387 = arith.constant 0 : index
    %c0_388 = arith.constant 0 : index
    %677 = vector.load %arg15[%c0_386, %c0_387, %c0_388] : memref<2x8x32xf32, #tpu.memory_space<vmem>>, vector<1x8x32xf32>
    %678 = vector.shape_cast %677 : vector<1x8x32xf32> to vector<8x32xf32>
    %679 = tpu.concatenate %678, %674 in 1 : vector<8x32xf32>, vector<8x32xf32> -> vector<8x64xf32>
    %680 = arith.truncf %679 : vector<8x64xf32> to vector<8x64xbf16>
    %cst_389 = arith.constant dense<0.000000e+00> : vector<8x128xf32>
    %681 = tpu.matmul %680, %573, %cst_389 {dimension_numbers = #tpu.dot_dimension_numbers<[1], [0], [0], [1], [0, 0, 1, 1], [], []>} : vector<8x64xbf16>, vector<64x128xbf16>, vector<8x128xf32> -> vector<8x128xf32>
    %682 = vector.broadcast %575 : vector<1x128xf32> to vector<8x128xf32>
    %683 = arith.addf %681, %682 : vector<8x128xf32>
    %684 = arith.negf %683 : vector<8x128xf32>
    %685 = math.exp %684 : vector<8x128xf32>
    %cst_390 = arith.constant 1.000000e+00 : f32
    %686 = vector.broadcast %cst_390 : f32 to vector<8x128xf32>
    %687 = arith.addf %686, %685 : vector<8x128xf32>
    %688 = arith.divf %686, %687 : vector<8x128xf32>
    %689 = math.tanh %683 : vector<8x128xf32>
    %690 = vector.extract_strided_slice %688 {offsets = [0, 32], sizes = [8, 32], strides = [1, 1]} : vector<8x128xf32> to vector<8x32xf32>
    %691 = arith.mulf %690, %676 : vector<8x32xf32>
    %692 = vector.extract_strided_slice %688 {offsets = [0, 0], sizes = [8, 32], strides = [1, 1]} : vector<8x128xf32> to vector<8x32xf32>
    %693 = vector.extract_strided_slice %689 {offsets = [0, 64], sizes = [8, 32], strides = [1, 1]} : vector<8x128xf32> to vector<8x32xf32>
    %694 = arith.mulf %692, %693 : vector<8x32xf32>
    %695 = arith.addf %691, %694 : vector<8x32xf32>
    %696 = vector.extract_strided_slice %688 {offsets = [0, 96], sizes = [8, 32], strides = [1, 1]} : vector<8x128xf32> to vector<8x32xf32>
    %697 = math.tanh %695 : vector<8x32xf32>
    %698 = arith.mulf %696, %697 : vector<8x32xf32>
    %c1_391 = arith.constant 1 : index
    %c0_392 = arith.constant 0 : index
    %c0_393 = arith.constant 0 : index
    %699 = vector.load %arg16[%c1_391, %c0_392, %c0_393] : memref<2x8x32xf32, #tpu.memory_space<vmem>>, vector<1x8x32xf32>
    %700 = vector.shape_cast %699 : vector<1x8x32xf32> to vector<8x32xf32>
    %701 = vector.shape_cast %695 : vector<8x32xf32> to vector<1x8x32xf32>
    tpu.vector_store %arg16[%c1_391, %c0_392, %c0_393], %701 {strides = array<i32>} : memref<2x8x32xf32, #tpu.memory_space<vmem>>, vector<1x8x32xf32>,
    %c1_394 = arith.constant 1 : index
    %c0_395 = arith.constant 0 : index
    %c0_396 = arith.constant 0 : index
    %702 = vector.load %arg15[%c1_394, %c0_395, %c0_396] : memref<2x8x32xf32, #tpu.memory_space<vmem>>, vector<1x8x32xf32>
    %703 = vector.shape_cast %702 : vector<1x8x32xf32> to vector<8x32xf32>
    %704 = vector.shape_cast %698 : vector<8x32xf32> to vector<1x8x32xf32>
    tpu.vector_store %arg15[%c1_394, %c0_395, %c0_396], %704 {strides = array<i32>} : memref<2x8x32xf32, #tpu.memory_space<vmem>>, vector<1x8x32xf32>,
    %705 = arith.truncf %698 : vector<8x32xf32> to vector<8x32xbf16>
    %cst_397 = arith.constant dense<0.000000e+00> : vector<8x128xf32>
    %706 = tpu.matmul %705, %576, %cst_397 {dimension_numbers = #tpu.dot_dimension_numbers<[1], [0], [0], [1], [0, 0, 1, 1], [], []>} : vector<8x32xbf16>, vector<32x128xbf16>, vector<8x128xf32> -> vector<8x128xf32>
    %707 = vector.broadcast %577 : vector<1x128xf32> to vector<8x128xf32>
    %708 = arith.addf %706, %707 : vector<8x128xf32>
    %c8_398 = arith.constant 8 : index
    %c0_399 = arith.constant 0 : index
    %709 = vector.load %arg12[%c8_398, %c0_399] : memref<64x128xf32, #tpu.memory_space<vmem>>, vector<8x128xf32>
    tpu.vector_store %arg12[%c8_398, %c0_399], %708 {strides = array<i32>} : memref<64x128xf32, #tpu.memory_space<vmem>>, vector<8x128xf32>,
    %c0_400 = arith.constant 0 : index
    %c0_401 = arith.constant 0 : index
    %c0_402 = arith.constant 0 : index
    %710 = vector.load %arg15[%c0_400, %c0_401, %c0_402] : memref<2x8x32xf32, #tpu.memory_space<vmem>>, vector<1x8x32xf32>
    %711 = vector.shape_cast %710 : vector<1x8x32xf32> to vector<8x32xf32>
    %c0_403 = arith.constant 0 : index
    %c0_404 = arith.constant 0 : index
    %c0_405 = arith.constant 0 : index
    %712 = vector.load %arg16[%c0_403, %c0_404, %c0_405] : memref<2x8x32xf32, #tpu.memory_space<vmem>>, vector<1x8x32xf32>
    %713 = vector.shape_cast %712 : vector<1x8x32xf32> to vector<8x32xf32>
    %c16_406 = arith.constant 16 : index
    %c0_407 = arith.constant 0 : index
    %714 = vector.load %arg14[%c16_406, %c0_407] : memref<64x128xf32, #tpu.memory_space<vmem>>, vector<8x128xf32>
    %715 = arith.truncf %711 : vector<8x32xf32> to vector<8x32xbf16>
    %cst_408 = arith.constant dense<0.000000e+00> : vector<8x128xf32>
    %716 = tpu.matmul %715, %571, %cst_408 {dimension_numbers = #tpu.dot_dimension_numbers<[1], [0], [0], [1], [0, 0, 1, 1], [], []>} : vector<8x32xbf16>, vector<32x128xbf16>, vector<8x128xf32> -> vector<8x128xf32>
    %717 = arith.addf %714, %716 : vector<8x128xf32>
    %718 = arith.negf %717 : vector<8x128xf32>
    %719 = math.exp %718 : vector<8x128xf32>
    %cst_409 = arith.constant 1.000000e+00 : f32
    %720 = vector.broadcast %cst_409 : f32 to vector<8x128xf32>
    %721 = arith.addf %720, %719 : vector<8x128xf32>
    %722 = arith.divf %720, %721 : vector<8x128xf32>
    %723 = math.tanh %717 : vector<8x128xf32>
    %724 = vector.extract_strided_slice %722 {offsets = [0, 32], sizes = [8, 32], strides = [1, 1]} : vector<8x128xf32> to vector<8x32xf32>
    %725 = arith.mulf %724, %713 : vector<8x32xf32>
    %726 = vector.extract_strided_slice %722 {offsets = [0, 0], sizes = [8, 32], strides = [1, 1]} : vector<8x128xf32> to vector<8x32xf32>
    %727 = vector.extract_strided_slice %723 {offsets = [0, 64], sizes = [8, 32], strides = [1, 1]} : vector<8x128xf32> to vector<8x32xf32>
    %728 = arith.mulf %726, %727 : vector<8x32xf32>
    %729 = arith.addf %725, %728 : vector<8x32xf32>
    %730 = vector.extract_strided_slice %722 {offsets = [0, 96], sizes = [8, 32], strides = [1, 1]} : vector<8x128xf32> to vector<8x32xf32>
    %731 = math.tanh %729 : vector<8x32xf32>
    %732 = arith.mulf %730, %731 : vector<8x32xf32>
    %c0_410 = arith.constant 0 : index
    %c0_411 = arith.constant 0 : index
    %c0_412 = arith.constant 0 : index
    %733 = vector.load %arg16[%c0_410, %c0_411, %c0_412] : memref<2x8x32xf32, #tpu.memory_space<vmem>>, vector<1x8x32xf32>
    %734 = vector.shape_cast %733 : vector<1x8x32xf32> to vector<8x32xf32>
    %735 = vector.shape_cast %729 : vector<8x32xf32> to vector<1x8x32xf32>
    tpu.vector_store %arg16[%c0_410, %c0_411, %c0_412], %735 {strides = array<i32>} : memref<2x8x32xf32, #tpu.memory_space<vmem>>, vector<1x8x32xf32>,
    %c0_413 = arith.constant 0 : index
    %c0_414 = arith.constant 0 : index
    %c0_415 = arith.constant 0 : index
    %736 = vector.load %arg15[%c0_413, %c0_414, %c0_415] : memref<2x8x32xf32, #tpu.memory_space<vmem>>, vector<1x8x32xf32>
    %737 = vector.shape_cast %736 : vector<1x8x32xf32> to vector<8x32xf32>
    %738 = vector.shape_cast %732 : vector<8x32xf32> to vector<1x8x32xf32>
    tpu.vector_store %arg15[%c0_413, %c0_414, %c0_415], %738 {strides = array<i32>} : memref<2x8x32xf32, #tpu.memory_space<vmem>>, vector<1x8x32xf32>,
    %c1_416 = arith.constant 1 : index
    %c0_417 = arith.constant 0 : index
    %c0_418 = arith.constant 0 : index
    %739 = vector.load %arg15[%c1_416, %c0_417, %c0_418] : memref<2x8x32xf32, #tpu.memory_space<vmem>>, vector<1x8x32xf32>
    %740 = vector.shape_cast %739 : vector<1x8x32xf32> to vector<8x32xf32>
    %c1_419 = arith.constant 1 : index
    %c0_420 = arith.constant 0 : index
    %c0_421 = arith.constant 0 : index
    %741 = vector.load %arg16[%c1_419, %c0_420, %c0_421] : memref<2x8x32xf32, #tpu.memory_space<vmem>>, vector<1x8x32xf32>
    %742 = vector.shape_cast %741 : vector<1x8x32xf32> to vector<8x32xf32>
    %c0_422 = arith.constant 0 : index
    %c0_423 = arith.constant 0 : index
    %c0_424 = arith.constant 0 : index
    %743 = vector.load %arg15[%c0_422, %c0_423, %c0_424] : memref<2x8x32xf32, #tpu.memory_space<vmem>>, vector<1x8x32xf32>
    %744 = vector.shape_cast %743 : vector<1x8x32xf32> to vector<8x32xf32>
    %745 = tpu.concatenate %744, %740 in 1 : vector<8x32xf32>, vector<8x32xf32> -> vector<8x64xf32>
    %746 = arith.truncf %745 : vector<8x64xf32> to vector<8x64xbf16>
    %cst_425 = arith.constant dense<0.000000e+00> : vector<8x128xf32>
    %747 = tpu.matmul %746, %573, %cst_425 {dimension_numbers = #tpu.dot_dimension_numbers<[1], [0], [0], [1], [0, 0, 1, 1], [], []>} : vector<8x64xbf16>, vector<64x128xbf16>, vector<8x128xf32> -> vector<8x128xf32>
    %748 = vector.broadcast %575 : vector<1x128xf32> to vector<8x128xf32>
    %749 = arith.addf %747, %748 : vector<8x128xf32>
    %750 = arith.negf %749 : vector<8x128xf32>
    %751 = math.exp %750 : vector<8x128xf32>
    %cst_426 = arith.constant 1.000000e+00 : f32
    %752 = vector.broadcast %cst_426 : f32 to vector<8x128xf32>
    %753 = arith.addf %752, %751 : vector<8x128xf32>
    %754 = arith.divf %752, %753 : vector<8x128xf32>
    %755 = math.tanh %749 : vector<8x128xf32>
    %756 = vector.extract_strided_slice %754 {offsets = [0, 32], sizes = [8, 32], strides = [1, 1]} : vector<8x128xf32> to vector<8x32xf32>
    %757 = arith.mulf %756, %742 : vector<8x32xf32>
    %758 = vector.extract_strided_slice %754 {offsets = [0, 0], sizes = [8, 32], strides = [1, 1]} : vector<8x128xf32> to vector<8x32xf32>
    %759 = vector.extract_strided_slice %755 {offsets = [0, 64], sizes = [8, 32], strides = [1, 1]} : vector<8x128xf32> to vector<8x32xf32>
    %760 = arith.mulf %758, %759 : vector<8x32xf32>
    %761 = arith.addf %757, %760 : vector<8x32xf32>
    %762 = vector.extract_strided_slice %754 {offsets = [0, 96], sizes = [8, 32], strides = [1, 1]} : vector<8x128xf32> to vector<8x32xf32>
    %763 = math.tanh %761 : vector<8x32xf32>
    %764 = arith.mulf %762, %763 : vector<8x32xf32>
    %c1_427 = arith.constant 1 : index
    %c0_428 = arith.constant 0 : index
    %c0_429 = arith.constant 0 : index
    %765 = vector.load %arg16[%c1_427, %c0_428, %c0_429] : memref<2x8x32xf32, #tpu.memory_space<vmem>>, vector<1x8x32xf32>
    %766 = vector.shape_cast %765 : vector<1x8x32xf32> to vector<8x32xf32>
    %767 = vector.shape_cast %761 : vector<8x32xf32> to vector<1x8x32xf32>
    tpu.vector_store %arg16[%c1_427, %c0_428, %c0_429], %767 {strides = array<i32>} : memref<2x8x32xf32, #tpu.memory_space<vmem>>, vector<1x8x32xf32>,
    %c1_430 = arith.constant 1 : index
    %c0_431 = arith.constant 0 : index
    %c0_432 = arith.constant 0 : index
    %768 = vector.load %arg15[%c1_430, %c0_431, %c0_432] : memref<2x8x32xf32, #tpu.memory_space<vmem>>, vector<1x8x32xf32>
    %769 = vector.shape_cast %768 : vector<1x8x32xf32> to vector<8x32xf32>
    %770 = vector.shape_cast %764 : vector<8x32xf32> to vector<1x8x32xf32>
    tpu.vector_store %arg15[%c1_430, %c0_431, %c0_432], %770 {strides = array<i32>} : memref<2x8x32xf32, #tpu.memory_space<vmem>>, vector<1x8x32xf32>,
    %771 = arith.truncf %764 : vector<8x32xf32> to vector<8x32xbf16>
    %cst_433 = arith.constant dense<0.000000e+00> : vector<8x128xf32>
    %772 = tpu.matmul %771, %576, %cst_433 {dimension_numbers = #tpu.dot_dimension_numbers<[1], [0], [0], [1], [0, 0, 1, 1], [], []>} : vector<8x32xbf16>, vector<32x128xbf16>, vector<8x128xf32> -> vector<8x128xf32>
    %773 = vector.broadcast %577 : vector<1x128xf32> to vector<8x128xf32>
    %774 = arith.addf %772, %773 : vector<8x128xf32>
    %c16_434 = arith.constant 16 : index
    %c0_435 = arith.constant 0 : index
    %775 = vector.load %arg12[%c16_434, %c0_435] : memref<64x128xf32, #tpu.memory_space<vmem>>, vector<8x128xf32>
    tpu.vector_store %arg12[%c16_434, %c0_435], %774 {strides = array<i32>} : memref<64x128xf32, #tpu.memory_space<vmem>>, vector<8x128xf32>,
    %c0_436 = arith.constant 0 : index
    %c0_437 = arith.constant 0 : index
    %c0_438 = arith.constant 0 : index
    %776 = vector.load %arg15[%c0_436, %c0_437, %c0_438] : memref<2x8x32xf32, #tpu.memory_space<vmem>>, vector<1x8x32xf32>
    %777 = vector.shape_cast %776 : vector<1x8x32xf32> to vector<8x32xf32>
    %c0_439 = arith.constant 0 : index
    %c0_440 = arith.constant 0 : index
    %c0_441 = arith.constant 0 : index
    %778 = vector.load %arg16[%c0_439, %c0_440, %c0_441] : memref<2x8x32xf32, #tpu.memory_space<vmem>>, vector<1x8x32xf32>
    %779 = vector.shape_cast %778 : vector<1x8x32xf32> to vector<8x32xf32>
    %c24_442 = arith.constant 24 : index
    %c0_443 = arith.constant 0 : index
    %780 = vector.load %arg14[%c24_442, %c0_443] : memref<64x128xf32, #tpu.memory_space<vmem>>, vector<8x128xf32>
    %781 = arith.truncf %777 : vector<8x32xf32> to vector<8x32xbf16>
    %cst_444 = arith.constant dense<0.000000e+00> : vector<8x128xf32>
    %782 = tpu.matmul %781, %571, %cst_444 {dimension_numbers = #tpu.dot_dimension_numbers<[1], [0], [0], [1], [0, 0, 1, 1], [], []>} : vector<8x32xbf16>, vector<32x128xbf16>, vector<8x128xf32> -> vector<8x128xf32>
    %783 = arith.addf %780, %782 : vector<8x128xf32>
    %784 = arith.negf %783 : vector<8x128xf32>
    %785 = math.exp %784 : vector<8x128xf32>
    %cst_445 = arith.constant 1.000000e+00 : f32
    %786 = vector.broadcast %cst_445 : f32 to vector<8x128xf32>
    %787 = arith.addf %786, %785 : vector<8x128xf32>
    %788 = arith.divf %786, %787 : vector<8x128xf32>
    %789 = math.tanh %783 : vector<8x128xf32>
    %790 = vector.extract_strided_slice %788 {offsets = [0, 32], sizes = [8, 32], strides = [1, 1]} : vector<8x128xf32> to vector<8x32xf32>
    %791 = arith.mulf %790, %779 : vector<8x32xf32>
    %792 = vector.extract_strided_slice %788 {offsets = [0, 0], sizes = [8, 32], strides = [1, 1]} : vector<8x128xf32> to vector<8x32xf32>
    %793 = vector.extract_strided_slice %789 {offsets = [0, 64], sizes = [8, 32], strides = [1, 1]} : vector<8x128xf32> to vector<8x32xf32>
    %794 = arith.mulf %792, %793 : vector<8x32xf32>
    %795 = arith.addf %791, %794 : vector<8x32xf32>
    %796 = vector.extract_strided_slice %788 {offsets = [0, 96], sizes = [8, 32], strides = [1, 1]} : vector<8x128xf32> to vector<8x32xf32>
    %797 = math.tanh %795 : vector<8x32xf32>
    %798 = arith.mulf %796, %797 : vector<8x32xf32>
    %c0_446 = arith.constant 0 : index
    %c0_447 = arith.constant 0 : index
    %c0_448 = arith.constant 0 : index
    %799 = vector.load %arg16[%c0_446, %c0_447, %c0_448] : memref<2x8x32xf32, #tpu.memory_space<vmem>>, vector<1x8x32xf32>
    %800 = vector.shape_cast %799 : vector<1x8x32xf32> to vector<8x32xf32>
    %801 = vector.shape_cast %795 : vector<8x32xf32> to vector<1x8x32xf32>
    tpu.vector_store %arg16[%c0_446, %c0_447, %c0_448], %801 {strides = array<i32>} : memref<2x8x32xf32, #tpu.memory_space<vmem>>, vector<1x8x32xf32>,
    %c0_449 = arith.constant 0 : index
    %c0_450 = arith.constant 0 : index
    %c0_451 = arith.constant 0 : index
    %802 = vector.load %arg15[%c0_449, %c0_450, %c0_451] : memref<2x8x32xf32, #tpu.memory_space<vmem>>, vector<1x8x32xf32>
    %803 = vector.shape_cast %802 : vector<1x8x32xf32> to vector<8x32xf32>
    %804 = vector.shape_cast %798 : vector<8x32xf32> to vector<1x8x32xf32>
    tpu.vector_store %arg15[%c0_449, %c0_450, %c0_451], %804 {strides = array<i32>} : memref<2x8x32xf32, #tpu.memory_space<vmem>>, vector<1x8x32xf32>,
    %c1_452 = arith.constant 1 : index
    %c0_453 = arith.constant 0 : index
    %c0_454 = arith.constant 0 : index
    %805 = vector.load %arg15[%c1_452, %c0_453, %c0_454] : memref<2x8x32xf32, #tpu.memory_space<vmem>>, vector<1x8x32xf32>
    %806 = vector.shape_cast %805 : vector<1x8x32xf32> to vector<8x32xf32>
    %c1_455 = arith.constant 1 : index
    %c0_456 = arith.constant 0 : index
    %c0_457 = arith.constant 0 : index
    %807 = vector.load %arg16[%c1_455, %c0_456, %c0_457] : memref<2x8x32xf32, #tpu.memory_space<vmem>>, vector<1x8x32xf32>
    %808 = vector.shape_cast %807 : vector<1x8x32xf32> to vector<8x32xf32>
    %c0_458 = arith.constant 0 : index
    %c0_459 = arith.constant 0 : index
    %c0_460 = arith.constant 0 : index
    %809 = vector.load %arg15[%c0_458, %c0_459, %c0_460] : memref<2x8x32xf32, #tpu.memory_space<vmem>>, vector<1x8x32xf32>
    %810 = vector.shape_cast %809 : vector<1x8x32xf32> to vector<8x32xf32>
    %811 = tpu.concatenate %810, %806 in 1 : vector<8x32xf32>, vector<8x32xf32> -> vector<8x64xf32>
    %812 = arith.truncf %811 : vector<8x64xf32> to vector<8x64xbf16>
    %cst_461 = arith.constant dense<0.000000e+00> : vector<8x128xf32>
    %813 = tpu.matmul %812, %573, %cst_461 {dimension_numbers = #tpu.dot_dimension_numbers<[1], [0], [0], [1], [0, 0, 1, 1], [], []>} : vector<8x64xbf16>, vector<64x128xbf16>, vector<8x128xf32> -> vector<8x128xf32>
    %814 = vector.broadcast %575 : vector<1x128xf32> to vector<8x128xf32>
    %815 = arith.addf %813, %814 : vector<8x128xf32>
    %816 = arith.negf %815 : vector<8x128xf32>
    %817 = math.exp %816 : vector<8x128xf32>
    %cst_462 = arith.constant 1.000000e+00 : f32
    %818 = vector.broadcast %cst_462 : f32 to vector<8x128xf32>
    %819 = arith.addf %818, %817 : vector<8x128xf32>
    %820 = arith.divf %818, %819 : vector<8x128xf32>
    %821 = math.tanh %815 : vector<8x128xf32>
    %822 = vector.extract_strided_slice %820 {offsets = [0, 32], sizes = [8, 32], strides = [1, 1]} : vector<8x128xf32> to vector<8x32xf32>
    %823 = arith.mulf %822, %808 : vector<8x32xf32>
    %824 = vector.extract_strided_slice %820 {offsets = [0, 0], sizes = [8, 32], strides = [1, 1]} : vector<8x128xf32> to vector<8x32xf32>
    %825 = vector.extract_strided_slice %821 {offsets = [0, 64], sizes = [8, 32], strides = [1, 1]} : vector<8x128xf32> to vector<8x32xf32>
    %826 = arith.mulf %824, %825 : vector<8x32xf32>
    %827 = arith.addf %823, %826 : vector<8x32xf32>
    %828 = vector.extract_strided_slice %820 {offsets = [0, 96], sizes = [8, 32], strides = [1, 1]} : vector<8x128xf32> to vector<8x32xf32>
    %829 = math.tanh %827 : vector<8x32xf32>
    %830 = arith.mulf %828, %829 : vector<8x32xf32>
    %c1_463 = arith.constant 1 : index
    %c0_464 = arith.constant 0 : index
    %c0_465 = arith.constant 0 : index
    %831 = vector.load %arg16[%c1_463, %c0_464, %c0_465] : memref<2x8x32xf32, #tpu.memory_space<vmem>>, vector<1x8x32xf32>
    %832 = vector.shape_cast %831 : vector<1x8x32xf32> to vector<8x32xf32>
    %833 = vector.shape_cast %827 : vector<8x32xf32> to vector<1x8x32xf32>
    tpu.vector_store %arg16[%c1_463, %c0_464, %c0_465], %833 {strides = array<i32>} : memref<2x8x32xf32, #tpu.memory_space<vmem>>, vector<1x8x32xf32>,
    %c1_466 = arith.constant 1 : index
    %c0_467 = arith.constant 0 : index
    %c0_468 = arith.constant 0 : index
    %834 = vector.load %arg15[%c1_466, %c0_467, %c0_468] : memref<2x8x32xf32, #tpu.memory_space<vmem>>, vector<1x8x32xf32>
    %835 = vector.shape_cast %834 : vector<1x8x32xf32> to vector<8x32xf32>
    %836 = vector.shape_cast %830 : vector<8x32xf32> to vector<1x8x32xf32>
    tpu.vector_store %arg15[%c1_466, %c0_467, %c0_468], %836 {strides = array<i32>} : memref<2x8x32xf32, #tpu.memory_space<vmem>>, vector<1x8x32xf32>,
    %837 = arith.truncf %830 : vector<8x32xf32> to vector<8x32xbf16>
    %cst_469 = arith.constant dense<0.000000e+00> : vector<8x128xf32>
    %838 = tpu.matmul %837, %576, %cst_469 {dimension_numbers = #tpu.dot_dimension_numbers<[1], [0], [0], [1], [0, 0, 1, 1], [], []>} : vector<8x32xbf16>, vector<32x128xbf16>, vector<8x128xf32> -> vector<8x128xf32>
    %839 = vector.broadcast %577 : vector<1x128xf32> to vector<8x128xf32>
    %840 = arith.addf %838, %839 : vector<8x128xf32>
    %c24_470 = arith.constant 24 : index
    %c0_471 = arith.constant 0 : index
    %841 = vector.load %arg12[%c24_470, %c0_471] : memref<64x128xf32, #tpu.memory_space<vmem>>, vector<8x128xf32>
    tpu.vector_store %arg12[%c24_470, %c0_471], %840 {strides = array<i32>} : memref<64x128xf32, #tpu.memory_space<vmem>>, vector<8x128xf32>,
    %c0_472 = arith.constant 0 : index
    %c0_473 = arith.constant 0 : index
    %c0_474 = arith.constant 0 : index
    %842 = vector.load %arg15[%c0_472, %c0_473, %c0_474] : memref<2x8x32xf32, #tpu.memory_space<vmem>>, vector<1x8x32xf32>
    %843 = vector.shape_cast %842 : vector<1x8x32xf32> to vector<8x32xf32>
    %c0_475 = arith.constant 0 : index
    %c0_476 = arith.constant 0 : index
    %c0_477 = arith.constant 0 : index
    %844 = vector.load %arg16[%c0_475, %c0_476, %c0_477] : memref<2x8x32xf32, #tpu.memory_space<vmem>>, vector<1x8x32xf32>
    %845 = vector.shape_cast %844 : vector<1x8x32xf32> to vector<8x32xf32>
    %c32_478 = arith.constant 32 : index
    %c0_479 = arith.constant 0 : index
    %846 = vector.load %arg14[%c32_478, %c0_479] : memref<64x128xf32, #tpu.memory_space<vmem>>, vector<8x128xf32>
    %847 = arith.truncf %843 : vector<8x32xf32> to vector<8x32xbf16>
    %cst_480 = arith.constant dense<0.000000e+00> : vector<8x128xf32>
    %848 = tpu.matmul %847, %571, %cst_480 {dimension_numbers = #tpu.dot_dimension_numbers<[1], [0], [0], [1], [0, 0, 1, 1], [], []>} : vector<8x32xbf16>, vector<32x128xbf16>, vector<8x128xf32> -> vector<8x128xf32>
    %849 = arith.addf %846, %848 : vector<8x128xf32>
    %850 = arith.negf %849 : vector<8x128xf32>
    %851 = math.exp %850 : vector<8x128xf32>
    %cst_481 = arith.constant 1.000000e+00 : f32
    %852 = vector.broadcast %cst_481 : f32 to vector<8x128xf32>
    %853 = arith.addf %852, %851 : vector<8x128xf32>
    %854 = arith.divf %852, %853 : vector<8x128xf32>
    %855 = math.tanh %849 : vector<8x128xf32>
    %856 = vector.extract_strided_slice %854 {offsets = [0, 32], sizes = [8, 32], strides = [1, 1]} : vector<8x128xf32> to vector<8x32xf32>
    %857 = arith.mulf %856, %845 : vector<8x32xf32>
    %858 = vector.extract_strided_slice %854 {offsets = [0, 0], sizes = [8, 32], strides = [1, 1]} : vector<8x128xf32> to vector<8x32xf32>
    %859 = vector.extract_strided_slice %855 {offsets = [0, 64], sizes = [8, 32], strides = [1, 1]} : vector<8x128xf32> to vector<8x32xf32>
    %860 = arith.mulf %858, %859 : vector<8x32xf32>
    %861 = arith.addf %857, %860 : vector<8x32xf32>
    %862 = vector.extract_strided_slice %854 {offsets = [0, 96], sizes = [8, 32], strides = [1, 1]} : vector<8x128xf32> to vector<8x32xf32>
    %863 = math.tanh %861 : vector<8x32xf32>
    %864 = arith.mulf %862, %863 : vector<8x32xf32>
    %c0_482 = arith.constant 0 : index
    %c0_483 = arith.constant 0 : index
    %c0_484 = arith.constant 0 : index
    %865 = vector.load %arg16[%c0_482, %c0_483, %c0_484] : memref<2x8x32xf32, #tpu.memory_space<vmem>>, vector<1x8x32xf32>
    %866 = vector.shape_cast %865 : vector<1x8x32xf32> to vector<8x32xf32>
    %867 = vector.shape_cast %861 : vector<8x32xf32> to vector<1x8x32xf32>
    tpu.vector_store %arg16[%c0_482, %c0_483, %c0_484], %867 {strides = array<i32>} : memref<2x8x32xf32, #tpu.memory_space<vmem>>, vector<1x8x32xf32>,
    %c0_485 = arith.constant 0 : index
    %c0_486 = arith.constant 0 : index
    %c0_487 = arith.constant 0 : index
    %868 = vector.load %arg15[%c0_485, %c0_486, %c0_487] : memref<2x8x32xf32, #tpu.memory_space<vmem>>, vector<1x8x32xf32>
    %869 = vector.shape_cast %868 : vector<1x8x32xf32> to vector<8x32xf32>
    %870 = vector.shape_cast %864 : vector<8x32xf32> to vector<1x8x32xf32>
    tpu.vector_store %arg15[%c0_485, %c0_486, %c0_487], %870 {strides = array<i32>} : memref<2x8x32xf32, #tpu.memory_space<vmem>>, vector<1x8x32xf32>,
    %c1_488 = arith.constant 1 : index
    %c0_489 = arith.constant 0 : index
    %c0_490 = arith.constant 0 : index
    %871 = vector.load %arg15[%c1_488, %c0_489, %c0_490] : memref<2x8x32xf32, #tpu.memory_space<vmem>>, vector<1x8x32xf32>
    %872 = vector.shape_cast %871 : vector<1x8x32xf32> to vector<8x32xf32>
    %c1_491 = arith.constant 1 : index
    %c0_492 = arith.constant 0 : index
    %c0_493 = arith.constant 0 : index
    %873 = vector.load %arg16[%c1_491, %c0_492, %c0_493] : memref<2x8x32xf32, #tpu.memory_space<vmem>>, vector<1x8x32xf32>
    %874 = vector.shape_cast %873 : vector<1x8x32xf32> to vector<8x32xf32>
    %c0_494 = arith.constant 0 : index
    %c0_495 = arith.constant 0 : index
    %c0_496 = arith.constant 0 : index
    %875 = vector.load %arg15[%c0_494, %c0_495, %c0_496] : memref<2x8x32xf32, #tpu.memory_space<vmem>>, vector<1x8x32xf32>
    %876 = vector.shape_cast %875 : vector<1x8x32xf32> to vector<8x32xf32>
    %877 = tpu.concatenate %876, %872 in 1 : vector<8x32xf32>, vector<8x32xf32> -> vector<8x64xf32>
    %878 = arith.truncf %877 : vector<8x64xf32> to vector<8x64xbf16>
    %cst_497 = arith.constant dense<0.000000e+00> : vector<8x128xf32>
    %879 = tpu.matmul %878, %573, %cst_497 {dimension_numbers = #tpu.dot_dimension_numbers<[1], [0], [0], [1], [0, 0, 1, 1], [], []>} : vector<8x64xbf16>, vector<64x128xbf16>, vector<8x128xf32> -> vector<8x128xf32>
    %880 = vector.broadcast %575 : vector<1x128xf32> to vector<8x128xf32>
    %881 = arith.addf %879, %880 : vector<8x128xf32>
    %882 = arith.negf %881 : vector<8x128xf32>
    %883 = math.exp %882 : vector<8x128xf32>
    %cst_498 = arith.constant 1.000000e+00 : f32
    %884 = vector.broadcast %cst_498 : f32 to vector<8x128xf32>
    %885 = arith.addf %884, %883 : vector<8x128xf32>
    %886 = arith.divf %884, %885 : vector<8x128xf32>
    %887 = math.tanh %881 : vector<8x128xf32>
    %888 = vector.extract_strided_slice %886 {offsets = [0, 32], sizes = [8, 32], strides = [1, 1]} : vector<8x128xf32> to vector<8x32xf32>
    %889 = arith.mulf %888, %874 : vector<8x32xf32>
    %890 = vector.extract_strided_slice %886 {offsets = [0, 0], sizes = [8, 32], strides = [1, 1]} : vector<8x128xf32> to vector<8x32xf32>
    %891 = vector.extract_strided_slice %887 {offsets = [0, 64], sizes = [8, 32], strides = [1, 1]} : vector<8x128xf32> to vector<8x32xf32>
    %892 = arith.mulf %890, %891 : vector<8x32xf32>
    %893 = arith.addf %889, %892 : vector<8x32xf32>
    %894 = vector.extract_strided_slice %886 {offsets = [0, 96], sizes = [8, 32], strides = [1, 1]} : vector<8x128xf32> to vector<8x32xf32>
    %895 = math.tanh %893 : vector<8x32xf32>
    %896 = arith.mulf %894, %895 : vector<8x32xf32>
    %c1_499 = arith.constant 1 : index
    %c0_500 = arith.constant 0 : index
    %c0_501 = arith.constant 0 : index
    %897 = vector.load %arg16[%c1_499, %c0_500, %c0_501] : memref<2x8x32xf32, #tpu.memory_space<vmem>>, vector<1x8x32xf32>
    %898 = vector.shape_cast %897 : vector<1x8x32xf32> to vector<8x32xf32>
    %899 = vector.shape_cast %893 : vector<8x32xf32> to vector<1x8x32xf32>
    tpu.vector_store %arg16[%c1_499, %c0_500, %c0_501], %899 {strides = array<i32>} : memref<2x8x32xf32, #tpu.memory_space<vmem>>, vector<1x8x32xf32>,
    %c1_502 = arith.constant 1 : index
    %c0_503 = arith.constant 0 : index
    %c0_504 = arith.constant 0 : index
    %900 = vector.load %arg15[%c1_502, %c0_503, %c0_504] : memref<2x8x32xf32, #tpu.memory_space<vmem>>, vector<1x8x32xf32>
    %901 = vector.shape_cast %900 : vector<1x8x32xf32> to vector<8x32xf32>
    %902 = vector.shape_cast %896 : vector<8x32xf32> to vector<1x8x32xf32>
    tpu.vector_store %arg15[%c1_502, %c0_503, %c0_504], %902 {strides = array<i32>} : memref<2x8x32xf32, #tpu.memory_space<vmem>>, vector<1x8x32xf32>,
    %903 = arith.truncf %896 : vector<8x32xf32> to vector<8x32xbf16>
    %cst_505 = arith.constant dense<0.000000e+00> : vector<8x128xf32>
    %904 = tpu.matmul %903, %576, %cst_505 {dimension_numbers = #tpu.dot_dimension_numbers<[1], [0], [0], [1], [0, 0, 1, 1], [], []>} : vector<8x32xbf16>, vector<32x128xbf16>, vector<8x128xf32> -> vector<8x128xf32>
    %905 = vector.broadcast %577 : vector<1x128xf32> to vector<8x128xf32>
    %906 = arith.addf %904, %905 : vector<8x128xf32>
    %c32_506 = arith.constant 32 : index
    %c0_507 = arith.constant 0 : index
    %907 = vector.load %arg12[%c32_506, %c0_507] : memref<64x128xf32, #tpu.memory_space<vmem>>, vector<8x128xf32>
    tpu.vector_store %arg12[%c32_506, %c0_507], %906 {strides = array<i32>} : memref<64x128xf32, #tpu.memory_space<vmem>>, vector<8x128xf32>,
    %c0_508 = arith.constant 0 : index
    %c0_509 = arith.constant 0 : index
    %c0_510 = arith.constant 0 : index
    %908 = vector.load %arg15[%c0_508, %c0_509, %c0_510] : memref<2x8x32xf32, #tpu.memory_space<vmem>>, vector<1x8x32xf32>
    %909 = vector.shape_cast %908 : vector<1x8x32xf32> to vector<8x32xf32>
    %c0_511 = arith.constant 0 : index
    %c0_512 = arith.constant 0 : index
    %c0_513 = arith.constant 0 : index
    %910 = vector.load %arg16[%c0_511, %c0_512, %c0_513] : memref<2x8x32xf32, #tpu.memory_space<vmem>>, vector<1x8x32xf32>
    %911 = vector.shape_cast %910 : vector<1x8x32xf32> to vector<8x32xf32>
    %c40_514 = arith.constant 40 : index
    %c0_515 = arith.constant 0 : index
    %912 = vector.load %arg14[%c40_514, %c0_515] : memref<64x128xf32, #tpu.memory_space<vmem>>, vector<8x128xf32>
    %913 = arith.truncf %909 : vector<8x32xf32> to vector<8x32xbf16>
    %cst_516 = arith.constant dense<0.000000e+00> : vector<8x128xf32>
    %914 = tpu.matmul %913, %571, %cst_516 {dimension_numbers = #tpu.dot_dimension_numbers<[1], [0], [0], [1], [0, 0, 1, 1], [], []>} : vector<8x32xbf16>, vector<32x128xbf16>, vector<8x128xf32> -> vector<8x128xf32>
    %915 = arith.addf %912, %914 : vector<8x128xf32>
    %916 = arith.negf %915 : vector<8x128xf32>
    %917 = math.exp %916 : vector<8x128xf32>
    %cst_517 = arith.constant 1.000000e+00 : f32
    %918 = vector.broadcast %cst_517 : f32 to vector<8x128xf32>
    %919 = arith.addf %918, %917 : vector<8x128xf32>
    %920 = arith.divf %918, %919 : vector<8x128xf32>
    %921 = math.tanh %915 : vector<8x128xf32>
    %922 = vector.extract_strided_slice %920 {offsets = [0, 32], sizes = [8, 32], strides = [1, 1]} : vector<8x128xf32> to vector<8x32xf32>
    %923 = arith.mulf %922, %911 : vector<8x32xf32>
    %924 = vector.extract_strided_slice %920 {offsets = [0, 0], sizes = [8, 32], strides = [1, 1]} : vector<8x128xf32> to vector<8x32xf32>
    %925 = vector.extract_strided_slice %921 {offsets = [0, 64], sizes = [8, 32], strides = [1, 1]} : vector<8x128xf32> to vector<8x32xf32>
    %926 = arith.mulf %924, %925 : vector<8x32xf32>
    %927 = arith.addf %923, %926 : vector<8x32xf32>
    %928 = vector.extract_strided_slice %920 {offsets = [0, 96], sizes = [8, 32], strides = [1, 1]} : vector<8x128xf32> to vector<8x32xf32>
    %929 = math.tanh %927 : vector<8x32xf32>
    %930 = arith.mulf %928, %929 : vector<8x32xf32>
    %c0_518 = arith.constant 0 : index
    %c0_519 = arith.constant 0 : index
    %c0_520 = arith.constant 0 : index
    %931 = vector.load %arg16[%c0_518, %c0_519, %c0_520] : memref<2x8x32xf32, #tpu.memory_space<vmem>>, vector<1x8x32xf32>
    %932 = vector.shape_cast %931 : vector<1x8x32xf32> to vector<8x32xf32>
    %933 = vector.shape_cast %927 : vector<8x32xf32> to vector<1x8x32xf32>
    tpu.vector_store %arg16[%c0_518, %c0_519, %c0_520], %933 {strides = array<i32>} : memref<2x8x32xf32, #tpu.memory_space<vmem>>, vector<1x8x32xf32>,
    %c0_521 = arith.constant 0 : index
    %c0_522 = arith.constant 0 : index
    %c0_523 = arith.constant 0 : index
    %934 = vector.load %arg15[%c0_521, %c0_522, %c0_523] : memref<2x8x32xf32, #tpu.memory_space<vmem>>, vector<1x8x32xf32>
    %935 = vector.shape_cast %934 : vector<1x8x32xf32> to vector<8x32xf32>
    %936 = vector.shape_cast %930 : vector<8x32xf32> to vector<1x8x32xf32>
    tpu.vector_store %arg15[%c0_521, %c0_522, %c0_523], %936 {strides = array<i32>} : memref<2x8x32xf32, #tpu.memory_space<vmem>>, vector<1x8x32xf32>,
    %c1_524 = arith.constant 1 : index
    %c0_525 = arith.constant 0 : index
    %c0_526 = arith.constant 0 : index
    %937 = vector.load %arg15[%c1_524, %c0_525, %c0_526] : memref<2x8x32xf32, #tpu.memory_space<vmem>>, vector<1x8x32xf32>
    %938 = vector.shape_cast %937 : vector<1x8x32xf32> to vector<8x32xf32>
    %c1_527 = arith.constant 1 : index
    %c0_528 = arith.constant 0 : index
    %c0_529 = arith.constant 0 : index
    %939 = vector.load %arg16[%c1_527, %c0_528, %c0_529] : memref<2x8x32xf32, #tpu.memory_space<vmem>>, vector<1x8x32xf32>
    %940 = vector.shape_cast %939 : vector<1x8x32xf32> to vector<8x32xf32>
    %c0_530 = arith.constant 0 : index
    %c0_531 = arith.constant 0 : index
    %c0_532 = arith.constant 0 : index
    %941 = vector.load %arg15[%c0_530, %c0_531, %c0_532] : memref<2x8x32xf32, #tpu.memory_space<vmem>>, vector<1x8x32xf32>
    %942 = vector.shape_cast %941 : vector<1x8x32xf32> to vector<8x32xf32>
    %943 = tpu.concatenate %942, %938 in 1 : vector<8x32xf32>, vector<8x32xf32> -> vector<8x64xf32>
    %944 = arith.truncf %943 : vector<8x64xf32> to vector<8x64xbf16>
    %cst_533 = arith.constant dense<0.000000e+00> : vector<8x128xf32>
    %945 = tpu.matmul %944, %573, %cst_533 {dimension_numbers = #tpu.dot_dimension_numbers<[1], [0], [0], [1], [0, 0, 1, 1], [], []>} : vector<8x64xbf16>, vector<64x128xbf16>, vector<8x128xf32> -> vector<8x128xf32>
    %946 = vector.broadcast %575 : vector<1x128xf32> to vector<8x128xf32>
    %947 = arith.addf %945, %946 : vector<8x128xf32>
    %948 = arith.negf %947 : vector<8x128xf32>
    %949 = math.exp %948 : vector<8x128xf32>
    %cst_534 = arith.constant 1.000000e+00 : f32
    %950 = vector.broadcast %cst_534 : f32 to vector<8x128xf32>
    %951 = arith.addf %950, %949 : vector<8x128xf32>
    %952 = arith.divf %950, %951 : vector<8x128xf32>
    %953 = math.tanh %947 : vector<8x128xf32>
    %954 = vector.extract_strided_slice %952 {offsets = [0, 32], sizes = [8, 32], strides = [1, 1]} : vector<8x128xf32> to vector<8x32xf32>
    %955 = arith.mulf %954, %940 : vector<8x32xf32>
    %956 = vector.extract_strided_slice %952 {offsets = [0, 0], sizes = [8, 32], strides = [1, 1]} : vector<8x128xf32> to vector<8x32xf32>
    %957 = vector.extract_strided_slice %953 {offsets = [0, 64], sizes = [8, 32], strides = [1, 1]} : vector<8x128xf32> to vector<8x32xf32>
    %958 = arith.mulf %956, %957 : vector<8x32xf32>
    %959 = arith.addf %955, %958 : vector<8x32xf32>
    %960 = vector.extract_strided_slice %952 {offsets = [0, 96], sizes = [8, 32], strides = [1, 1]} : vector<8x128xf32> to vector<8x32xf32>
    %961 = math.tanh %959 : vector<8x32xf32>
    %962 = arith.mulf %960, %961 : vector<8x32xf32>
    %c1_535 = arith.constant 1 : index
    %c0_536 = arith.constant 0 : index
    %c0_537 = arith.constant 0 : index
    %963 = vector.load %arg16[%c1_535, %c0_536, %c0_537] : memref<2x8x32xf32, #tpu.memory_space<vmem>>, vector<1x8x32xf32>
    %964 = vector.shape_cast %963 : vector<1x8x32xf32> to vector<8x32xf32>
    %965 = vector.shape_cast %959 : vector<8x32xf32> to vector<1x8x32xf32>
    tpu.vector_store %arg16[%c1_535, %c0_536, %c0_537], %965 {strides = array<i32>} : memref<2x8x32xf32, #tpu.memory_space<vmem>>, vector<1x8x32xf32>,
    %c1_538 = arith.constant 1 : index
    %c0_539 = arith.constant 0 : index
    %c0_540 = arith.constant 0 : index
    %966 = vector.load %arg15[%c1_538, %c0_539, %c0_540] : memref<2x8x32xf32, #tpu.memory_space<vmem>>, vector<1x8x32xf32>
    %967 = vector.shape_cast %966 : vector<1x8x32xf32> to vector<8x32xf32>
    %968 = vector.shape_cast %962 : vector<8x32xf32> to vector<1x8x32xf32>
    tpu.vector_store %arg15[%c1_538, %c0_539, %c0_540], %968 {strides = array<i32>} : memref<2x8x32xf32, #tpu.memory_space<vmem>>, vector<1x8x32xf32>,
    %969 = arith.truncf %962 : vector<8x32xf32> to vector<8x32xbf16>
    %cst_541 = arith.constant dense<0.000000e+00> : vector<8x128xf32>
    %970 = tpu.matmul %969, %576, %cst_541 {dimension_numbers = #tpu.dot_dimension_numbers<[1], [0], [0], [1], [0, 0, 1, 1], [], []>} : vector<8x32xbf16>, vector<32x128xbf16>, vector<8x128xf32> -> vector<8x128xf32>
    %971 = vector.broadcast %577 : vector<1x128xf32> to vector<8x128xf32>
    %972 = arith.addf %970, %971 : vector<8x128xf32>
    %c40_542 = arith.constant 40 : index
    %c0_543 = arith.constant 0 : index
    %973 = vector.load %arg12[%c40_542, %c0_543] : memref<64x128xf32, #tpu.memory_space<vmem>>, vector<8x128xf32>
    tpu.vector_store %arg12[%c40_542, %c0_543], %972 {strides = array<i32>} : memref<64x128xf32, #tpu.memory_space<vmem>>, vector<8x128xf32>,
    %c0_544 = arith.constant 0 : index
    %c0_545 = arith.constant 0 : index
    %c0_546 = arith.constant 0 : index
    %974 = vector.load %arg15[%c0_544, %c0_545, %c0_546] : memref<2x8x32xf32, #tpu.memory_space<vmem>>, vector<1x8x32xf32>
    %975 = vector.shape_cast %974 : vector<1x8x32xf32> to vector<8x32xf32>
    %c0_547 = arith.constant 0 : index
    %c0_548 = arith.constant 0 : index
    %c0_549 = arith.constant 0 : index
    %976 = vector.load %arg16[%c0_547, %c0_548, %c0_549] : memref<2x8x32xf32, #tpu.memory_space<vmem>>, vector<1x8x32xf32>
    %977 = vector.shape_cast %976 : vector<1x8x32xf32> to vector<8x32xf32>
    %c48_550 = arith.constant 48 : index
    %c0_551 = arith.constant 0 : index
    %978 = vector.load %arg14[%c48_550, %c0_551] : memref<64x128xf32, #tpu.memory_space<vmem>>, vector<8x128xf32>
    %979 = arith.truncf %975 : vector<8x32xf32> to vector<8x32xbf16>
    %cst_552 = arith.constant dense<0.000000e+00> : vector<8x128xf32>
    %980 = tpu.matmul %979, %571, %cst_552 {dimension_numbers = #tpu.dot_dimension_numbers<[1], [0], [0], [1], [0, 0, 1, 1], [], []>} : vector<8x32xbf16>, vector<32x128xbf16>, vector<8x128xf32> -> vector<8x128xf32>
    %981 = arith.addf %978, %980 : vector<8x128xf32>
    %982 = arith.negf %981 : vector<8x128xf32>
    %983 = math.exp %982 : vector<8x128xf32>
    %cst_553 = arith.constant 1.000000e+00 : f32
    %984 = vector.broadcast %cst_553 : f32 to vector<8x128xf32>
    %985 = arith.addf %984, %983 : vector<8x128xf32>
    %986 = arith.divf %984, %985 : vector<8x128xf32>
    %987 = math.tanh %981 : vector<8x128xf32>
    %988 = vector.extract_strided_slice %986 {offsets = [0, 32], sizes = [8, 32], strides = [1, 1]} : vector<8x128xf32> to vector<8x32xf32>
    %989 = arith.mulf %988, %977 : vector<8x32xf32>
    %990 = vector.extract_strided_slice %986 {offsets = [0, 0], sizes = [8, 32], strides = [1, 1]} : vector<8x128xf32> to vector<8x32xf32>
    %991 = vector.extract_strided_slice %987 {offsets = [0, 64], sizes = [8, 32], strides = [1, 1]} : vector<8x128xf32> to vector<8x32xf32>
    %992 = arith.mulf %990, %991 : vector<8x32xf32>
    %993 = arith.addf %989, %992 : vector<8x32xf32>
    %994 = vector.extract_strided_slice %986 {offsets = [0, 96], sizes = [8, 32], strides = [1, 1]} : vector<8x128xf32> to vector<8x32xf32>
    %995 = math.tanh %993 : vector<8x32xf32>
    %996 = arith.mulf %994, %995 : vector<8x32xf32>
    %c0_554 = arith.constant 0 : index
    %c0_555 = arith.constant 0 : index
    %c0_556 = arith.constant 0 : index
    %997 = vector.load %arg16[%c0_554, %c0_555, %c0_556] : memref<2x8x32xf32, #tpu.memory_space<vmem>>, vector<1x8x32xf32>
    %998 = vector.shape_cast %997 : vector<1x8x32xf32> to vector<8x32xf32>
    %999 = vector.shape_cast %993 : vector<8x32xf32> to vector<1x8x32xf32>
    tpu.vector_store %arg16[%c0_554, %c0_555, %c0_556], %999 {strides = array<i32>} : memref<2x8x32xf32, #tpu.memory_space<vmem>>, vector<1x8x32xf32>,
    %c0_557 = arith.constant 0 : index
    %c0_558 = arith.constant 0 : index
    %c0_559 = arith.constant 0 : index
    %1000 = vector.load %arg15[%c0_557, %c0_558, %c0_559] : memref<2x8x32xf32, #tpu.memory_space<vmem>>, vector<1x8x32xf32>
    %1001 = vector.shape_cast %1000 : vector<1x8x32xf32> to vector<8x32xf32>
    %1002 = vector.shape_cast %996 : vector<8x32xf32> to vector<1x8x32xf32>
    tpu.vector_store %arg15[%c0_557, %c0_558, %c0_559], %1002 {strides = array<i32>} : memref<2x8x32xf32, #tpu.memory_space<vmem>>, vector<1x8x32xf32>,
    %c1_560 = arith.constant 1 : index
    %c0_561 = arith.constant 0 : index
    %c0_562 = arith.constant 0 : index
    %1003 = vector.load %arg15[%c1_560, %c0_561, %c0_562] : memref<2x8x32xf32, #tpu.memory_space<vmem>>, vector<1x8x32xf32>
    %1004 = vector.shape_cast %1003 : vector<1x8x32xf32> to vector<8x32xf32>
    %c1_563 = arith.constant 1 : index
    %c0_564 = arith.constant 0 : index
    %c0_565 = arith.constant 0 : index
    %1005 = vector.load %arg16[%c1_563, %c0_564, %c0_565] : memref<2x8x32xf32, #tpu.memory_space<vmem>>, vector<1x8x32xf32>
    %1006 = vector.shape_cast %1005 : vector<1x8x32xf32> to vector<8x32xf32>
    %c0_566 = arith.constant 0 : index
    %c0_567 = arith.constant 0 : index
    %c0_568 = arith.constant 0 : index
    %1007 = vector.load %arg15[%c0_566, %c0_567, %c0_568] : memref<2x8x32xf32, #tpu.memory_space<vmem>>, vector<1x8x32xf32>
    %1008 = vector.shape_cast %1007 : vector<1x8x32xf32> to vector<8x32xf32>
    %1009 = tpu.concatenate %1008, %1004 in 1 : vector<8x32xf32>, vector<8x32xf32> -> vector<8x64xf32>
    %1010 = arith.truncf %1009 : vector<8x64xf32> to vector<8x64xbf16>
    %cst_569 = arith.constant dense<0.000000e+00> : vector<8x128xf32>
    %1011 = tpu.matmul %1010, %573, %cst_569 {dimension_numbers = #tpu.dot_dimension_numbers<[1], [0], [0], [1], [0, 0, 1, 1], [], []>} : vector<8x64xbf16>, vector<64x128xbf16>, vector<8x128xf32> -> vector<8x128xf32>
    %1012 = vector.broadcast %575 : vector<1x128xf32> to vector<8x128xf32>
    %1013 = arith.addf %1011, %1012 : vector<8x128xf32>
    %1014 = arith.negf %1013 : vector<8x128xf32>
    %1015 = math.exp %1014 : vector<8x128xf32>
    %cst_570 = arith.constant 1.000000e+00 : f32
    %1016 = vector.broadcast %cst_570 : f32 to vector<8x128xf32>
    %1017 = arith.addf %1016, %1015 : vector<8x128xf32>
    %1018 = arith.divf %1016, %1017 : vector<8x128xf32>
    %1019 = math.tanh %1013 : vector<8x128xf32>
    %1020 = vector.extract_strided_slice %1018 {offsets = [0, 32], sizes = [8, 32], strides = [1, 1]} : vector<8x128xf32> to vector<8x32xf32>
    %1021 = arith.mulf %1020, %1006 : vector<8x32xf32>
    %1022 = vector.extract_strided_slice %1018 {offsets = [0, 0], sizes = [8, 32], strides = [1, 1]} : vector<8x128xf32> to vector<8x32xf32>
    %1023 = vector.extract_strided_slice %1019 {offsets = [0, 64], sizes = [8, 32], strides = [1, 1]} : vector<8x128xf32> to vector<8x32xf32>
    %1024 = arith.mulf %1022, %1023 : vector<8x32xf32>
    %1025 = arith.addf %1021, %1024 : vector<8x32xf32>
    %1026 = vector.extract_strided_slice %1018 {offsets = [0, 96], sizes = [8, 32], strides = [1, 1]} : vector<8x128xf32> to vector<8x32xf32>
    %1027 = math.tanh %1025 : vector<8x32xf32>
    %1028 = arith.mulf %1026, %1027 : vector<8x32xf32>
    %c1_571 = arith.constant 1 : index
    %c0_572 = arith.constant 0 : index
    %c0_573 = arith.constant 0 : index
    %1029 = vector.load %arg16[%c1_571, %c0_572, %c0_573] : memref<2x8x32xf32, #tpu.memory_space<vmem>>, vector<1x8x32xf32>
    %1030 = vector.shape_cast %1029 : vector<1x8x32xf32> to vector<8x32xf32>
    %1031 = vector.shape_cast %1025 : vector<8x32xf32> to vector<1x8x32xf32>
    tpu.vector_store %arg16[%c1_571, %c0_572, %c0_573], %1031 {strides = array<i32>} : memref<2x8x32xf32, #tpu.memory_space<vmem>>, vector<1x8x32xf32>,
    %c1_574 = arith.constant 1 : index
    %c0_575 = arith.constant 0 : index
    %c0_576 = arith.constant 0 : index
    %1032 = vector.load %arg15[%c1_574, %c0_575, %c0_576] : memref<2x8x32xf32, #tpu.memory_space<vmem>>, vector<1x8x32xf32>
    %1033 = vector.shape_cast %1032 : vector<1x8x32xf32> to vector<8x32xf32>
    %1034 = vector.shape_cast %1028 : vector<8x32xf32> to vector<1x8x32xf32>
    tpu.vector_store %arg15[%c1_574, %c0_575, %c0_576], %1034 {strides = array<i32>} : memref<2x8x32xf32, #tpu.memory_space<vmem>>, vector<1x8x32xf32>,
    %1035 = arith.truncf %1028 : vector<8x32xf32> to vector<8x32xbf16>
    %cst_577 = arith.constant dense<0.000000e+00> : vector<8x128xf32>
    %1036 = tpu.matmul %1035, %576, %cst_577 {dimension_numbers = #tpu.dot_dimension_numbers<[1], [0], [0], [1], [0, 0, 1, 1], [], []>} : vector<8x32xbf16>, vector<32x128xbf16>, vector<8x128xf32> -> vector<8x128xf32>
    %1037 = vector.broadcast %577 : vector<1x128xf32> to vector<8x128xf32>
    %1038 = arith.addf %1036, %1037 : vector<8x128xf32>
    %c48_578 = arith.constant 48 : index
    %c0_579 = arith.constant 0 : index
    %1039 = vector.load %arg12[%c48_578, %c0_579] : memref<64x128xf32, #tpu.memory_space<vmem>>, vector<8x128xf32>
    tpu.vector_store %arg12[%c48_578, %c0_579], %1038 {strides = array<i32>} : memref<64x128xf32, #tpu.memory_space<vmem>>, vector<8x128xf32>,
    %c0_580 = arith.constant 0 : index
    %c0_581 = arith.constant 0 : index
    %c0_582 = arith.constant 0 : index
    %1040 = vector.load %arg15[%c0_580, %c0_581, %c0_582] : memref<2x8x32xf32, #tpu.memory_space<vmem>>, vector<1x8x32xf32>
    %1041 = vector.shape_cast %1040 : vector<1x8x32xf32> to vector<8x32xf32>
    %c0_583 = arith.constant 0 : index
    %c0_584 = arith.constant 0 : index
    %c0_585 = arith.constant 0 : index
    %1042 = vector.load %arg16[%c0_583, %c0_584, %c0_585] : memref<2x8x32xf32, #tpu.memory_space<vmem>>, vector<1x8x32xf32>
    %1043 = vector.shape_cast %1042 : vector<1x8x32xf32> to vector<8x32xf32>
    %c56_586 = arith.constant 56 : index
    %c0_587 = arith.constant 0 : index
    %1044 = vector.load %arg14[%c56_586, %c0_587] : memref<64x128xf32, #tpu.memory_space<vmem>>, vector<8x128xf32>
    %1045 = arith.truncf %1041 : vector<8x32xf32> to vector<8x32xbf16>
    %cst_588 = arith.constant dense<0.000000e+00> : vector<8x128xf32>
    %1046 = tpu.matmul %1045, %571, %cst_588 {dimension_numbers = #tpu.dot_dimension_numbers<[1], [0], [0], [1], [0, 0, 1, 1], [], []>} : vector<8x32xbf16>, vector<32x128xbf16>, vector<8x128xf32> -> vector<8x128xf32>
    %1047 = arith.addf %1044, %1046 : vector<8x128xf32>
    %1048 = arith.negf %1047 : vector<8x128xf32>
    %1049 = math.exp %1048 : vector<8x128xf32>
    %cst_589 = arith.constant 1.000000e+00 : f32
    %1050 = vector.broadcast %cst_589 : f32 to vector<8x128xf32>
    %1051 = arith.addf %1050, %1049 : vector<8x128xf32>
    %1052 = arith.divf %1050, %1051 : vector<8x128xf32>
    %1053 = math.tanh %1047 : vector<8x128xf32>
    %1054 = vector.extract_strided_slice %1052 {offsets = [0, 32], sizes = [8, 32], strides = [1, 1]} : vector<8x128xf32> to vector<8x32xf32>
    %1055 = arith.mulf %1054, %1043 : vector<8x32xf32>
    %1056 = vector.extract_strided_slice %1052 {offsets = [0, 0], sizes = [8, 32], strides = [1, 1]} : vector<8x128xf32> to vector<8x32xf32>
    %1057 = vector.extract_strided_slice %1053 {offsets = [0, 64], sizes = [8, 32], strides = [1, 1]} : vector<8x128xf32> to vector<8x32xf32>
    %1058 = arith.mulf %1056, %1057 : vector<8x32xf32>
    %1059 = arith.addf %1055, %1058 : vector<8x32xf32>
    %1060 = vector.extract_strided_slice %1052 {offsets = [0, 96], sizes = [8, 32], strides = [1, 1]} : vector<8x128xf32> to vector<8x32xf32>
    %1061 = math.tanh %1059 : vector<8x32xf32>
    %1062 = arith.mulf %1060, %1061 : vector<8x32xf32>
    %c0_590 = arith.constant 0 : index
    %c0_591 = arith.constant 0 : index
    %c0_592 = arith.constant 0 : index
    %1063 = vector.load %arg16[%c0_590, %c0_591, %c0_592] : memref<2x8x32xf32, #tpu.memory_space<vmem>>, vector<1x8x32xf32>
    %1064 = vector.shape_cast %1063 : vector<1x8x32xf32> to vector<8x32xf32>
    %1065 = vector.shape_cast %1059 : vector<8x32xf32> to vector<1x8x32xf32>
    tpu.vector_store %arg16[%c0_590, %c0_591, %c0_592], %1065 {strides = array<i32>} : memref<2x8x32xf32, #tpu.memory_space<vmem>>, vector<1x8x32xf32>,
    %c0_593 = arith.constant 0 : index
    %c0_594 = arith.constant 0 : index
    %c0_595 = arith.constant 0 : index
    %1066 = vector.load %arg15[%c0_593, %c0_594, %c0_595] : memref<2x8x32xf32, #tpu.memory_space<vmem>>, vector<1x8x32xf32>
    %1067 = vector.shape_cast %1066 : vector<1x8x32xf32> to vector<8x32xf32>
    %1068 = vector.shape_cast %1062 : vector<8x32xf32> to vector<1x8x32xf32>
    tpu.vector_store %arg15[%c0_593, %c0_594, %c0_595], %1068 {strides = array<i32>} : memref<2x8x32xf32, #tpu.memory_space<vmem>>, vector<1x8x32xf32>,
    %c1_596 = arith.constant 1 : index
    %c0_597 = arith.constant 0 : index
    %c0_598 = arith.constant 0 : index
    %1069 = vector.load %arg15[%c1_596, %c0_597, %c0_598] : memref<2x8x32xf32, #tpu.memory_space<vmem>>, vector<1x8x32xf32>
    %1070 = vector.shape_cast %1069 : vector<1x8x32xf32> to vector<8x32xf32>
    %c1_599 = arith.constant 1 : index
    %c0_600 = arith.constant 0 : index
    %c0_601 = arith.constant 0 : index
    %1071 = vector.load %arg16[%c1_599, %c0_600, %c0_601] : memref<2x8x32xf32, #tpu.memory_space<vmem>>, vector<1x8x32xf32>
    %1072 = vector.shape_cast %1071 : vector<1x8x32xf32> to vector<8x32xf32>
    %c0_602 = arith.constant 0 : index
    %c0_603 = arith.constant 0 : index
    %c0_604 = arith.constant 0 : index
    %1073 = vector.load %arg15[%c0_602, %c0_603, %c0_604] : memref<2x8x32xf32, #tpu.memory_space<vmem>>, vector<1x8x32xf32>
    %1074 = vector.shape_cast %1073 : vector<1x8x32xf32> to vector<8x32xf32>
    %1075 = tpu.concatenate %1074, %1070 in 1 : vector<8x32xf32>, vector<8x32xf32> -> vector<8x64xf32>
    %1076 = arith.truncf %1075 : vector<8x64xf32> to vector<8x64xbf16>
    %cst_605 = arith.constant dense<0.000000e+00> : vector<8x128xf32>
    %1077 = tpu.matmul %1076, %573, %cst_605 {dimension_numbers = #tpu.dot_dimension_numbers<[1], [0], [0], [1], [0, 0, 1, 1], [], []>} : vector<8x64xbf16>, vector<64x128xbf16>, vector<8x128xf32> -> vector<8x128xf32>
    %1078 = vector.broadcast %575 : vector<1x128xf32> to vector<8x128xf32>
    %1079 = arith.addf %1077, %1078 : vector<8x128xf32>
    %1080 = arith.negf %1079 : vector<8x128xf32>
    %1081 = math.exp %1080 : vector<8x128xf32>
    %cst_606 = arith.constant 1.000000e+00 : f32
    %1082 = vector.broadcast %cst_606 : f32 to vector<8x128xf32>
    %1083 = arith.addf %1082, %1081 : vector<8x128xf32>
    %1084 = arith.divf %1082, %1083 : vector<8x128xf32>
    %1085 = math.tanh %1079 : vector<8x128xf32>
    %1086 = vector.extract_strided_slice %1084 {offsets = [0, 32], sizes = [8, 32], strides = [1, 1]} : vector<8x128xf32> to vector<8x32xf32>
    %1087 = arith.mulf %1086, %1072 : vector<8x32xf32>
    %1088 = vector.extract_strided_slice %1084 {offsets = [0, 0], sizes = [8, 32], strides = [1, 1]} : vector<8x128xf32> to vector<8x32xf32>
    %1089 = vector.extract_strided_slice %1085 {offsets = [0, 64], sizes = [8, 32], strides = [1, 1]} : vector<8x128xf32> to vector<8x32xf32>
    %1090 = arith.mulf %1088, %1089 : vector<8x32xf32>
    %1091 = arith.addf %1087, %1090 : vector<8x32xf32>
    %1092 = vector.extract_strided_slice %1084 {offsets = [0, 96], sizes = [8, 32], strides = [1, 1]} : vector<8x128xf32> to vector<8x32xf32>
    %1093 = math.tanh %1091 : vector<8x32xf32>
    %1094 = arith.mulf %1092, %1093 : vector<8x32xf32>
    %c1_607 = arith.constant 1 : index
    %c0_608 = arith.constant 0 : index
    %c0_609 = arith.constant 0 : index
    %1095 = vector.load %arg16[%c1_607, %c0_608, %c0_609] : memref<2x8x32xf32, #tpu.memory_space<vmem>>, vector<1x8x32xf32>
    %1096 = vector.shape_cast %1095 : vector<1x8x32xf32> to vector<8x32xf32>
    %1097 = vector.shape_cast %1091 : vector<8x32xf32> to vector<1x8x32xf32>
    tpu.vector_store %arg16[%c1_607, %c0_608, %c0_609], %1097 {strides = array<i32>} : memref<2x8x32xf32, #tpu.memory_space<vmem>>, vector<1x8x32xf32>,
    %c1_610 = arith.constant 1 : index
    %c0_611 = arith.constant 0 : index
    %c0_612 = arith.constant 0 : index
    %1098 = vector.load %arg15[%c1_610, %c0_611, %c0_612] : memref<2x8x32xf32, #tpu.memory_space<vmem>>, vector<1x8x32xf32>
    %1099 = vector.shape_cast %1098 : vector<1x8x32xf32> to vector<8x32xf32>
    %1100 = vector.shape_cast %1094 : vector<8x32xf32> to vector<1x8x32xf32>
    tpu.vector_store %arg15[%c1_610, %c0_611, %c0_612], %1100 {strides = array<i32>} : memref<2x8x32xf32, #tpu.memory_space<vmem>>, vector<1x8x32xf32>,
    %1101 = arith.truncf %1094 : vector<8x32xf32> to vector<8x32xbf16>
    %cst_613 = arith.constant dense<0.000000e+00> : vector<8x128xf32>
    %1102 = tpu.matmul %1101, %576, %cst_613 {dimension_numbers = #tpu.dot_dimension_numbers<[1], [0], [0], [1], [0, 0, 1, 1], [], []>} : vector<8x32xbf16>, vector<32x128xbf16>, vector<8x128xf32> -> vector<8x128xf32>
    %1103 = vector.broadcast %577 : vector<1x128xf32> to vector<8x128xf32>
    %1104 = arith.addf %1102, %1103 : vector<8x128xf32>
    %c56_614 = arith.constant 56 : index
    %c0_615 = arith.constant 0 : index
    %1105 = vector.load %arg12[%c56_614, %c0_615] : memref<64x128xf32, #tpu.memory_space<vmem>>, vector<8x128xf32>
    tpu.vector_store %arg12[%c56_614, %c0_615], %1104 {strides = array<i32>} : memref<64x128xf32, #tpu.memory_space<vmem>>, vector<8x128xf32>,
    return
  }
}

</mosaic_0001>

<bundles_post_ra>
// kernel: tpu_custom_call.1
= control target key start
LH: loop header
LB: loop body
LE: loop exit
PB: predicated region body
PF: predicated region fallthrough
CT: control target
= control target key end

     0   :  { %v5283_v2 = vmov 0   ;;  %vm205_vm0 = vcmask 1041408   ;;  %s6531_s0 = inlined_call_operand.vmem [shape: s32[64,1], index: 0, kind: input, shape index: {}]   ;;  %s6532_s1 = inlined_call_operand.vmem [shape: f32[64,1], index: 1, kind: input, shape index: {}]   ;;  %s6533_s2 = inlined_call_operand.vmem [shape: s32[64,1], index: 2, kind: input, shape index: {}]   ;;  %s6534_s3 = inlined_call_operand.vmem [shape: f32[64,1], index: 3, kind: input, shape index: {}]   ;;  %s6535_s4 = inlined_call_operand.vmem [shape: f32[18,32], index: 4, kind: input, shape index: {}]   ;;  %s6536_s5 = inlined_call_operand.vmem [shape: bf16[2,64,128], index: 5, kind: input, shape index: {}]   ;;  %s6537_s6 = inlined_call_operand.vmem [shape: f32[2,1,128], index: 6, kind: input, shape index: {}]   ;;  %s6538_s7 = inlined_call_operand.vmem [shape: f32[18,32], index: 7, kind: input, shape index: {}]   ;;  %s6539_s8 = inlined_call_operand.vmem [shape: bf16[2,64,128], index: 8, kind: input, shape index: {}]   ;;  %s6540_s9 = inlined_call_operand.vmem [shape: f32[2,1,128], index: 9, kind: input, shape index: {}]   ;;  %s6541_s10 = inlined_call_operand.vmem [shape: bf16[32,128], index: 10, kind: input, shape index: {}]   ;;  %s6542_s11 = inlined_call_operand.vmem [shape: f32[1,128], index: 11, kind: input, shape index: {}]   ;;  %s6543_s12 = inlined_call_operand.hbm [shape: f32[64,128], index: 12, kind: output, shape index: {}]  }
   0x1   :  { %v51_v0 = vld [vmem:[%s6532_s1] sm:$0xff]  ;;  %4966 = vset.pattern.permute.xlu1 %v5283_v2  ;;  %4965 = vset.pattern.permute.xlu0 %v5283_v2  ;;  %v52_v3 = vld [vmem:[%s6532_s1 + $0x8] sm:$0xff]  ;;  %v46_v5 = vld [vmem:[%s6531_s0 + $0x18] sm:$0xff] }
   0x2   :  { %v43_v1 = vld [vmem:[%s6531_s0] sm:$0xff]  ;;  %112 = vperm.xlu1 %4966, %v51_v0   ;;  %v44_v4 = vld [vmem:[%s6531_s0 + $0x8] sm:$0xff]  ;;  %v45_v6 = vld [vmem:[%s6531_s0 + $0x10] sm:$0xff] }
   0x3   :  { %62 = vperm.xlu0 %4965, %v43_v1   ;;  %v54_v7 = vld [vmem:[%s6532_s1 + $0x18] sm:$0xff]  ;;  %v177_v8 = vld [vmem:[%s6535_s4] sm:$0xff]  ;;  %v53_v9 = vld [vmem:[%s6532_s1 + $0x10] sm:$0xff] }
   0x4   :  { %v178_v10 = vld [vmem:[%s6535_s4 + $0x8] sm:$0xff]  ;;  %v179_v12 = vld [vmem:[%s6535_s4 + $0x10] sm:$0x3]  ;;  %v47_v14 = vld [vmem:[%s6531_s0 + $0x20] sm:$0xff] }
   0x5   :  { %v4948_v11 = vpack.c.bf16 %v178_v10, %v177_v8  ;;  %v48_v13 = vld [vmem:[%s6531_s0 + $0x28] sm:$0xff]  ;;  %v55_v16 = vld [vmem:[%s6532_s1 + $0x20] sm:$0xff]  ;;  %v50_v17 = vld [vmem:[%s6531_s0 + $0x38] sm:$0xff] }
   0x6   :  { %117 = vperm.xlu1 %4966, %v52_v3   ;;  %v56_v15 = vld [vmem:[%s6532_s1 + $0x28] sm:$0xff]  ;;  %v49_v18 = vld [vmem:[%s6531_s0 + $0x30] sm:$0xff] }
   0x7   :  { %65 = vperm.xlu0 %4965, %v44_v4   ;;  %4949 = vmatprep.subr.bf16.mxu0 %v4948_v11 }
   0x8   :  { %4951 = vmatpush3.bf16.msra.mxu0 %v4948_v11 }
   0x9   :  { %4508 = vmatprep.subr.msk.mxu0 %vm205_vm0, %v179_v12 }
   0xa   :  { %71 = vperm.xlu1 %4966, %v46_v5  }
   0xb   :  { %68 = vperm.xlu0 %4965, %v45_v6  }
   0xc   :  { %4509 = vmatpush3.msk.msra.mxu0 %vm205_vm0, %v179_v12 }
   0xe   :  { %127 = vperm.xlu1 %4966, %v54_v7  }
   0xf   :  { %122 = vperm.xlu0 %4965, %v53_v9  }
  0x12   :  { %77 = vperm.xlu1 %4966, %v48_v13  }
  0x13   :  { %74 = vperm.xlu0 %4965, %v47_v14  }
  0x16   :  { %137 = vperm.xlu1 %4966, %v56_v15  }
  0x17   :  { %132 = vperm.xlu0 %4965, %v55_v16  }
  0x18   :  { %17 = vsyncpa [#allocation7], 0  ;;  %v58_v19 = vld [vmem:[%s6532_s1 + $0x38] sm:$0xff]  ;;  %v57_v20 = vld [vmem:[%s6532_s1 + $0x30] sm:$0xff]  ;;  %v59_v40 = vlaneseq  ;;  %v5284_v45 = vmov 0.0   ;;  %vm180_vm4 = vcmask 146432  }
  0x19   :  { %v428_v21 = vld [vmem:[%s6533_s2 + $0x8] sm:$0xff]  ;;  %v427_v22 = vld [vmem:[%s6533_s2] sm:$0xff]  ;;  %v430_v28 = vld [vmem:[%s6533_s2 + $0x18] sm:$0xff]  ;;  %s5286_s24 = smov 32   ;;  %s5287_s1 = smov 64  }
  0x1a   :  { %83 = vperm.xlu1 %4966, %v50_v17   ;;  %v436_v23 = vld [vmem:[%s6534_s3 + $0x8] sm:$0xff]  ;;  %v435_v24 = vld [vmem:[%s6534_s3] sm:$0xff]  ;;  %v429_v29 = vld [vmem:[%s6533_s2 + $0x10] sm:$0xff]  ;;  %v5470_v41 = vand.u32 127, %v59_v40 }
  0x1b   :  { %80 = vperm.xlu0 %4965, %v49_v18   ;;  %v555_v25 = vld [vmem:[%s6538_s7] sm:$0xff]  ;;  %v556_v26 = vld [vmem:[%s6538_s7 + $0x8] sm:$0xff]  ;;  %v438_v30 = vld [vmem:[%s6534_s3 + $0x18] sm:$0xff] }
  0x1c   :  { %v4952_v27 = vpack.c.bf16 %v556_v26, %v555_v25  ;;  %v437_v31 = vld [vmem:[%s6534_s3 + $0x10] sm:$0xff]  ;;  %v432_v32 = vld [vmem:[%s6533_s2 + $0x28] sm:$0xff]  ;;  %v431_v33 = vld [vmem:[%s6533_s2 + $0x20] sm:$0xff]  ;;  %vm109_vm1 = vcmp.eq.s32.totalorder %v5470_v41, 16  ;;  %vm166_vm2 = vcmp.eq.s32.totalorder %v5470_v41, 17 }
  0x1d   :  { %v440_v34 = vld [vmem:[%s6534_s3 + $0x28] sm:$0xff]  ;;  %v439_v35 = vld [vmem:[%s6534_s3 + $0x20] sm:$0xff]  ;;  %v434_v36 = vld [vmem:[%s6533_s2 + $0x38] sm:$0xff]  ;;  %v5479_v47 = vsel %vm166_vm2, 1.0, %v5284_v45 }
  0x1e   :  { %147 = vperm.xlu1 %4966, %v58_v19   ;;  %4953 = vmatprep.subr.bf16.mxu0 %v4952_v27  ;;  %v433_v37 = vld [vmem:[%s6533_s2 + $0x30] sm:$0xff]  ;;  %v442_v38 = vld [vmem:[%s6534_s3 + $0x38] sm:$0xff]  ;;  %s5288_s2 = smov 96  }
  0x1f   :  { %142 = vperm.xlu0 %4965, %v57_v20   ;;  %v441_v39 = vld [vmem:[%s6534_s3 + $0x30] sm:$0xff] }
  0x20   :  { %v557_v58 = vld [vmem:[%s6538_s7 + $0x10] sm:$0x3] }
  0x22   :  { %447 = vperm.xlu1 %4966, %v428_v21  }
  0x23   :  { %444 = vperm.xlu0 %4965, %v427_v22  }
  0x26   :  { %498 = vperm.xlu1 %4966, %v436_v23  }
  0x27   :  { %493 = vperm.xlu0 %4965, %v435_v24  }
  0x2a   :  { %453 = vperm.xlu1 %4966, %v430_v28  }
  0x2b   :  { %450 = vperm.xlu0 %4965, %v429_v29  }
  0x2e   :  { %508 = vperm.xlu1 %4966, %v438_v30  }
  0x2f   :  { %503 = vperm.xlu0 %4965, %v437_v31  }
  0x32   :  { %459 = vperm.xlu1 %4966, %v432_v32  }
  0x33   :  { %456 = vperm.xlu0 %4965, %v431_v33  }
  0x36   :  { %518 = vperm.xlu1 %4966, %v440_v34  }
  0x37   :  { %513 = vperm.xlu0 %4965, %v439_v35  }
  0x3a   :  { %465 = vperm.xlu1 %4966, %v434_v36  }
  0x3b   :  { %462 = vperm.xlu0 %4965, %v433_v37  }
  0x3e   :  { %528 = vperm.xlu1 %4966, %v442_v38  }
  0x3f   :  { %523 = vperm.xlu0 %4965, %v441_v39  }
  0x81   :  { %v113_v42 = vpop.permute.xlu1 %112 }
  0x82   :  { %v63_v43 = vpop.permute.xlu0 %62  ;;  %v150_v44 = vsel %vm109_vm1, %v113_v42, 0.0 }
  0x83   :  { %vm85_vm3 = vcmp.eq.s32.totalorder %v5470_v41, %v63_v43 }
  0x84   :  { %v4162_v46 = vsel %vm85_vm3, 1.0, %v5284_v45 }
  0x85   :  { %v158_v48 = vadd.f32 %v4162_v46, %v150_v44  ;;  %v118_v49 = vpop.permute.xlu1 %117  ;;  %v5544_v44 = vld [vmem:[%s6536_s5 + $0x10] sm:$0xff]  }
  0x86   :  { %v66_v50 = vpop.permute.xlu0 %65  ;;  %v151_v51 = vsel %vm109_vm1, %v118_v49, 0.0 }
  0x87   :  { %vm86_vm5 = vcmp.eq.s32.totalorder %v5470_v41, %v66_v50  ;;  %v169_v52 = vadd.f32 %v5479_v47, %v158_v48 }
  0x88   :  { %v4163_v53 = vsel %vm86_vm5, 1.0, %v5284_v45 }
  0x89   :  { %v159_v54 = vadd.f32 %v4163_v53, %v151_v51  ;;  %4510 = vmatprep.mubr.msk.f32.mxu0 %vm180_vm4, %v169_v52  ;;  %v72_v55 = vpop.permute.xlu1 %71 }
  0x8a   :  { %v69_v56 = vpop.permute.xlu0 %68  ;;  %vm88_vm6 = vcmp.eq.s32.totalorder %v5470_v41, %v72_v55 }
  0x8b   :  { %v170_v57 = vadd.f32 %v5479_v47, %v159_v54  ;;  %vm87_vm7 = vcmp.eq.s32.totalorder %v5470_v41, %v69_v56  ;;  %v4165_v61 = vsel %vm88_vm6, 1.0, %v5284_v45  ;;  %vm341_vm6 = vcmask 261120  }
  0x8c   :  { %v4164_v62 = vsel %vm87_vm7, 1.0, %v5284_v45  ;;  %817 = vst.msk [vmem:[#allocation4] sm:$0xff] %vm341_vm6, %v5284_v45  ;;  %818 = vst.msk [vmem:[#allocation5] sm:$0xff] %vm341_vm6, %v5284_v45 }
  0x8d   :  { %4511 = vmatmul.mubr.msk.f32.vlgmr.msra.gmra.mrb[0].mxu0 %vm180_vm4, %v170_v57  ;;  %v128_v59 = vpop.permute.xlu1 %127  ;;  %820 = vst.msk [vmem:[#allocation4 + $0x8] sm:$0xff] %vm341_vm6, %v5284_v45  ;;  %822 = vst.msk [vmem:[#allocation5 + $0x8] sm:$0xff] %vm341_vm6, %v5284_v45 }
  0x8e   :  { %v123_v60 = vpop.permute.xlu0 %122  ;;  %4955 = vmatpush3.bf16.msra.mxu0 %v4952_v27  ;;  %v153_v63 = vsel %vm109_vm1, %v128_v59, 0.0 }
  0x8f   :  { %v152_v0 = vsel %vm109_vm1, %v123_v60, 0.0  ;;  %4538 = vmatprep.subr.msk.mxu0 %vm205_vm0, %v557_v58  ;;  %v161_v1 = vadd.f32 %v4165_v61, %v153_v63 }
  0x90   :  { %v160_v2 = vadd.f32 %v4164_v62, %v152_v0 }
  0x91   :  { %v172_v3 = vadd.f32 %v5479_v47, %v161_v1  ;;  %v78_v5 = vpop.permute.xlu1 %77 }
  0x92   :  { %v171_v4 = vadd.f32 %v5479_v47, %v160_v2  ;;  %v75_v6 = vpop.permute.xlu0 %74  ;;  %4539 = vmatpush3.msk.msra.mxu0 %vm205_vm0, %v557_v58  ;;  %vm90_vm8 = vcmp.eq.s32.totalorder %v5470_v41, %v78_v5 }
  0x93   :  { %4564 = vmatprep.subr.bf16.mxu0 %v5284_v45  ;;  %vm89_vm9 = vcmp.eq.s32.totalorder %v5470_v41, %v75_v6  ;;  %v4167_v9 = vsel %vm90_vm8, 1.0, %v5284_v45 }
  0x94   :  { %4513 = vmatprep.mubr.msk.f32.mxu0 %vm180_vm4, %v171_v4  ;;  %v4166_v10 = vsel %vm89_vm9, 1.0, %v5284_v45 }
  0x95   :  { %4514 = vmatmul.mubr.msk.f32.gmra.mrb[2].mxu0 %vm180_vm4, %v172_v3  ;;  %v138_v7 = vpop.permute.xlu1 %137 }
  0x96   :  { %v133_v8 = vpop.permute.xlu0 %132  ;;  %v155_v11 = vsel %vm109_vm1, %v138_v7, 0.0 }
  0x97   :  { %v154_v12 = vsel %vm109_vm1, %v133_v8, 0.0  ;;  %v163_v13 = vadd.f32 %v4167_v9, %v155_v11 }
  0x98   :  { %v162_v14 = vadd.f32 %v4166_v10, %v154_v12 }
  0x99   :  { %v174_v15 = vadd.f32 %v5479_v47, %v163_v13  ;;  %v84_v17 = vpop.permute.xlu1 %83 }
  0x9a   :  { %v173_v16 = vadd.f32 %v5479_v47, %v162_v14  ;;  %v81_v18 = vpop.permute.xlu0 %80  ;;  %vm92_vm10 = vcmp.eq.s32.totalorder %v5470_v41, %v84_v17  ;;  %v4968_v17 = vld [vmem:[%s6536_s5] sm:$0xff]  }
  0x9b   :  { %vm91_vm11 = vcmp.eq.s32.totalorder %v5470_v41, %v81_v18  ;;  %v4169_v21 = vsel %vm92_vm10, 1.0, %v5284_v45  ;;  %4522 = vmatprep.subr.bf16.mxu1 %v4968_v17  ;;  %v823_v18 = vld [vmem:[#allocation4] sm:$0xff] }
  0x9c   :  { %4516 = vmatprep.mubr.msk.f32.mxu0 %vm180_vm4, %v173_v16  ;;  %v4168_v22 = vsel %vm91_vm11, 1.0, %v5284_v45  ;;  %4523 = vmatpush3.bf16.msra.mxu1 %v4968_v17 }
  0x9d   :  { %4517 = vmatmul.mubr.msk.f32.gmra.mrb[4].mxu0 %vm180_vm4, %v174_v15  ;;  %v148_v19 = vpop.permute.xlu1 %147 }
  0x9e   :  { %v143_v20 = vpop.permute.xlu0 %142  ;;  %v157_v23 = vsel %vm109_vm1, %v148_v19, 0.0  ;;  %v826_v19 = vpack.c.bf16 %v823_v18, %v823_v18 }
  0x9f   :  { %v156_v24 = vsel %vm109_vm1, %v143_v20, 0.0  ;;  %v165_v25 = vadd.f32 %v4169_v21, %v157_v23  ;;  %v4971_v20 = vld [vmem:[%s6539_s8] sm:$0xff]   ;;  %v824_v21 = vld [vmem:[#allocation5] sm:$0xff] }
  0xa0   :  { %v164_v26 = vadd.f32 %v4168_v22, %v156_v24  ;;  %891 = vrot.lane.b32.xlu1 %v824_v21, %s5286_s24 }
  0xa1   :  { %v176_v27 = vadd.f32 %v5479_v47, %v165_v25  ;;  %v448_v29 = vpop.permute.xlu1 %447 }
  0xa2   :  { %v175_v28 = vadd.f32 %v5479_v47, %v164_v26  ;;  %v445_v30 = vpop.permute.xlu0 %444  ;;  %vm468_vm12 = vcmp.eq.s32.totalorder %v5470_v41, %v448_v29 }
  0xa3   :  { %vm467_vm13 = vcmp.eq.s32.totalorder %v5470_v41, %v445_v30  ;;  %v4188_v33 = vsel %vm468_vm12, 1.0, %v5284_v45 }
  0xa4   :  { %4519 = vmatprep.mubr.msk.f32.mxu0 %vm180_vm4, %v175_v28  ;;  %v4187_v34 = vsel %vm467_vm13, 1.0, %v5284_v45  ;;  %v4972_v28 = vld [vmem:[%s6539_s8 + $0x8] sm:$0xff]  }
  0xa5   :  { %4520 = vmatmul.mubr.msk.f32.gmra.mrb[6].mxu0 %vm180_vm4, %v176_v27  ;;  %v499_v31 = vpop.permute.xlu1 %498 }
  0xa6   :  { %v494_v32 = vpop.permute.xlu0 %493  ;;  %v532_v35 = vsel %vm109_vm1, %v499_v31, 0.0 }
  0xa7   :  { %v531_v36 = vsel %vm109_vm1, %v494_v32, 0.0  ;;  %v540_v37 = vadd.f32 %v4188_v33, %v532_v35 }
  0xa8   :  { %v539_v38 = vadd.f32 %v4187_v34, %v531_v36 }
  0xa9   :  { %v548_v39 = vadd.f32 %v5479_v47, %v540_v37  ;;  %v454_v42 = vpop.permute.xlu1 %453 }
  0xaa   :  { %v547_v40 = vadd.f32 %v5479_v47, %v539_v38  ;;  %v451_v43 = vpop.permute.xlu0 %450  ;;  %vm470_vm14 = vcmp.eq.s32.totalorder %v5470_v41, %v454_v42 }
  0xab   :  { %vm469_vm15 = vcmp.eq.s32.totalorder %v5470_v41, %v451_v43  ;;  %v4190_v49 = vsel %vm470_vm14, 1.0, %v5284_v45 }
  0xac   :  { %4540 = vmatprep.mubr.msk.f32.mxu0 %vm180_vm4, %v547_v40  ;;  %v4189_v50 = vsel %vm469_vm15, 1.0, %v5284_v45 }
  0xad   :  { %4541 = vmatmul.mubr.msk.f32.vlgmr.msra.gmra.mrb[8].mxu0 %vm180_vm4, %v548_v39  ;;  %v509_v46 = vpop.permute.xlu1 %508 }
  0xae   :  { %v504_v48 = vpop.permute.xlu0 %503  ;;  %4565 = vmatpush3.bf16.msra.mxu0 %v5544_v44  ;;  %v534_v51 = vsel %vm109_vm1, %v509_v46, 0.0 }
  0xaf   :  { %v533_v52 = vsel %vm109_vm1, %v504_v48, 0.0  ;;  %4566 = vmatprep.subr.bf16.mxu0 %v5284_v45  ;;  %v542_v53 = vadd.f32 %v4190_v49, %v534_v51 }
  0xb0   :  { %v541_v54 = vadd.f32 %v4189_v50, %v533_v52 }
  0xb1   :  { %v550_v55 = vadd.f32 %v5479_v47, %v542_v53  ;;  %v460_v57 = vpop.permute.xlu1 %459 }
  0xb2   :  { %v549_v56 = vadd.f32 %v5479_v47, %v541_v54  ;;  %v457_v58 = vpop.permute.xlu0 %456  ;;  %vm472_vm0 = vcmp.eq.s32.totalorder %v5470_v41, %v460_v57 }
  0xb3   :  { %vm471_vm2 = vcmp.eq.s32.totalorder %v5470_v41, %v457_v58  ;;  %v4192_v61 = vsel %vm472_vm0, 1.0, %v5284_v45 }
  0xb4   :  { %4543 = vmatprep.mubr.msk.f32.mxu0 %vm180_vm4, %v549_v56  ;;  %v4191_v62 = vsel %vm471_vm2, 1.0, %v5284_v45 }
  0xb5   :  { %4544 = vmatmul.mubr.msk.f32.gmra.mrb[10].mxu0 %vm180_vm4, %v550_v55  ;;  %v519_v59 = vpop.permute.xlu1 %518  ;;  %v4180_v55 = vld [vmem:[%s6537_s6] ss:$0 sm:$0xff] }
  0xb6   :  { %v514_v60 = vpop.permute.xlu0 %513  ;;  %v536_v63 = vsel %vm109_vm1, %v519_v59, 0.0 }
  0xb7   :  { %v535_v0 = vsel %vm109_vm1, %v514_v60, 0.0  ;;  %v544_v1 = vadd.f32 %v4192_v61, %v536_v63 }
  0xb8   :  { %v543_v2 = vadd.f32 %v4191_v62, %v535_v0 }
  0xb9   :  { %v552_v3 = vadd.f32 %v5479_v47, %v544_v1  ;;  %v466_v5 = vpop.permute.xlu1 %465 }
  0xba   :  { %v551_v4 = vadd.f32 %v5479_v47, %v543_v2  ;;  %v463_v6 = vpop.permute.xlu0 %462  ;;  %vm474_vm3 = vcmp.eq.s32.totalorder %v5470_v41, %v466_v5 }
  0xbb   :  { %vm473_vm5 = vcmp.eq.s32.totalorder %v5470_v41, %v463_v6  ;;  %v4194_v9 = vsel %vm474_vm3, 1.0, %v5284_v45  ;;  %v5600_v41 = vld [vmem:[%s6536_s5 + $0x18] sm:$0xff]  }
  0xbc   :  { %4546 = vmatprep.mubr.msk.f32.mxu0 %vm180_vm4, %v551_v4  ;;  %v4193_v10 = vsel %vm473_vm5, 1.0, %v5284_v45  ;;  %4567 = vmatpush3.bf16.msra.mxu0 %v5600_v41 }
  0xbd   :  { %4547 = vmatmul.mubr.msk.f32.gmra.mrb[12].mxu0 %vm180_vm4, %v552_v3  ;;  %v529_v7 = vpop.permute.xlu1 %528  ;;  %4584 = vmatprep.subr.bf16.mxu0 %v5284_v45 }
  0xbe   :  { %v524_v8 = vpop.permute.xlu0 %523  ;;  %v538_v11 = vsel %vm109_vm1, %v529_v7, 0.0 }
  0xbf   :  { %v537_v12 = vsel %vm109_vm1, %v524_v8, 0.0  ;;  %v546_v13 = vadd.f32 %v4194_v9, %v538_v11  ;;  %vm5285_vm1 = vmmov 0  }
  0xc0   :  { %v545_v14 = vadd.f32 %v4193_v10, %v537_v12  ;;  %v4204_v10 = vld [vmem:[%s6540_s9] ss:$0 sm:$0xff] }
  0xc1   :  { %v554_v15 = vadd.f32 %v5479_v47, %v546_v13 }
  0xc2   :  { %v553_v16 = vadd.f32 %v5479_v47, %v545_v14  ;;  %v4970_v47 = vld [vmem:[%s6536_s5 + $0x8] sm:$0xff]  }
  0xc3   :  { %4524 = vmatprep.subr.bf16.mxu1 %v4970_v47 }
  0xc4   :  { %4549 = vmatprep.mubr.msk.f32.mxu0 %vm180_vm4, %v553_v16  ;;  %4525 = vmatpush3.bf16.msra.mxu1 %v4970_v47 }
  0xc5   :  { %4550 = vmatmul.mubr.msk.f32.gmra.mrb[14].mxu0 %vm180_vm4, %v554_v15  ;;  %4552 = vmatprep.subr.bf16.mxu1 %v4971_v20  ;;  %vm960_vm4 = vcmask 523264  }
  0xc6   :  { %4568 = vmatprep.mubr.msk.bf16.mxu0 %vm5285_vm1, %v5284_v45 }
  0xc9   :  { %4569 = vmatmul.mubr.msk.bf16.vlgmr.msra.gmra.mrb[16].mxu0 %vm341_vm6, %v826_v19 }
  0xca   :  { %4585 = vmatpush3.bf16.msra.mxu0 %v5544_v44  ;;  %4588 = vmatprep.mubr.msk.bf16.mxu0 %vm5285_vm1, %v5284_v45 }
  0xcb   :  { %4586 = vmatprep.subr.bf16.mxu0 %v5284_v45 }
  0xce   :  { %4587 = vmatpush3.bf16.msra.mxu0 %v5600_v41 }
  0xcf   :  { %4604 = vmatprep.subr.bf16.mxu0 %v5284_v45 }
 0x160   :  { %v4512_v22 = vpop.f32.mrb[0].mxu0 }
 0x161   :  { %v275_v23 = vpop.f32.mrb[1].mxu0 }
 0x162   :  { %v314_v24 = vpack.c.bf16 %v4512_v22, %v275_v23 }
 0x164   :  { %4526 = vmatprep.mubr.msk.bf16.mxu1 %vm341_vm6, %v314_v24 }
 0x168   :  { %v4515_v25 = vpop.f32.mrb[2].mxu0 }
 0x169   :  { %v285_v26 = vpop.f32.mrb[3].mxu0 }
 0x16a   :  { %v315_v27 = vpack.c.bf16 %v4515_v25, %v285_v26 }
 0x16c   :  { %4527 = vmatmul.mubr.msk.bf16.vlgmr.msra.gmra.mrb[0].mxu1 %vm341_vm6, %v315_v27 }
 0x16d   :  { %4553 = vmatpush3.bf16.msra.mxu1 %v4971_v20 }
 0x16e   :  { %4554 = vmatprep.subr.bf16.mxu1 %v4972_v28 }
 0x170   :  { %v4518_v29 = vpop.f32.mrb[4].mxu0 }
 0x171   :  { %v295_v30 = vpop.f32.mrb[5].mxu0  ;;  %4555 = vmatpush3.bf16.msra.mxu1 %v4972_v28 }
 0x172   :  { %v316_v31 = vpack.c.bf16 %v4518_v29, %v295_v30  ;;  %4572 = vmatprep.subr.bf16.mxu1 %v5284_v45 }
 0x174   :  { %4530 = vmatprep.mubr.msk.bf16.mxu1 %vm341_vm6, %v316_v31  ;;  %v892_v31 = vpop.permute.xlu1 %891 }
 0x178   :  { %v4521_v32 = vpop.f32.mrb[6].mxu0 }
 0x179   :  { %v305_v33 = vpop.f32.mrb[7].mxu0 }
 0x17a   :  { %v317_v34 = vpack.c.bf16 %v4521_v32, %v305_v33 }
 0x17c   :  { %4531 = vmatmul.mubr.msk.bf16.gmra.mrb[4].mxu1 %vm341_vm6, %v317_v34 }
 0x180   :  { %v4542_v35 = vpop.f32.mrb[8].mxu0 }
 0x181   :  { %v651_v36 = vpop.f32.mrb[9].mxu0 }
 0x182   :  { %v690_v37 = vpack.c.bf16 %v4542_v35, %v651_v36  ;;  %v5675_v35 = vld [vmem:[%s6536_s5 + $0x20] sm:$0xff]   ;;  %v5681_v36 = vld [vmem:[%s6536_s5 + $0x28] sm:$0xff]  }
 0x184   :  { %4556 = vmatprep.mubr.msk.bf16.mxu1 %vm341_vm6, %v690_v37 }
 0x188   :  { %v4545_v38 = vpop.f32.mrb[10].mxu0 }
 0x189   :  { %v661_v39 = vpop.f32.mrb[11].mxu0 }
 0x18a   :  { %v691_v40 = vpack.c.bf16 %v4545_v38, %v661_v39  ;;  %v921_v38 = vld [vmem:[#allocation4 + $0x8] sm:$0xff] }
 0x18b   :  { %v5692_v39 = vld [vmem:[%s6536_s5 + $0x30] sm:$0xff]  }
 0x18c   :  { %4557 = vmatmul.mubr.msk.bf16.vlgmr.msra.gmra.mrb[8].mxu1 %vm341_vm6, %v691_v40  ;;  %v5698_v40 = vld [vmem:[%s6536_s5 + $0x38] sm:$0xff]  }
 0x18d   :  { %4573 = vmatpush3.bf16.msra.mxu1 %v5675_v35 }
 0x18e   :  { %4574 = vmatprep.subr.bf16.mxu1 %v5284_v45 }
 0x190   :  { %v4548_v42 = vpop.f32.mrb[12].mxu0 }
 0x191   :  { %v671_v43 = vpop.f32.mrb[13].mxu0  ;;  %4575 = vmatpush3.bf16.msra.mxu1 %v5681_v36 }
 0x192   :  { %v692_v46 = vpack.c.bf16 %v4548_v42, %v671_v43  ;;  %4576 = vmatprep.subr.bf16.mxu1 %v5284_v45 }
 0x194   :  { %4560 = vmatprep.mubr.msk.bf16.mxu1 %vm341_vm6, %v692_v46 }
 0x195   :  { %4577 = vmatpush3.bf16.msra.mxu1 %v5692_v39 }
 0x196   :  { %4578 = vmatprep.subr.bf16.mxu1 %v5284_v45 }
 0x198   :  { %v4551_v48 = vpop.f32.mrb[14].mxu0 }
 0x199   :  { %v681_v49 = vpop.f32.mrb[15].mxu0  ;;  %4579 = vmatpush3.bf16.msra.mxu1 %v5698_v40 }
 0x19a   :  { %v693_v50 = vpack.c.bf16 %v4551_v48, %v681_v49  ;;  %4592 = vmatprep.subr.bf16.mxu1 %v5284_v45 }
 0x19c   :  { %4561 = vmatmul.mubr.msk.bf16.gmra.mrb[12].mxu1 %vm341_vm6, %v693_v50  ;;  %v876_v51 = vpop.f32.mrb[16].mxu0 }
 0x19d   :  { %4580 = vmatprep.mubr.msk.bf16.mxu1 %vm5285_vm1, %v5284_v45  ;;  %v4570_v52 = vpop.f32.mrb[17].mxu0 }
 0x19e   :  { %v879_v53 = vpop.f32.mrb[18].mxu0 }
 0x19f   :  { %v4571_v54 = vpop.f32.mrb[19].mxu0 }
 0x1a0   :  { %v5728_v54 = vld [vmem:[%s6537_s6 + $0x1] ss:$0 sm:$0xff] }
 0x23f   :  { %v4528_v56 = vpop.f32.mrb[0].mxu1 }
 0x240   :  { %v5637_v57 = vadd.f32 %v4528_v56, %v4180_v55  ;;  %v388_v58 = vpop.f32.mrb[1].mxu1 }
 0x241   :  { %v389_v59 = vadd.f32 %v4180_v55, %v388_v58  ;;  %v4529_v60 = vpop.f32.mrb[2].mxu1 }
 0x242   :  { %v5639_v61 = vadd.f32 %v4529_v60, %v4180_v55  ;;  %v391_v62 = vpop.f32.mrb[3].mxu1 }
 0x243   :  { %v882_v63 = vadd.f32 %v876_v51, %v389_v59  ;;  %v5641_v0 = vadd.f32 %v4180_v55, %v391_v62 }
 0x245   :  { %4985 = vtanh.f32 %v882_v63  ;;  %v4223_v25 = vmul.f32 -1.442695, %v882_v63 }
 0x247   :  { %4987 = vpow2.f32 %v4223_v25 }
 0x24f   :  { %v4986_v1 = vpop.eup %4985  ;;  %v4532_v2 = vpop.f32.mrb[4].mxu1 }
 0x250   :  { %v5643_v3 = vadd.f32 %v4532_v2, %v4180_v55  ;;  %v404_v4 = vpop.f32.mrb[5].mxu1  ;;  %896 = vrot.lane.b32.xlu0 %v4986_v1, %s5287_s1 }
 0x251   :  { %v5646_v5 = vadd.f32 %v4180_v55, %v404_v4  ;;  %v4533_v6 = vpop.f32.mrb[6].mxu1  ;;  %v4988_v26 = vpop.eup %4987 }
 0x252   :  { %v5648_v7 = vadd.f32 %v4533_v6, %v4180_v55  ;;  %v407_v8 = vpop.f32.mrb[7].mxu1  ;;  %v886_v27 = vadd.f32 1.0, %v4988_v26 }
 0x253   :  { %v5650_v9 = vadd.f32 %v4180_v55, %v407_v8 }
 0x254   :  { %4989 = vrcp.f32 %v886_v27 }
 0x25e   :  { %v4990_v28 = vpop.eup %4989 }
 0x25f   :  { %v4558_v11 = vpop.f32.mrb[8].mxu1  ;;  %v894_v32 = vmul.f32 %v4990_v28, %v892_v31 }
 0x260   :  { %v5655_v12 = vadd.f32 %v4558_v11, %v4204_v10  ;;  %v5657_v13 = vpop.f32.mrb[9].mxu1 }
 0x261   :  { %v4559_v14 = vpop.f32.mrb[10].mxu1 }
 0x262   :  { %v5659_v15 = vadd.f32 %v4559_v14, %v4204_v10  ;;  %v766_v16 = vpop.f32.mrb[11].mxu1 }
 0x263   :  { %v5661_v17 = vadd.f32 %v4204_v10, %v766_v16 }
 0x26f   :  { %v4562_v47 = vpop.f32.mrb[12].mxu1 }
 0x270   :  { %v5663_v18 = vadd.f32 %v4562_v47, %v4204_v10  ;;  %v779_v19 = vpop.f32.mrb[13].mxu1 }
 0x271   :  { %v5665_v20 = vadd.f32 %v4204_v10, %v779_v19  ;;  %v4563_v21 = vpop.f32.mrb[14].mxu1 }
 0x272   :  { %v5667_v22 = vadd.f32 %v4563_v21, %v4204_v10  ;;  %v782_v23 = vpop.f32.mrb[15].mxu1 }
 0x273   :  { %v5669_v24 = vadd.f32 %v4204_v10, %v782_v23  ;;  %v922_v10 = vld [vmem:[#allocation5 + $0x8] sm:$0xff] }
 0x2c2   :  { %v897_v29 = vpop.permute.xlu0 %896 }
 0x2c3   :  { %v899_v30 = vmul.f32 %v4990_v28, %v897_v29 }
 0x2c5   :  { %901 = vrot.lane.b32.xlu0 %v899_v30, %s5286_s24 }
 0x337   :  { %v902_v33 = vpop.permute.xlu0 %901 }
 0x338   :  { %v904_v34 = vadd.f32 %v902_v33, %v894_v32 }
 0x33a   :  { %4991 = vtanh.f32 %v904_v34 }
 0x344   :  { %v4992_v37 = vpop.eup %4991 }
 0x345   :  { %907 = vrot.lane.b32.xlu1 %v4992_v37, %s5287_s1 }
 0x349   :  { %925 = vrot.lane.b32.xlu1 %v921_v38, %s5286_s24 }
 0x34d   :  { %912 = vrot.lane.b32.xlu1 %v904_v34, %s5288_s2 }
 0x3b7   :  { %v908_v42 = vpop.permute.xlu1 %907 }
 0x3b8   :  { %v910_v43 = vmul.f32 %v4990_v28, %v908_v42 }
 0x3ba   :  { %917 = vrot.lane.b32.xlu0 %v910_v43, %s5286_s24 }
 0x3bb   :  { %v926_v46 = vpop.permute.xlu1 %925 }
 0x3bf   :  { %v913_v48 = vpop.permute.xlu1 %912 }
 0x3c0   :  { %915 = vst.msk [vmem:[#allocation5] sm:$0xff] %vm341_vm6, %v913_v48 }
 0x3c7   :  { %v1043_v11 = vld [vmem:[#allocation5] sm:$0xff] }
 0x42c   :  { %v918_v49 = vpop.permute.xlu0 %917 }
 0x42d   :  { %920 = vst.msk [vmem:[#allocation4] sm:$0xff] %vm341_vm6, %v918_v49 }
 0x434   :  { %v1042_v50 = vld [vmem:[#allocation4] sm:$0xff] }
 0x435   :  { %v1045_v51 = vpack.c.bf16 %v1042_v50, %v1042_v50  ;;  %v928_v52 = vsel %vm341_vm6, %v1042_v50, %v926_v46 }
 0x436   :  { %v929_v53 = vpack.c.bf16 %v928_v52, %v928_v52 }
 0x437   :  { %4589 = vmatmul.mubr.msk.bf16.vlgmr.msra.gmra.mrb[20].mxu0 %vm341_vm6, %v1045_v51 }
 0x438   :  { %4581 = vmatmul.mubr.msk.bf16.vlgmr.msra.gmra.mrb[16].mxu1 %vm960_vm4, %v929_v53  ;;  %4605 = vmatpush3.bf16.msra.mxu0 %v5544_v44 }
 0x439   :  { %4606 = vmatprep.subr.bf16.mxu0 %v5284_v45  ;;  %4608 = vmatprep.mubr.msk.bf16.mxu0 %vm5285_vm1, %v5284_v45 }
 0x43a   :  { %4593 = vmatpush3.bf16.msra.mxu1 %v5675_v35  ;;  %4600 = vmatprep.mubr.msk.bf16.mxu1 %vm5285_vm1, %v5284_v45 }
 0x43b   :  { %4594 = vmatprep.subr.bf16.mxu1 %v5284_v45 }
 0x43c   :  { %4607 = vmatpush3.bf16.msra.mxu0 %v5600_v41 }
 0x43d   :  { %4612 = vmatprep.subr.bf16.mxu0 %v5284_v45 }
 0x43e   :  { %4595 = vmatpush3.bf16.msra.mxu1 %v5681_v36 }
 0x43f   :  { %4596 = vmatprep.subr.bf16.mxu1 %v5284_v45 }
 0x442   :  { %4597 = vmatpush3.bf16.msra.mxu1 %v5692_v39 }
 0x443   :  { %4598 = vmatprep.subr.bf16.mxu1 %v5284_v45 }
 0x446   :  { %4599 = vmatpush3.bf16.msra.mxu1 %v5698_v40 }
 0x447   :  { %4624 = vmatprep.subr.bf16.mxu1 %v5284_v45 }
 0x50a   :  { %v1083_v55 = vpop.f32.mrb[20].mxu0 }
 0x50b   :  { %v1089_v56 = vadd.f32 %v1083_v55, %v5641_v0  ;;  %v998_v58 = vpop.f32.mrb[16].mxu1  ;;  %v4590_v59 = vpop.f32.mrb[21].mxu0 }
 0x50c   :  { %v999_v60 = vadd.f32 %v5728_v54, %v998_v58  ;;  %v4582_v62 = vpop.f32.mrb[17].mxu1  ;;  %v1086_v63 = vpop.f32.mrb[22].mxu0 }
 0x50d   :  { %4993 = vtanh.f32 %v1089_v56  ;;  %v1001_v1 = vpop.f32.mrb[18].mxu1  ;;  %v4591_v2 = vpop.f32.mrb[23].mxu0  ;;  %v4232_v14 = vmul.f32 -1.442695, %v1089_v56 }
 0x50e   :  { %4995 = vtanh.f32 %v999_v60  ;;  %v4583_v4 = vpop.f32.mrb[19].mxu1  ;;  %v4230_v0 = vmul.f32 -1.442695, %v999_v60 }
 0x510   :  { %4997 = vpow2.f32 %v4230_v0 }
 0x511   :  { %4999 = vpow2.f32 %v4232_v14 }
 0x517   :  { %v4994_v6 = vpop.eup %4993 }
 0x518   :  { %v4996_v8 = vpop.eup %4995  ;;  %1103 = vrot.lane.b32.xlu1 %v4994_v6, %s5287_s1 }
 0x519   :  { %1017 = vrot.lane.b32.xlu0 %v4996_v8, %s5287_s1 }
 0x51a   :  { %v4998_v16 = vpop.eup %4997 }
 0x51b   :  { %v1007_v47 = vadd.f32 1.0, %v4998_v16  ;;  %v5000_v19 = vpop.eup %4999 }
 0x51c   :  { %1098 = vrot.lane.b32.xlu1 %v1043_v11, %s5286_s24  ;;  %v1093_v21 = vadd.f32 1.0, %v5000_v19 }
 0x51d   :  { %1012 = vrot.lane.b32.xlu0 %v922_v10, %s5286_s24  ;;  %5001 = vrcp.f32 %v1007_v47 }
 0x51e   :  { %5003 = vrcp.f32 %v1093_v21 }
 0x527   :  { %v5002_v23 = vpop.eup %5001 }
 0x528   :  { %v5004_v28 = vpop.eup %5003 }
 0x58a   :  { %v1104_v27 = vpop.permute.xlu1 %1103 }
 0x58b   :  { %v1018_v25 = vpop.permute.xlu0 %1017  ;;  %v1106_v29 = vmul.f32 %v5004_v28, %v1104_v27 }
 0x58c   :  { %v1020_v26 = vmul.f32 %v5002_v23, %v1018_v25 }
 0x58e   :  { %1022 = vrot.lane.b32.xlu0 %v1020_v26, %s5286_s24  ;;  %v1099_v32 = vpop.permute.xlu1 %1098 }
 0x58f   :  { %v1013_v30 = vpop.permute.xlu0 %1012  ;;  %v1101_v37 = vmul.f32 %v5004_v28, %v1099_v32 }
 0x590   :  { %v1015_v31 = vmul.f32 %v5002_v23, %v1013_v30 }
 0x592   :  { %1108 = vrot.lane.b32.xlu0 %v1106_v29, %s5286_s24 }
 0x600   :  { %v1023_v33 = vpop.permute.xlu0 %1022 }
 0x601   :  { %v1025_v34 = vadd.f32 %v1023_v33, %v1015_v31 }
 0x603   :  { %5005 = vtanh.f32 %v1025_v34 }
 0x604   :  { %v1109_v38 = vpop.permute.xlu0 %1108 }
 0x605   :  { %v1111_v42 = vadd.f32 %v1109_v38, %v1101_v37 }
 0x607   :  { %5007 = vtanh.f32 %v1111_v42 }
 0x60d   :  { %v5006_v43 = vpop.eup %5005 }
 0x60e   :  { %1028 = vrot.lane.b32.xlu1 %v5006_v43, %s5287_s1 }
 0x611   :  { %v5008_v46 = vpop.eup %5007 }
 0x612   :  { %1114 = vrot.lane.b32.xlu0 %v5008_v46, %s5287_s1 }
 0x680   :  { %v1029_v48 = vpop.permute.xlu1 %1028 }
 0x681   :  { %v1031_v49 = vmul.f32 %v5002_v23, %v1029_v48 }
 0x683   :  { %1038 = vrot.lane.b32.xlu1 %v1031_v49, %s5286_s24 }
 0x684   :  { %v1115_v50 = vpop.permute.xlu0 %1114 }
 0x685   :  { %v1117_v51 = vmul.f32 %v5004_v28, %v1115_v50 }
 0x687   :  { %1124 = vrot.lane.b32.xlu0 %v1117_v51, %s5286_s24 }
 0x68b   :  { %1033 = vrot.lane.b32.xlu0 %v1025_v34, %s5288_s2 }
 0x68f   :  { %1119 = vrot.lane.b32.xlu0 %v1111_v42, %s5288_s2 }
 0x6f5   :  { %v1039_v52 = vpop.permute.xlu1 %1038 }
 0x6f6   :  { %1041 = vst.msk [vmem:[#allocation4 + $0x8] sm:$0xff] %vm341_vm6, %v1039_v52 }
 0x6f9   :  { %v1125_v53 = vpop.permute.xlu0 %1124 }
 0x6fa   :  { %1127 = vst.msk [vmem:[#allocation4] sm:$0xff] %vm341_vm6, %v1125_v53 }
 0x6fd   :  { %v1034_v55 = vpop.permute.xlu0 %1033  ;;  %v1128_v56 = vld [vmem:[#allocation4 + $0x8] sm:$0xff] }
 0x6fe   :  { %1036 = vst.msk [vmem:[#allocation5 + $0x8] sm:$0xff] %vm341_vm6, %v1034_v55  ;;  %1132 = vrot.lane.b32.xlu1 %v1128_v56, %s5286_s24 }
 0x701   :  { %v1120_v58 = vpop.permute.xlu0 %1119  ;;  %v1218_v59 = vld [vmem:[#allocation4] sm:$0xff] }
 0x702   :  { %1122 = vst.msk [vmem:[#allocation5] sm:$0xff] %vm341_vm6, %v1120_v58  ;;  %v1221_v60 = vpack.c.bf16 %v1218_v59, %v1218_v59 }
 0x704   :  { %4609 = vmatmul.mubr.msk.bf16.vlgmr.msra.gmra.mrb[24].mxu0 %vm341_vm6, %v1221_v60 }
 0x705   :  { %4613 = vmatpush3.bf16.msra.mxu0 %v5675_v35  ;;  %4620 = vmatprep.mubr.msk.bf16.mxu0 %vm5285_vm1, %v5284_v45 }
 0x706   :  { %4614 = vmatprep.subr.bf16.mxu0 %v5284_v45 }
 0x709   :  { %4615 = vmatpush3.bf16.msra.mxu0 %v5681_v36  ;;  %v1219_v0 = vld [vmem:[#allocation5] sm:$0xff] }
 0x70a   :  { %4616 = vmatprep.subr.bf16.mxu0 %v5284_v45 }
 0x70d   :  { %4617 = vmatpush3.bf16.msra.mxu0 %v5692_v39 }
 0x70e   :  { %4618 = vmatprep.subr.bf16.mxu0 %v5284_v45 }
 0x711   :  { %4619 = vmatpush3.bf16.msra.mxu0 %v5698_v40 }
 0x712   :  { %4644 = vmatprep.subr.bf16.mxu0 %v5284_v45 }
 0x770   :  { %v1133_v62 = vpop.permute.xlu1 %1132 }
 0x771   :  { %v1135_v63 = vsel %vm341_vm6, %v1218_v59, %v1133_v62 }
 0x772   :  { %v1136_v1 = vpack.c.bf16 %v1135_v63, %v1135_v63 }
 0x774   :  { %4601 = vmatmul.mubr.msk.bf16.vlgmr.msra.gmra.mrb[20].mxu1 %vm960_vm4, %v1136_v1 }
 0x775   :  { %4625 = vmatpush3.bf16.msra.mxu1 %v5544_v44  ;;  %4628 = vmatprep.mubr.msk.bf16.mxu1 %vm5285_vm1, %v5284_v45 }
 0x776   :  { %4626 = vmatprep.subr.bf16.mxu1 %v5284_v45 }
 0x779   :  { %4627 = vmatpush3.bf16.msra.mxu1 %v5600_v41 }
 0x77a   :  { %4632 = vmatprep.subr.bf16.mxu1 %v5284_v45 }
 0x7d7   :  { %v1259_v2 = vpop.f32.mrb[24].mxu0 }
 0x7d8   :  { %v1265_v4 = vadd.f32 %v1259_v2, %v5637_v57  ;;  %v4610_v6 = vpop.f32.mrb[25].mxu0  ;;  %v1129_v57 = vld [vmem:[#allocation5 + $0x8] sm:$0xff] }
 0x7d9   :  { %v1262_v8 = vpop.f32.mrb[26].mxu0 }
 0x7da   :  { %5009 = vtanh.f32 %v1265_v4  ;;  %v4611_v10 = vpop.f32.mrb[27].mxu0  ;;  %v4236_v26 = vmul.f32 -1.442695, %v1265_v4 }
 0x7e4   :  { %v5010_v11 = vpop.eup %5009 }
 0x7e5   :  { %1279 = vrot.lane.b32.xlu0 %v5010_v11, %s5287_s1 }
 0x7e9   :  { %1274 = vrot.lane.b32.xlu0 %v1219_v0, %s5286_s24 }
 0x847   :  { %v1174_v14 = vpop.f32.mrb[20].mxu1 }
 0x848   :  { %v1175_v16 = vadd.f32 %v5728_v54, %v1174_v14  ;;  %v4602_v47 = vpop.f32.mrb[21].mxu1 }
 0x849   :  { %v1177_v19 = vpop.f32.mrb[22].mxu1 }
 0x84a   :  { %5011 = vtanh.f32 %v1175_v16  ;;  %v4603_v21 = vpop.f32.mrb[23].mxu1  ;;  %v4234_v25 = vmul.f32 -1.442695, %v1175_v16 }
 0x84c   :  { %5013 = vpow2.f32 %v4234_v25 }
 0x84d   :  { %5015 = vpow2.f32 %v4236_v26 }
 0x854   :  { %v5012_v23 = vpop.eup %5011 }
 0x855   :  { %1193 = vrot.lane.b32.xlu1 %v5012_v23, %s5287_s1 }
 0x856   :  { %v5014_v27 = vpop.eup %5013 }
 0x857   :  { %v1183_v28 = vadd.f32 1.0, %v5014_v27  ;;  %v5016_v29 = vpop.eup %5015  ;;  %v1280_v34 = vpop.permute.xlu0 %1279 }
 0x858   :  { %v1269_v30 = vadd.f32 1.0, %v5016_v29 }
 0x859   :  { %1188 = vrot.lane.b32.xlu1 %v1129_v57, %s5286_s24  ;;  %5017 = vrcp.f32 %v1183_v28 }
 0x85a   :  { %5019 = vrcp.f32 %v1269_v30 }
 0x85b   :  { %v1275_v46 = vpop.permute.xlu0 %1274 }
 0x863   :  { %v5018_v31 = vpop.eup %5017 }
 0x864   :  { %v5020_v37 = vpop.eup %5019 }
 0x865   :  { %v1282_v38 = vmul.f32 %v5020_v37, %v1280_v34  ;;  %v1277_v50 = vmul.f32 %v5020_v37, %v1275_v46 }
 0x8c7   :  { %v1194_v32 = vpop.permute.xlu1 %1193 }
 0x8c8   :  { %v1196_v33 = vmul.f32 %v5018_v31, %v1194_v32 }
 0x8ca   :  { %1198 = vrot.lane.b32.xlu1 %v1196_v33, %s5286_s24 }
 0x8cb   :  { %v1189_v42 = vpop.permute.xlu1 %1188 }
 0x8cc   :  { %v1191_v43 = vmul.f32 %v5018_v31, %v1189_v42 }
 0x8ce   :  { %1284 = vrot.lane.b32.xlu1 %v1282_v38, %s5286_s24 }
 0x93c   :  { %v1199_v48 = vpop.permute.xlu1 %1198 }
 0x93d   :  { %v1201_v49 = vadd.f32 %v1199_v48, %v1191_v43 }
 0x93f   :  { %5021 = vtanh.f32 %v1201_v49 }
 0x940   :  { %v1285_v51 = vpop.permute.xlu1 %1284 }
 0x941   :  { %v1287_v52 = vadd.f32 %v1285_v51, %v1277_v50 }
 0x943   :  { %5023 = vtanh.f32 %v1287_v52 }
 0x949   :  { %v5022_v53 = vpop.eup %5021 }
 0x94a   :  { %1204 = vrot.lane.b32.xlu0 %v5022_v53, %s5287_s1 }
 0x94d   :  { %v5024_v55 = vpop.eup %5023 }
 0x94e   :  { %1290 = vrot.lane.b32.xlu1 %v5024_v55, %s5287_s1 }
 0x9bc   :  { %v1205_v56 = vpop.permute.xlu0 %1204 }
 0x9bd   :  { %v1207_v58 = vmul.f32 %v5018_v31, %v1205_v56 }
 0x9bf   :  { %1214 = vrot.lane.b32.xlu0 %v1207_v58, %s5286_s24 }
 0x9c0   :  { %v1291_v59 = vpop.permute.xlu1 %1290 }
 0x9c1   :  { %v1293_v60 = vmul.f32 %v5020_v37, %v1291_v59 }
 0x9c3   :  { %1300 = vrot.lane.b32.xlu1 %v1293_v60, %s5286_s24 }
 0x9c7   :  { %1209 = vrot.lane.b32.xlu1 %v1201_v49, %s5288_s2 }
 0x9cb   :  { %1295 = vrot.lane.b32.xlu1 %v1287_v52, %s5288_s2 }
 0xa31   :  { %v1215_v62 = vpop.permute.xlu0 %1214 }
 0xa32   :  { %1217 = vst.msk [vmem:[#allocation4 + $0x8] sm:$0xff] %vm341_vm6, %v1215_v62 }
 0xa35   :  { %v1301_v63 = vpop.permute.xlu1 %1300 }
 0xa36   :  { %1303 = vst.msk [vmem:[#allocation4] sm:$0xff] %vm341_vm6, %v1301_v63 }
 0xa39   :  { %v1210_v1 = vpop.permute.xlu1 %1209  ;;  %v1304_v2 = vld [vmem:[#allocation4 + $0x8] sm:$0xff] }
 0xa3a   :  { %1212 = vst.msk [vmem:[#allocation5 + $0x8] sm:$0xff] %vm341_vm6, %v1210_v1  ;;  %1308 = vrot.lane.b32.xlu0 %v1304_v2, %s5286_s24 }
 0xa3d   :  { %v1296_v4 = vpop.permute.xlu1 %1295  ;;  %v1394_v6 = vld [vmem:[#allocation4] sm:$0xff] }
 0xa3e   :  { %1298 = vst.msk [vmem:[#allocation5] sm:$0xff] %vm341_vm6, %v1296_v4  ;;  %v1397_v8 = vpack.c.bf16 %v1394_v6, %v1394_v6 }
 0xa40   :  { %4629 = vmatmul.mubr.msk.bf16.vlgmr.msra.gmra.mrb[24].mxu1 %vm341_vm6, %v1397_v8 }
 0xa41   :  { %4633 = vmatpush3.bf16.msra.mxu1 %v5675_v35  ;;  %4640 = vmatprep.mubr.msk.bf16.mxu1 %vm5285_vm1, %v5284_v45 }
 0xa42   :  { %4634 = vmatprep.subr.bf16.mxu1 %v5284_v45 }
 0xa45   :  { %4635 = vmatpush3.bf16.msra.mxu1 %v5681_v36  ;;  %v1395_v57 = vld [vmem:[#allocation5] sm:$0xff] }
 0xa46   :  { %4636 = vmatprep.subr.bf16.mxu1 %v5284_v45 }
 0xa49   :  { %4637 = vmatpush3.bf16.msra.mxu1 %v5692_v39 }
 0xa4a   :  { %4638 = vmatprep.subr.bf16.mxu1 %v5284_v45 }
 0xa4d   :  { %4639 = vmatpush3.bf16.msra.mxu1 %v5698_v40 }
 0xa4e   :  { %4664 = vmatprep.subr.bf16.mxu1 %v5284_v45 }
 0xaac   :  { %v1309_v10 = vpop.permute.xlu0 %1308 }
 0xaad   :  { %v1311_v11 = vsel %vm341_vm6, %v1394_v6, %v1309_v10 }
 0xaae   :  { %v1312_v0 = vpack.c.bf16 %v1311_v11, %v1311_v11 }
 0xab0   :  { %4621 = vmatmul.mubr.msk.bf16.vlgmr.msra.gmra.mrb[28].mxu0 %vm960_vm4, %v1312_v0 }
 0xab1   :  { %4645 = vmatpush3.bf16.msra.mxu0 %v5544_v44  ;;  %4648 = vmatprep.mubr.msk.bf16.mxu0 %vm5285_vm1, %v5284_v45 }
 0xab2   :  { %4646 = vmatprep.subr.bf16.mxu0 %v5284_v45 }
 0xab5   :  { %4647 = vmatpush3.bf16.msra.mxu0 %v5600_v41 }
 0xab6   :  { %4652 = vmatprep.subr.bf16.mxu0 %v5284_v45 }
 0xb13   :  { %v1435_v14 = vpop.f32.mrb[24].mxu1 }
 0xb14   :  { %v1441_v16 = vadd.f32 %v1435_v14, %v5639_v61  ;;  %v4630_v47 = vpop.f32.mrb[25].mxu1  ;;  %v1305_v61 = vld [vmem:[#allocation5 + $0x8] sm:$0xff] }
 0xb15   :  { %v1438_v19 = vpop.f32.mrb[26].mxu1 }
 0xb16   :  { %5025 = vtanh.f32 %v1441_v16  ;;  %v4631_v21 = vpop.f32.mrb[27].mxu1  ;;  %v4240_v32 = vmul.f32 -1.442695, %v1441_v16 }
 0xb20   :  { %v5026_v23 = vpop.eup %5025 }
 0xb21   :  { %1455 = vrot.lane.b32.xlu1 %v5026_v23, %s5287_s1 }
 0xb25   :  { %1450 = vrot.lane.b32.xlu1 %v1395_v57, %s5286_s24 }
 0xb83   :  { %v1350_v25 = vpop.f32.mrb[28].mxu0 }
 0xb84   :  { %v1351_v26 = vadd.f32 %v5728_v54, %v1350_v25  ;;  %v4622_v27 = vpop.f32.mrb[29].mxu0 }
 0xb85   :  { %v1353_v28 = vpop.f32.mrb[30].mxu0 }
 0xb86   :  { %5027 = vtanh.f32 %v1351_v26  ;;  %v4623_v29 = vpop.f32.mrb[31].mxu0  ;;  %v4238_v31 = vmul.f32 -1.442695, %v1351_v26 }
 0xb88   :  { %5029 = vpow2.f32 %v4238_v31 }
 0xb89   :  { %5031 = vpow2.f32 %v4240_v32 }
 0xb90   :  { %v5028_v30 = vpop.eup %5027 }
 0xb91   :  { %1369 = vrot.lane.b32.xlu0 %v5028_v30, %s5287_s1 }
 0xb92   :  { %v5030_v33 = vpop.eup %5029 }
 0xb93   :  { %v1359_v34 = vadd.f32 1.0, %v5030_v33  ;;  %v5032_v37 = vpop.eup %5031  ;;  %v1456_v48 = vpop.permute.xlu1 %1455 }
 0xb94   :  { %v1445_v38 = vadd.f32 1.0, %v5032_v37 }
 0xb95   :  { %1364 = vrot.lane.b32.xlu0 %v1305_v61, %s5286_s24  ;;  %5033 = vrcp.f32 %v1359_v34 }
 0xb96   :  { %5035 = vrcp.f32 %v1445_v38 }
 0xb97   :  { %v1451_v53 = vpop.permute.xlu1 %1450 }
 0xb9f   :  { %v5034_v42 = vpop.eup %5033 }
 0xba0   :  { %v5036_v49 = vpop.eup %5035 }
 0xba1   :  { %v1458_v50 = vmul.f32 %v5036_v49, %v1456_v48  ;;  %v1453_v58 = vmul.f32 %v5036_v49, %v1451_v53 }
 0xc03   :  { %v1370_v43 = vpop.permute.xlu0 %1369 }
 0xc04   :  { %v1372_v46 = vmul.f32 %v5034_v42, %v1370_v43 }
 0xc06   :  { %1374 = vrot.lane.b32.xlu0 %v1372_v46, %s5286_s24 }
 0xc07   :  { %v1365_v51 = vpop.permute.xlu0 %1364 }
 0xc08   :  { %v1367_v52 = vmul.f32 %v5034_v42, %v1365_v51 }
 0xc0a   :  { %1460 = vrot.lane.b32.xlu0 %v1458_v50, %s5286_s24 }
 0xc78   :  { %v1375_v55 = vpop.permute.xlu0 %1374 }
 0xc79   :  { %v1377_v56 = vadd.f32 %v1375_v55, %v1367_v52 }
 0xc7b   :  { %5037 = vtanh.f32 %v1377_v56 }
 0xc7c   :  { %v1461_v59 = vpop.permute.xlu0 %1460 }
 0xc7d   :  { %v1463_v60 = vadd.f32 %v1461_v59, %v1453_v58 }
 0xc7f   :  { %5039 = vtanh.f32 %v1463_v60 }
 0xc85   :  { %v5038_v62 = vpop.eup %5037 }
 0xc86   :  { %1380 = vrot.lane.b32.xlu1 %v5038_v62, %s5287_s1 }
 0xc89   :  { %v5040_v63 = vpop.eup %5039 }
 0xc8a   :  { %1466 = vrot.lane.b32.xlu0 %v5040_v63, %s5287_s1 }
 0xcf8   :  { %v1381_v1 = vpop.permute.xlu1 %1380 }
 0xcf9   :  { %v1383_v2 = vmul.f32 %v5034_v42, %v1381_v1 }
 0xcfb   :  { %1390 = vrot.lane.b32.xlu1 %v1383_v2, %s5286_s24 }
 0xcfc   :  { %v1467_v4 = vpop.permute.xlu0 %1466 }
 0xcfd   :  { %v1469_v6 = vmul.f32 %v5036_v49, %v1467_v4 }
 0xcff   :  { %1476 = vrot.lane.b32.xlu0 %v1469_v6, %s5286_s24 }
 0xd03   :  { %1385 = vrot.lane.b32.xlu0 %v1377_v56, %s5288_s2 }
 0xd07   :  { %1471 = vrot.lane.b32.xlu0 %v1463_v60, %s5288_s2 }
 0xd6d   :  { %v1391_v8 = vpop.permute.xlu1 %1390 }
 0xd6e   :  { %1393 = vst.msk [vmem:[#allocation4 + $0x8] sm:$0xff] %vm341_vm6, %v1391_v8 }
 0xd71   :  { %v1477_v10 = vpop.permute.xlu0 %1476 }
 0xd72   :  { %1479 = vst.msk [vmem:[#allocation4] sm:$0xff] %vm341_vm6, %v1477_v10 }
 0xd75   :  { %v1386_v11 = vpop.permute.xlu0 %1385  ;;  %v1480_v0 = vld [vmem:[#allocation4 + $0x8] sm:$0xff] }
 0xd76   :  { %1388 = vst.msk [vmem:[#allocation5 + $0x8] sm:$0xff] %vm341_vm6, %v1386_v11  ;;  %1484 = vrot.lane.b32.xlu1 %v1480_v0, %s5286_s24 }
 0xd79   :  { %v1472_v14 = vpop.permute.xlu0 %1471  ;;  %v1570_v16 = vld [vmem:[#allocation4] sm:$0xff] }
 0xd7a   :  { %1474 = vst.msk [vmem:[#allocation5] sm:$0xff] %vm341_vm6, %v1472_v14  ;;  %v1573_v47 = vpack.c.bf16 %v1570_v16, %v1570_v16 }
 0xd7c   :  { %4649 = vmatmul.mubr.msk.bf16.vlgmr.msra.gmra.mrb[32].mxu0 %vm341_vm6, %v1573_v47 }
 0xd7d   :  { %4653 = vmatpush3.bf16.msra.mxu0 %v5675_v35  ;;  %4660 = vmatprep.mubr.msk.bf16.mxu0 %vm5285_vm1, %v5284_v45 }
 0xd7e   :  { %4654 = vmatprep.subr.bf16.mxu0 %v5284_v45 }
 0xd81   :  { %4655 = vmatpush3.bf16.msra.mxu0 %v5681_v36 }
 0xd82   :  { %4656 = vmatprep.subr.bf16.mxu0 %v5284_v45 }
 0xd85   :  { %4657 = vmatpush3.bf16.msra.mxu0 %v5692_v39 }
 0xd86   :  { %4658 = vmatprep.subr.bf16.mxu0 %v5284_v45 }
 0xd89   :  { %4659 = vmatpush3.bf16.msra.mxu0 %v5698_v40 }
 0xd8a   :  { %4684 = vmatprep.subr.bf16.mxu0 %v5284_v45 }
 0xde8   :  { %v1485_v19 = vpop.permute.xlu1 %1484 }
 0xde9   :  { %v1487_v21 = vsel %vm341_vm6, %v1570_v16, %v1485_v19 }
 0xdea   :  { %v1488_v23 = vpack.c.bf16 %v1487_v21, %v1487_v21 }
 0xdec   :  { %4641 = vmatmul.mubr.msk.bf16.vlgmr.msra.gmra.mrb[28].mxu1 %vm960_vm4, %v1488_v23 }
 0xded   :  { %4665 = vmatpush3.bf16.msra.mxu1 %v5544_v44  ;;  %4668 = vmatprep.mubr.msk.bf16.mxu1 %vm5285_vm1, %v5284_v45  ;;  %v1571_v44 = vld [vmem:[#allocation5] sm:$0xff] }
 0xdee   :  { %4666 = vmatprep.subr.bf16.mxu1 %v5284_v45 }
 0xdf1   :  { %4667 = vmatpush3.bf16.msra.mxu1 %v5600_v41 }
 0xdf2   :  { %4672 = vmatprep.subr.bf16.mxu1 %v5284_v45 }
 0xe4f   :  { %v1611_v57 = vpop.f32.mrb[32].mxu0 }
 0xe50   :  { %v1617_v25 = vadd.f32 %v1611_v57, %v5646_v5  ;;  %v4650_v26 = vpop.f32.mrb[33].mxu0  ;;  %v1481_v5 = vld [vmem:[#allocation5 + $0x8] sm:$0xff] }
 0xe51   :  { %v1614_v27 = vpop.f32.mrb[34].mxu0 }
 0xe52   :  { %5041 = vtanh.f32 %v1617_v25  ;;  %v4651_v28 = vpop.f32.mrb[35].mxu0  ;;  %v4244_v37 = vmul.f32 -1.442695, %v1617_v25  ;;  %v5879_v27 = vld [vmem:[%s6536_s5 + $0x10] sm:$0xff]  }
 0xe53   :  { %v5888_v28 = vld [vmem:[%s6536_s5 + $0x18] sm:$0xff]  }
 0xe5c   :  { %v5042_v29 = vpop.eup %5041 }
 0xe5d   :  { %1631 = vrot.lane.b32.xlu0 %v5042_v29, %s5287_s1 }
 0xe61   :  { %1626 = vrot.lane.b32.xlu0 %v1571_v44, %s5286_s24 }
 0xebf   :  { %v1526_v30 = vpop.f32.mrb[28].mxu1 }
 0xec0   :  { %v1527_v61 = vadd.f32 %v5728_v54, %v1526_v30  ;;  %v4642_v31 = vpop.f32.mrb[29].mxu1 }
 0xec1   :  { %v1529_v41 = vpop.f32.mrb[30].mxu1 }
 0xec2   :  { %5043 = vtanh.f32 %v1527_v61  ;;  %v4643_v32 = vpop.f32.mrb[31].mxu1  ;;  %v4242_v34 = vmul.f32 -1.442695, %v1527_v61 }
 0xec4   :  { %5045 = vpow2.f32 %v4242_v34 }
 0xec5   :  { %5047 = vpow2.f32 %v4244_v37 }
 0xecc   :  { %v5044_v33 = vpop.eup %5043 }
 0xecd   :  { %1545 = vrot.lane.b32.xlu1 %v5044_v33, %s5287_s1 }
 0xece   :  { %v5046_v38 = vpop.eup %5045 }
 0xecf   :  { %v1535_v42 = vadd.f32 1.0, %v5046_v38  ;;  %v5048_v43 = vpop.eup %5047  ;;  %v1632_v51 = vpop.permute.xlu0 %1631 }
 0xed0   :  { %v1621_v46 = vadd.f32 1.0, %v5048_v43 }
 0xed1   :  { %1540 = vrot.lane.b32.xlu1 %v1481_v5, %s5286_s24  ;;  %5049 = vrcp.f32 %v1535_v42 }
 0xed2   :  { %5051 = vrcp.f32 %v1621_v46 }
 0xed3   :  { %v1627_v58 = vpop.permute.xlu0 %1626 }
 0xedb   :  { %v5050_v48 = vpop.eup %5049 }
 0xedc   :  { %v5052_v52 = vpop.eup %5051 }
 0xedd   :  { %v1634_v53 = vmul.f32 %v5052_v52, %v1632_v51  ;;  %v1629_v62 = vmul.f32 %v5052_v52, %v1627_v58 }
 0xf3f   :  { %v1546_v49 = vpop.permute.xlu1 %1545 }
 0xf40   :  { %v1548_v50 = vmul.f32 %v5050_v48, %v1546_v49 }
 0xf42   :  { %1550 = vrot.lane.b32.xlu1 %v1548_v50, %s5286_s24 }
 0xf43   :  { %v1541_v55 = vpop.permute.xlu1 %1540 }
 0xf44   :  { %v1543_v56 = vmul.f32 %v5050_v48, %v1541_v55 }
 0xf46   :  { %1636 = vrot.lane.b32.xlu1 %v1634_v53, %s5286_s24 }
 0xfb4   :  { %v1551_v59 = vpop.permute.xlu1 %1550 }
 0xfb5   :  { %v1553_v60 = vadd.f32 %v1551_v59, %v1543_v56 }
 0xfb7   :  { %5053 = vtanh.f32 %v1553_v60 }
 0xfb8   :  { %v1637_v63 = vpop.permute.xlu1 %1636 }
 0xfb9   :  { %v1639_v1 = vadd.f32 %v1637_v63, %v1629_v62 }
 0xfbb   :  { %5055 = vtanh.f32 %v1639_v1 }
 0xfc1   :  { %v5054_v2 = vpop.eup %5053 }
 0xfc2   :  { %1556 = vrot.lane.b32.xlu0 %v5054_v2, %s5287_s1 }
 0xfc5   :  { %v5056_v4 = vpop.eup %5055 }
 0xfc6   :  { %1642 = vrot.lane.b32.xlu1 %v5056_v4, %s5287_s1 }
0x1034   :  { %v1557_v6 = vpop.permute.xlu0 %1556 }
0x1035   :  { %v1559_v8 = vmul.f32 %v5050_v48, %v1557_v6 }
0x1037   :  { %1566 = vrot.lane.b32.xlu0 %v1559_v8, %s5286_s24 }
0x1038   :  { %v1643_v10 = vpop.permute.xlu1 %1642 }
0x1039   :  { %v1645_v11 = vmul.f32 %v5052_v52, %v1643_v10 }
0x103b   :  { %1652 = vrot.lane.b32.xlu1 %v1645_v11, %s5286_s24 }
0x103f   :  { %1561 = vrot.lane.b32.xlu1 %v1553_v60, %s5288_s2 }
0x1043   :  { %1647 = vrot.lane.b32.xlu1 %v1639_v1, %s5288_s2 }
0x10a9   :  { %v1567_v0 = vpop.permute.xlu0 %1566 }
0x10aa   :  { %1569 = vst.msk [vmem:[#allocation4 + $0x8] sm:$0xff] %vm341_vm6, %v1567_v0 }
0x10ad   :  { %v1653_v14 = vpop.permute.xlu1 %1652 }
0x10ae   :  { %1655 = vst.msk [vmem:[#allocation4] sm:$0xff] %vm341_vm6, %v1653_v14 }
0x10b1   :  { %v1562_v16 = vpop.permute.xlu1 %1561  ;;  %v1656_v47 = vld [vmem:[#allocation4 + $0x8] sm:$0xff] }
0x10b2   :  { %1564 = vst.msk [vmem:[#allocation5 + $0x8] sm:$0xff] %vm341_vm6, %v1562_v16  ;;  %1660 = vrot.lane.b32.xlu0 %v1656_v47, %s5286_s24 }
0x10b5   :  { %v1648_v19 = vpop.permute.xlu1 %1647  ;;  %v1746_v21 = vld [vmem:[#allocation4] sm:$0xff] }
0x10b6   :  { %1650 = vst.msk [vmem:[#allocation5] sm:$0xff] %vm341_vm6, %v1648_v19  ;;  %v1749_v23 = vpack.c.bf16 %v1746_v21, %v1746_v21 }
0x10b8   :  { %4669 = vmatmul.mubr.msk.bf16.vlgmr.msra.gmra.mrb[32].mxu1 %vm341_vm6, %v1749_v23 }
0x10b9   :  { %4673 = vmatpush3.bf16.msra.mxu1 %v5675_v35  ;;  %4680 = vmatprep.mubr.msk.bf16.mxu1 %vm5285_vm1, %v5284_v45 }
0x10ba   :  { %4674 = vmatprep.subr.bf16.mxu1 %v5284_v45 }
0x10bd   :  { %4675 = vmatpush3.bf16.msra.mxu1 %v5681_v36  ;;  %v1747_v32 = vld [vmem:[#allocation5] sm:$0xff] }
0x10be   :  { %4676 = vmatprep.subr.bf16.mxu1 %v5284_v45 }
0x10c1   :  { %4677 = vmatpush3.bf16.msra.mxu1 %v5692_v39 }
0x10c2   :  { %4678 = vmatprep.subr.bf16.mxu1 %v5284_v45 }
0x10c5   :  { %4679 = vmatpush3.bf16.msra.mxu1 %v5698_v40 }
0x10c6   :  { %4704 = vmatprep.subr.bf16.mxu1 %v5284_v45 }
0x1124   :  { %v1661_v57 = vpop.permute.xlu0 %1660 }
0x1125   :  { %v1663_v25 = vsel %vm341_vm6, %v1746_v21, %v1661_v57 }
0x1126   :  { %v1664_v26 = vpack.c.bf16 %v1663_v25, %v1663_v25 }
0x1128   :  { %4661 = vmatmul.mubr.msk.bf16.vlgmr.msra.gmra.mrb[36].mxu0 %vm960_vm4, %v1664_v26 }
0x1129   :  { %4685 = vmatpush3.bf16.msra.mxu0 %v5879_v27  ;;  %4688 = vmatprep.mubr.msk.bf16.mxu0 %vm5285_vm1, %v5284_v45 }
0x112a   :  { %4686 = vmatprep.subr.bf16.mxu0 %v5284_v45 }
0x112d   :  { %4687 = vmatpush3.bf16.msra.mxu0 %v5888_v28 }
0x112e   :  { %4692 = vmatprep.subr.bf16.mxu0 %v5284_v45 }
0x118b   :  { %v1787_v29 = vpop.f32.mrb[32].mxu1 }
0x118c   :  { %v1793_v44 = vadd.f32 %v1787_v29, %v5650_v9  ;;  %v4670_v30 = vpop.f32.mrb[33].mxu1  ;;  %v1657_v9 = vld [vmem:[#allocation5 + $0x8] sm:$0xff] }
0x118d   :  { %v1790_v61 = vpop.f32.mrb[34].mxu1 }
0x118e   :  { %5057 = vtanh.f32 %v1793_v44  ;;  %v4671_v31 = vpop.f32.mrb[35].mxu1  ;;  %v4248_v46 = vmul.f32 -1.442695, %v1793_v44 }
0x1198   :  { %v5058_v41 = vpop.eup %5057 }
0x1199   :  { %1807 = vrot.lane.b32.xlu1 %v5058_v41, %s5287_s1 }
0x119d   :  { %1802 = vrot.lane.b32.xlu1 %v1747_v32, %s5286_s24 }
0x11fb   :  { %v1702_v33 = vpop.f32.mrb[36].mxu0 }
0x11fc   :  { %v1703_v5 = vadd.f32 %v5728_v54, %v1702_v33  ;;  %v4662_v34 = vpop.f32.mrb[37].mxu0 }
0x11fd   :  { %v1705_v37 = vpop.f32.mrb[38].mxu0 }
0x11fe   :  { %5059 = vtanh.f32 %v1703_v5  ;;  %v4663_v38 = vpop.f32.mrb[39].mxu0  ;;  %v4246_v43 = vmul.f32 -1.442695, %v1703_v5 }
0x1200   :  { %5061 = vpow2.f32 %v4246_v43 }
0x1201   :  { %5063 = vpow2.f32 %v4248_v46 }
0x1208   :  { %v5060_v42 = vpop.eup %5059 }
0x1209   :  { %1721 = vrot.lane.b32.xlu0 %v5060_v42, %s5287_s1 }
0x120a   :  { %v5062_v48 = vpop.eup %5061 }
0x120b   :  { %v1711_v49 = vadd.f32 1.0, %v5062_v48  ;;  %v5064_v50 = vpop.eup %5063  ;;  %v1808_v56 = vpop.permute.xlu1 %1807 }
0x120c   :  { %v1797_v51 = vadd.f32 1.0, %v5064_v50 }
0x120d   :  { %1716 = vrot.lane.b32.xlu0 %v1657_v9, %s5286_s24  ;;  %5065 = vrcp.f32 %v1711_v49 }
0x120e   :  { %5067 = vrcp.f32 %v1797_v51 }
0x120f   :  { %v1803_v63 = vpop.permute.xlu1 %1802 }
0x1217   :  { %v5066_v52 = vpop.eup %5065 }
0x1218   :  { %v5068_v58 = vpop.eup %5067 }
0x1219   :  { %v1810_v59 = vmul.f32 %v5068_v58, %v1808_v56  ;;  %v1805_v4 = vmul.f32 %v5068_v58, %v1803_v63 }
0x127b   :  { %v1722_v53 = vpop.permute.xlu0 %1721 }
0x127c   :  { %v1724_v55 = vmul.f32 %v5066_v52, %v1722_v53 }
0x127e   :  { %1726 = vrot.lane.b32.xlu0 %v1724_v55, %s5286_s24 }
0x127f   :  { %v1717_v60 = vpop.permute.xlu0 %1716 }
0x1280   :  { %v1719_v62 = vmul.f32 %v5066_v52, %v1717_v60 }
0x1282   :  { %1812 = vrot.lane.b32.xlu0 %v1810_v59, %s5286_s24 }
0x12f0   :  { %v1727_v1 = vpop.permute.xlu0 %1726 }
0x12f1   :  { %v1729_v2 = vadd.f32 %v1727_v1, %v1719_v62 }
0x12f3   :  { %5069 = vtanh.f32 %v1729_v2 }
0x12f4   :  { %v1813_v6 = vpop.permute.xlu0 %1812 }
0x12f5   :  { %v1815_v8 = vadd.f32 %v1813_v6, %v1805_v4 }
0x12f7   :  { %5071 = vtanh.f32 %v1815_v8 }
0x12fd   :  { %v5070_v10 = vpop.eup %5069 }
0x12fe   :  { %1732 = vrot.lane.b32.xlu1 %v5070_v10, %s5287_s1 }
0x1301   :  { %v5072_v11 = vpop.eup %5071 }
0x1302   :  { %1818 = vrot.lane.b32.xlu0 %v5072_v11, %s5287_s1 }
0x1370   :  { %v1733_v0 = vpop.permute.xlu1 %1732 }
0x1371   :  { %v1735_v14 = vmul.f32 %v5066_v52, %v1733_v0 }
0x1373   :  { %1742 = vrot.lane.b32.xlu1 %v1735_v14, %s5286_s24 }
0x1374   :  { %v1819_v16 = vpop.permute.xlu0 %1818 }
0x1375   :  { %v1821_v47 = vmul.f32 %v5068_v58, %v1819_v16 }
0x1377   :  { %1828 = vrot.lane.b32.xlu0 %v1821_v47, %s5286_s24 }
0x137b   :  { %1737 = vrot.lane.b32.xlu0 %v1729_v2, %s5288_s2 }
0x137f   :  { %1823 = vrot.lane.b32.xlu0 %v1815_v8, %s5288_s2 }
0x13e5   :  { %v1743_v19 = vpop.permute.xlu1 %1742 }
0x13e6   :  { %1745 = vst.msk [vmem:[#allocation4 + $0x8] sm:$0xff] %vm341_vm6, %v1743_v19 }
0x13e9   :  { %v1829_v21 = vpop.permute.xlu0 %1828 }
0x13ea   :  { %1831 = vst.msk [vmem:[#allocation4] sm:$0xff] %vm341_vm6, %v1829_v21 }
0x13ed   :  { %v1738_v23 = vpop.permute.xlu0 %1737  ;;  %v1832_v57 = vld [vmem:[#allocation4 + $0x8] sm:$0xff] }
0x13ee   :  { %1740 = vst.msk [vmem:[#allocation5 + $0x8] sm:$0xff] %vm341_vm6, %v1738_v23  ;;  %1836 = vrot.lane.b32.xlu1 %v1832_v57, %s5286_s24  ;;  %v5243_v57 = vld [vmem:[%s6536_s5 + $0x20] sm:$0xff]  }
0x13f1   :  { %v1824_v25 = vpop.permute.xlu0 %1823  ;;  %v1922_v26 = vld [vmem:[#allocation4] sm:$0xff] }
0x13f2   :  { %1826 = vst.msk [vmem:[#allocation5] sm:$0xff] %vm341_vm6, %v1824_v25  ;;  %v1925_v29 = vpack.c.bf16 %v1922_v26, %v1922_v26  ;;  %v5244_v25 = vld [vmem:[%s6536_s5 + $0x28] sm:$0xff]  }
0x13f4   :  { %4689 = vmatmul.mubr.msk.bf16.vlgmr.msra.gmra.mrb[40].mxu0 %vm341_vm6, %v1925_v29  ;;  %v5246_v29 = vld [vmem:[%s6536_s5 + $0x38] sm:$0xff]  }
0x13f5   :  { %4693 = vmatpush3.bf16.msra.mxu0 %v5675_v35  ;;  %4700 = vmatprep.mubr.msk.bf16.mxu0 %vm5285_vm1, %v5284_v45 }
0x13f6   :  { %4694 = vmatprep.subr.bf16.mxu0 %v5284_v45 }
0x13f9   :  { %4695 = vmatpush3.bf16.msra.mxu0 %v5681_v36 }
0x13fa   :  { %4696 = vmatprep.subr.bf16.mxu0 %v5284_v45 }
0x13fd   :  { %4697 = vmatpush3.bf16.msra.mxu0 %v5692_v39 }
0x13fe   :  { %4698 = vmatprep.subr.bf16.mxu0 %v5284_v45 }
0x1401   :  { %4699 = vmatpush3.bf16.msra.mxu0 %v5698_v40 }
0x1402   :  { %4724 = vmatprep.subr.bf16.mxu0 %v5284_v45 }
0x1460   :  { %v1837_v44 = vpop.permute.xlu1 %1836 }
0x1461   :  { %v1839_v35 = vsel %vm341_vm6, %v1922_v26, %v1837_v44  ;;  %v5245_v26 = vld [vmem:[%s6536_s5 + $0x30] sm:$0xff]  }
0x1462   :  { %v1840_v30 = vpack.c.bf16 %v1839_v35, %v1839_v35 }
0x1464   :  { %4681 = vmatmul.mubr.msk.bf16.vlgmr.msra.gmra.mrb[36].mxu1 %vm960_vm4, %v1840_v30 }
0x1465   :  { %4705 = vmatpush3.bf16.msra.mxu1 %v5879_v27  ;;  %4708 = vmatprep.mubr.msk.bf16.mxu1 %vm5285_vm1, %v5284_v45  ;;  %v1923_v27 = vld [vmem:[#allocation5] sm:$0xff] }
0x1466   :  { %4706 = vmatprep.subr.bf16.mxu1 %v5284_v45 }
0x1469   :  { %4707 = vmatpush3.bf16.msra.mxu1 %v5888_v28 }
0x146a   :  { %4712 = vmatprep.subr.bf16.mxu1 %v5284_v45 }
0x14c7   :  { %v1963_v36 = vpop.f32.mrb[40].mxu0 }
0x14c8   :  { %v1969_v39 = vadd.f32 %v1963_v36, %v5643_v3  ;;  %v4690_v40 = vpop.f32.mrb[41].mxu0  ;;  %v1833_v3 = vld [vmem:[#allocation5 + $0x8] sm:$0xff] }
0x14c9   :  { %v1966_v61 = vpop.f32.mrb[42].mxu0 }
0x14ca   :  { %5073 = vtanh.f32 %v1969_v39  ;;  %v4691_v31 = vpop.f32.mrb[43].mxu0  ;;  %v4252_v42 = vmul.f32 -1.442695, %v1969_v39 }
0x14d4   :  { %v5074_v41 = vpop.eup %5073 }
0x14d5   :  { %1983 = vrot.lane.b32.xlu0 %v5074_v41, %s5287_s1 }
0x14d9   :  { %1978 = vrot.lane.b32.xlu0 %v1923_v27, %s5286_s24 }
0x1537   :  { %v1878_v32 = vpop.f32.mrb[36].mxu1 }
0x1538   :  { %v1879_v33 = vadd.f32 %v5728_v54, %v1878_v32  ;;  %v4682_v5 = vpop.f32.mrb[37].mxu1 }
0x1539   :  { %v1881_v28 = vpop.f32.mrb[38].mxu1 }
0x153a   :  { %5075 = vtanh.f32 %v1879_v33  ;;  %v4683_v34 = vpop.f32.mrb[39].mxu1  ;;  %v4250_v38 = vmul.f32 -1.442695, %v1879_v33  ;;  %v5978_v33 = vld [vmem:[%s6537_s6 + $0x1] ss:$0 sm:$0xff] }
0x153c   :  { %5077 = vpow2.f32 %v4250_v38 }
0x153d   :  { %5079 = vpow2.f32 %v4252_v42 }
0x1544   :  { %v5076_v37 = vpop.eup %5075 }
0x1545   :  { %1897 = vrot.lane.b32.xlu1 %v5076_v37, %s5287_s1 }
0x1546   :  { %v5078_v9 = vpop.eup %5077 }
0x1547   :  { %v1887_v43 = vadd.f32 1.0, %v5078_v9  ;;  %v5080_v46 = vpop.eup %5079  ;;  %v1984_v51 = vpop.permute.xlu0 %1983 }
0x1548   :  { %v1973_v48 = vadd.f32 1.0, %v5080_v46 }
0x1549   :  { %1892 = vrot.lane.b32.xlu1 %v1833_v3, %s5286_s24  ;;  %5081 = vrcp.f32 %v1887_v43 }
0x154a   :  { %5083 = vrcp.f32 %v1973_v48 }
0x154b   :  { %v1979_v58 = vpop.permute.xlu0 %1978 }
0x1553   :  { %v5082_v54 = vpop.eup %5081 }
0x1554   :  { %v5084_v52 = vpop.eup %5083 }
0x1555   :  { %v1986_v53 = vmul.f32 %v5084_v52, %v1984_v51  ;;  %v1981_v62 = vmul.f32 %v5084_v52, %v1979_v58 }
0x15b7   :  { %v1898_v49 = vpop.permute.xlu1 %1897 }
0x15b8   :  { %v1900_v50 = vmul.f32 %v5082_v54, %v1898_v49 }
0x15ba   :  { %1902 = vrot.lane.b32.xlu1 %v1900_v50, %s5286_s24 }
0x15bb   :  { %v1893_v55 = vpop.permute.xlu1 %1892 }
0x15bc   :  { %v1895_v56 = vmul.f32 %v5082_v54, %v1893_v55 }
0x15be   :  { %1988 = vrot.lane.b32.xlu1 %v1986_v53, %s5286_s24 }
0x162c   :  { %v1903_v59 = vpop.permute.xlu1 %1902 }
0x162d   :  { %v1905_v60 = vadd.f32 %v1903_v59, %v1895_v56 }
0x162f   :  { %5085 = vtanh.f32 %v1905_v60 }
0x1630   :  { %v1989_v63 = vpop.permute.xlu1 %1988 }
0x1631   :  { %v1991_v1 = vadd.f32 %v1989_v63, %v1981_v62 }
0x1633   :  { %5087 = vtanh.f32 %v1991_v1 }
0x1639   :  { %v5086_v2 = vpop.eup %5085 }
0x163a   :  { %1908 = vrot.lane.b32.xlu0 %v5086_v2, %s5287_s1 }
0x163d   :  { %v5088_v4 = vpop.eup %5087 }
0x163e   :  { %1994 = vrot.lane.b32.xlu1 %v5088_v4, %s5287_s1 }
0x16ac   :  { %v1909_v6 = vpop.permute.xlu0 %1908 }
0x16ad   :  { %v1911_v8 = vmul.f32 %v5082_v54, %v1909_v6  ;;  %v5990_v6 = vld [vmem:[%s6539_s8 + $0x10] sm:$0xff]  }
0x16af   :  { %1918 = vrot.lane.b32.xlu0 %v1911_v8, %s5286_s24  ;;  %v5997_v8 = vld [vmem:[%s6539_s8 + $0x18] sm:$0xff]  }
0x16b0   :  { %v1995_v10 = vpop.permute.xlu1 %1994 }
0x16b1   :  { %v1997_v11 = vmul.f32 %v5084_v52, %v1995_v10 }
0x16b3   :  { %2004 = vrot.lane.b32.xlu1 %v1997_v11, %s5286_s24 }
0x16b7   :  { %1913 = vrot.lane.b32.xlu1 %v1905_v60, %s5288_s2 }
0x16bb   :  { %1999 = vrot.lane.b32.xlu1 %v1991_v1, %s5288_s2 }
0x1721   :  { %v1919_v0 = vpop.permute.xlu0 %1918 }
0x1722   :  { %1921 = vst.msk [vmem:[#allocation4 + $0x8] sm:$0xff] %vm341_vm6, %v1919_v0 }
0x1725   :  { %v2005_v14 = vpop.permute.xlu1 %2004 }
0x1726   :  { %2007 = vst.msk [vmem:[#allocation4] sm:$0xff] %vm341_vm6, %v2005_v14 }
0x1729   :  { %v1914_v16 = vpop.permute.xlu1 %1913  ;;  %v2008_v47 = vld [vmem:[#allocation4 + $0x8] sm:$0xff] }
0x172a   :  { %1916 = vst.msk [vmem:[#allocation5 + $0x8] sm:$0xff] %vm341_vm6, %v1914_v16  ;;  %2012 = vrot.lane.b32.xlu0 %v2008_v47, %s5286_s24 }
0x172d   :  { %v2000_v19 = vpop.permute.xlu1 %1999  ;;  %v2098_v21 = vld [vmem:[#allocation4] sm:$0xff] }
0x172e   :  { %2002 = vst.msk [vmem:[#allocation5] sm:$0xff] %vm341_vm6, %v2000_v19  ;;  %v2101_v23 = vpack.c.bf16 %v2098_v21, %v2098_v21 }
0x1730   :  { %4709 = vmatmul.mubr.msk.bf16.vlgmr.msra.gmra.mrb[40].mxu1 %vm341_vm6, %v2101_v23 }
0x1731   :  { %4713 = vmatpush3.bf16.msra.mxu1 %v5243_v57  ;;  %4720 = vmatprep.mubr.msk.bf16.mxu1 %vm5285_vm1, %v5284_v45  ;;  %v2009_v3 = vld [vmem:[#allocation5 + $0x8] sm:$0xff] }
0x1732   :  { %4714 = vmatprep.subr.bf16.mxu1 %v5284_v45 }
0x1735   :  { %4715 = vmatpush3.bf16.msra.mxu1 %v5244_v25  ;;  %v2099_v27 = vld [vmem:[#allocation5] sm:$0xff] }
0x1736   :  { %4716 = vmatprep.subr.bf16.mxu1 %v5284_v45 }
0x1739   :  { %4717 = vmatpush3.bf16.msra.mxu1 %v5245_v26 }
0x173a   :  { %4718 = vmatprep.subr.bf16.mxu1 %v5284_v45 }
0x173d   :  { %4719 = vmatpush3.bf16.msra.mxu1 %v5246_v29 }
0x173e   :  { %4744 = vmatprep.subr.bf16.mxu1 %v5284_v45 }
0x179c   :  { %v2013_v44 = vpop.permute.xlu0 %2012 }
0x179d   :  { %v2015_v35 = vsel %vm341_vm6, %v2098_v21, %v2013_v44 }
0x179e   :  { %v2016_v30 = vpack.c.bf16 %v2015_v35, %v2015_v35  ;;  %v5248_v35 = vld [vmem:[%s6540_s9] ss:$0 sm:$0xff] }
0x17a0   :  { %4701 = vmatmul.mubr.msk.bf16.vlgmr.msra.gmra.mrb[44].mxu0 %vm960_vm4, %v2016_v30  ;;  %v764_v30 = vadd.f32 %v5248_v35, %v5657_v13 }
0x17a1   :  { %4728 = vmatprep.mubr.msk.bf16.mxu0 %vm5285_vm1, %v5284_v45  ;;  %4725 = vmatpush3.bf16.msra.mxu0 %v5990_v6 }
0x17a2   :  { %4726 = vmatprep.subr.bf16.mxu0 %v5284_v45 }
0x17a5   :  { %4727 = vmatpush3.bf16.msra.mxu0 %v5997_v8 }
0x17a6   :  { %4732 = vmatprep.subr.bf16.mxu0 %v5284_v45 }
0x1803   :  { %v2139_v36 = vpop.f32.mrb[40].mxu1 }
0x1804   :  { %v2145_v39 = vadd.f32 %v2139_v36, %v5648_v7  ;;  %v4710_v40 = vpop.f32.mrb[41].mxu1 }
0x1805   :  { %v2142_v61 = vpop.f32.mrb[42].mxu1 }
0x1806   :  { %5089 = vtanh.f32 %v2145_v39  ;;  %v4711_v31 = vpop.f32.mrb[43].mxu1  ;;  %v4256_v42 = vmul.f32 -1.442695, %v2145_v39 }
0x1810   :  { %v5090_v41 = vpop.eup %5089 }
0x1811   :  { %2159 = vrot.lane.b32.xlu1 %v5090_v41, %s5287_s1 }
0x1815   :  { %2154 = vrot.lane.b32.xlu1 %v2099_v27, %s5286_s24 }
0x1873   :  { %v2054_v32 = vpop.f32.mrb[44].mxu0 }
0x1874   :  { %v2055_v5 = vadd.f32 %v5978_v33, %v2054_v32  ;;  %v4702_v28 = vpop.f32.mrb[45].mxu0 }
0x1875   :  { %v2057_v7 = vpop.f32.mrb[46].mxu0 }
0x1876   :  { %5091 = vtanh.f32 %v2055_v5  ;;  %v4703_v34 = vpop.f32.mrb[47].mxu0  ;;  %v4254_v38 = vmul.f32 -1.442695, %v2055_v5 }
0x1878   :  { %5093 = vpow2.f32 %v4254_v38 }
0x1879   :  { %5095 = vpow2.f32 %v4256_v42 }
0x1880   :  { %v5092_v37 = vpop.eup %5091 }
0x1881   :  { %2073 = vrot.lane.b32.xlu0 %v5092_v37, %s5287_s1 }
0x1882   :  { %v5094_v9 = vpop.eup %5093 }
0x1883   :  { %v2063_v43 = vadd.f32 1.0, %v5094_v9  ;;  %v5096_v46 = vpop.eup %5095  ;;  %v2160_v51 = vpop.permute.xlu1 %2159 }
0x1884   :  { %v2149_v48 = vadd.f32 1.0, %v5096_v46 }
0x1885   :  { %2068 = vrot.lane.b32.xlu0 %v2009_v3, %s5286_s24  ;;  %5097 = vrcp.f32 %v2063_v43 }
0x1886   :  { %5099 = vrcp.f32 %v2149_v48 }
0x1887   :  { %v2155_v58 = vpop.permute.xlu1 %2154 }
0x188f   :  { %v5098_v54 = vpop.eup %5097 }
0x1890   :  { %v5100_v52 = vpop.eup %5099 }
0x1891   :  { %v2162_v53 = vmul.f32 %v5100_v52, %v2160_v51  ;;  %v2157_v62 = vmul.f32 %v5100_v52, %v2155_v58 }
0x18f3   :  { %v2074_v49 = vpop.permute.xlu0 %2073 }
0x18f4   :  { %v2076_v50 = vmul.f32 %v5098_v54, %v2074_v49 }
0x18f6   :  { %2078 = vrot.lane.b32.xlu0 %v2076_v50, %s5286_s24 }
0x18f7   :  { %v2069_v55 = vpop.permute.xlu0 %2068 }
0x18f8   :  { %v2071_v56 = vmul.f32 %v5098_v54, %v2069_v55 }
0x18fa   :  { %2164 = vrot.lane.b32.xlu0 %v2162_v53, %s5286_s24 }
0x1968   :  { %v2079_v59 = vpop.permute.xlu0 %2078 }
0x1969   :  { %v2081_v60 = vadd.f32 %v2079_v59, %v2071_v56 }
0x196b   :  { %5101 = vtanh.f32 %v2081_v60 }
0x196c   :  { %v2165_v63 = vpop.permute.xlu0 %2164 }
0x196d   :  { %v2167_v1 = vadd.f32 %v2165_v63, %v2157_v62 }
0x196f   :  { %5103 = vtanh.f32 %v2167_v1 }
0x1975   :  { %v5102_v2 = vpop.eup %5101 }
0x1976   :  { %2084 = vrot.lane.b32.xlu1 %v5102_v2, %s5287_s1 }
0x1979   :  { %v5104_v4 = vpop.eup %5103 }
0x197a   :  { %2170 = vrot.lane.b32.xlu0 %v5104_v4, %s5287_s1 }
0x19e8   :  { %v2085_v10 = vpop.permute.xlu1 %2084 }
0x19e9   :  { %v2087_v11 = vmul.f32 %v5098_v54, %v2085_v10 }
0x19eb   :  { %2094 = vrot.lane.b32.xlu1 %v2087_v11, %s5286_s24 }
0x19ec   :  { %v2171_v0 = vpop.permute.xlu0 %2170 }
0x19ed   :  { %v2173_v14 = vmul.f32 %v5100_v52, %v2171_v0  ;;  %v6037_v0 = vld [vmem:[%s6539_s8 + $0x20] sm:$0xff]  }
0x19ef   :  { %2180 = vrot.lane.b32.xlu0 %v2173_v14, %s5286_s24  ;;  %v6044_v14 = vld [vmem:[%s6539_s8 + $0x28] sm:$0xff]  }
0x19f3   :  { %2089 = vrot.lane.b32.xlu0 %v2081_v60, %s5288_s2 }
0x19f7   :  { %2175 = vrot.lane.b32.xlu0 %v2167_v1, %s5288_s2 }
0x1a5d   :  { %v2095_v16 = vpop.permute.xlu1 %2094 }
0x1a5e   :  { %2097 = vst.msk [vmem:[#allocation4 + $0x8] sm:$0xff] %vm341_vm6, %v2095_v16  ;;  %v6052_v16 = vld [vmem:[%s6539_s8 + $0x30] sm:$0xff]  }
0x1a61   :  { %v2181_v47 = vpop.permute.xlu0 %2180 }
0x1a62   :  { %2183 = vst.msk [vmem:[#allocation4] sm:$0xff] %vm341_vm6, %v2181_v47  ;;  %v6060_v47 = vld [vmem:[%s6539_s8 + $0x38] sm:$0xff]  }
0x1a65   :  { %v2090_v19 = vpop.permute.xlu0 %2089  ;;  %v2184_v21 = vld [vmem:[#allocation4 + $0x8] sm:$0xff] }
0x1a66   :  { %2092 = vst.msk [vmem:[#allocation5 + $0x8] sm:$0xff] %vm341_vm6, %v2090_v19  ;;  %2188 = vrot.lane.b32.xlu1 %v2184_v21, %s5286_s24 }
0x1a69   :  { %v2176_v23 = vpop.permute.xlu0 %2175  ;;  %v2294_v57 = vld [vmem:[#allocation4] sm:$0xff] }
0x1a6a   :  { %2178 = vst.msk [vmem:[#allocation5] sm:$0xff] %vm341_vm6, %v2176_v23  ;;  %v2297_v25 = vpack.c.bf16 %v2294_v57, %v2294_v57 }
0x1a6c   :  { %4729 = vmatmul.mubr.msk.bf16.vlgmr.msra.gmra.mrb[48].mxu0 %vm341_vm6, %v2297_v25 }
0x1a6d   :  { %4740 = vmatprep.mubr.msk.bf16.mxu0 %vm5285_vm1, %v5284_v45  ;;  %v2185_v37 = vld [vmem:[#allocation5 + $0x8] sm:$0xff]  ;;  %4733 = vmatpush3.bf16.msra.mxu0 %v6037_v0 }
0x1a6e   :  { %4734 = vmatprep.subr.bf16.mxu0 %v5284_v45 }
0x1a71   :  { %v2295_v27 = vld [vmem:[#allocation5] sm:$0xff]  ;;  %4735 = vmatpush3.bf16.msra.mxu0 %v6044_v14 }
0x1a72   :  { %4736 = vmatprep.subr.bf16.mxu0 %v5284_v45 }
0x1a75   :  { %4737 = vmatpush3.bf16.msra.mxu0 %v6052_v16 }
0x1a76   :  { %4738 = vmatprep.subr.bf16.mxu0 %v5284_v45 }
0x1a79   :  { %4739 = vmatpush3.bf16.msra.mxu0 %v6060_v47 }
0x1a7a   :  { %4760 = vmatprep.subr.bf16.mxu0 %v5284_v45 }
0x1ad8   :  { %v2189_v26 = vpop.permute.xlu1 %2188 }
0x1ad9   :  { %v2191_v29 = vsel %vm341_vm6, %v2294_v57, %v2189_v26 }
0x1ada   :  { %v2192_v44 = vpack.c.bf16 %v2191_v29, %v2191_v29 }
0x1adc   :  { %4721 = vmatmul.mubr.msk.bf16.vlgmr.msra.gmra.mrb[44].mxu1 %vm960_vm4, %v2192_v44 }
0x1add   :  { %4748 = vmatprep.mubr.msk.bf16.mxu1 %vm5285_vm1, %v5284_v45 }
0x1b3f   :  { %v2347_v36 = vpop.f32.mrb[48].mxu0 }
0x1b40   :  { %v2353_v39 = vadd.f32 %v2347_v36, %v764_v30  ;;  %v4730_v40 = vpop.f32.mrb[49].mxu0  ;;  %v6087_v30 = vld [vmem:[%s6540_s9 + $0x1] ss:$0 sm:$0xff] }
0x1b41   :  { %v2350_v61 = vpop.f32.mrb[50].mxu0 }
0x1b42   :  { %5105 = vtanh.f32 %v2353_v39  ;;  %v4731_v31 = vpop.f32.mrb[51].mxu0  ;;  %v4271_v38 = vmul.f32 -1.442695, %v2353_v39 }
0x1b4c   :  { %v5106_v41 = vpop.eup %5105 }
0x1b4d   :  { %2367 = vrot.lane.b32.xlu0 %v5106_v41, %s5287_s1 }
0x1b51   :  { %2362 = vrot.lane.b32.xlu0 %v2295_v27, %s5286_s24 }
0x1baf   :  { %v2230_v32 = vpop.f32.mrb[44].mxu1 }
0x1bb0   :  { %v2231_v5 = vadd.f32 %v5978_v33, %v2230_v32  ;;  %v4722_v28 = vpop.f32.mrb[45].mxu1 }
0x1bb1   :  { %v2233_v7 = vpop.f32.mrb[46].mxu1 }
0x1bb2   :  { %5107 = vtanh.f32 %v2231_v5  ;;  %v4723_v34 = vpop.f32.mrb[47].mxu1  ;;  %v4258_v3 = vmul.f32 -1.442695, %v2231_v5 }
0x1bb4   :  { %5109 = vpow2.f32 %v4258_v3 }
0x1bb5   :  { %5111 = vpow2.f32 %v4271_v38 }
0x1bbc   :  { %v5108_v13 = vpop.eup %5107 }
0x1bbd   :  { %2249 = vrot.lane.b32.xlu1 %v5108_v13, %s5287_s1 }
0x1bbe   :  { %v5110_v42 = vpop.eup %5109 }
0x1bbf   :  { %v2239_v9 = vadd.f32 1.0, %v5110_v42  ;;  %v5112_v43 = vpop.eup %5111  ;;  %v2368_v49 = vpop.permute.xlu0 %2367 }
0x1bc0   :  { %v2357_v46 = vadd.f32 1.0, %v5112_v43  ;;  %v6105_v43 = vld [vmem:[%s6541_s10 + $0x8] sm:$0xff]  }
0x1bc1   :  { %2244 = vrot.lane.b32.xlu1 %v2185_v37, %s5286_s24  ;;  %5113 = vrcp.f32 %v2239_v9  ;;  %v6098_v9 = vld [vmem:[%s6541_s10] sm:$0xff]  }
0x1bc2   :  { %5115 = vrcp.f32 %v2357_v46  ;;  %4745 = vmatpush3.bf16.msra.mxu1 %v6098_v9 }
0x1bc3   :  { %v2363_v55 = vpop.permute.xlu0 %2362  ;;  %4746 = vmatprep.subr.bf16.mxu1 %v5284_v45 }
0x1bc6   :  { %4747 = vmatpush3.bf16.msra.mxu1 %v6105_v43 }
0x1bc7   :  { %4752 = vmatprep.subr.bf16.mxu1 %v5284_v45 }
0x1bcb   :  { %v5114_v33 = vpop.eup %5113 }
0x1bcc   :  { %v5116_v50 = vpop.eup %5115 }
0x1bcd   :  { %v2370_v51 = vmul.f32 %v5116_v50, %v2368_v49  ;;  %v2365_v59 = vmul.f32 %v5116_v50, %v2363_v55 }
0x1c2f   :  { %v2250_v48 = vpop.permute.xlu1 %2249 }
0x1c30   :  { %v2252_v54 = vmul.f32 %v5114_v33, %v2250_v48 }
0x1c32   :  { %2254 = vrot.lane.b32.xlu1 %v2252_v54, %s5286_s24 }
0x1c33   :  { %v2245_v52 = vpop.permute.xlu1 %2244 }
0x1c34   :  { %v2247_v53 = vmul.f32 %v5114_v33, %v2245_v52  ;;  %v6134_v52 = vld [vmem:[%s6542_s11] ss:$0 sm:$0xff] }
0x1c36   :  { %2372 = vrot.lane.b32.xlu1 %v2370_v51, %s5286_s24 }
0x1ca4   :  { %v2255_v56 = vpop.permute.xlu1 %2254 }
0x1ca5   :  { %v2257_v58 = vadd.f32 %v2255_v56, %v2247_v53 }
0x1ca7   :  { %5117 = vtanh.f32 %v2257_v58 }
0x1ca8   :  { %v2373_v60 = vpop.permute.xlu1 %2372 }
0x1ca9   :  { %v6028_v62 = vadd.f32 %v2373_v60, %v2365_v59 }
0x1cab   :  { %5119 = vtanh.f32 %v6028_v62 }
0x1cb1   :  { %v5118_v63 = vpop.eup %5117 }
0x1cb2   :  { %2260 = vrot.lane.b32.xlu0 %v5118_v63, %s5287_s1 }
0x1cb5   :  { %v5120_v1 = vpop.eup %5119 }
0x1cb6   :  { %2378 = vrot.lane.b32.xlu1 %v5120_v1, %s5287_s1 }
0x1d24   :  { %v2261_v2 = vpop.permute.xlu0 %2260 }
0x1d25   :  { %v2263_v4 = vmul.f32 %v5114_v33, %v2261_v2 }
0x1d27   :  { %2270 = vrot.lane.b32.xlu0 %v2263_v4, %s5286_s24 }
0x1d28   :  { %v2379_v10 = vpop.permute.xlu1 %2378 }
0x1d29   :  { %v2381_v11 = vmul.f32 %v5116_v50, %v2379_v10 }
0x1d2b   :  { %2388 = vrot.lane.b32.xlu1 %v2381_v11, %s5286_s24 }
0x1d2f   :  { %2265 = vrot.lane.b32.xlu1 %v2257_v58, %s5288_s2 }
0x1d99   :  { %v2271_v19 = vpop.permute.xlu0 %2270 }
0x1d9a   :  { %2273 = vst.msk [vmem:[#allocation4 + $0x8] sm:$0xff] %vm341_vm6, %v2271_v19 }
0x1d9d   :  { %v2389_v21 = vpop.permute.xlu1 %2388 }
0x1d9e   :  { %2391 = vst.msk [vmem:[#allocation4] sm:$0xff] %vm341_vm6, %v2389_v21 }
0x1da1   :  { %v2266_v23 = vpop.permute.xlu1 %2265  ;;  %v2392_v57 = vld [vmem:[#allocation4 + $0x8] sm:$0xff] }
0x1da2   :  { %2268 = vst.msk [vmem:[#allocation5 + $0x8] sm:$0xff] %vm341_vm6, %v2266_v23  ;;  %2396 = vrot.lane.b32.xlu0 %v2392_v57, %s5286_s24 }
0x1da5   :  { %v6069_v26 = vld [vmem:[#allocation4] sm:$0xff] }
0x1da6   :  { %v2581_v51 = vpack.c.bf16 %v6069_v26, %v6069_v26 }
0x1da9   :  { %v2393_v25 = vld [vmem:[#allocation5 + $0x8] sm:$0xff] }
0x1daa   :  { %2482 = vrot.lane.b32.xlu1 %v2393_v25, %s5286_s24 }
0x1e14   :  { %v2397_v29 = vpop.permute.xlu0 %2396 }
0x1e15   :  { %v2399_v44 = vsel %vm341_vm6, %v6069_v26, %v2397_v29 }
0x1e16   :  { %v2400_v35 = vpack.c.bf16 %v2399_v44, %v2399_v44 }
0x1e18   :  { %4741 = vmatmul.mubr.msk.bf16.vlgmr.msra.gmra.mrb[52].mxu0 %vm960_vm4, %v2400_v35 }
0x1e19   :  { %4761 = vmatpush3.bf16.msra.mxu0 %v6037_v0  ;;  %4768 = vmatprep.mubr.msk.bf16.mxu0 %vm5285_vm1, %v5284_v45 }
0x1e1a   :  { %4762 = vmatprep.subr.bf16.mxu0 %v5284_v45 }
0x1e1c   :  { %v2483_v13 = vpop.permute.xlu1 %2482 }
0x1e1d   :  { %4763 = vmatpush3.bf16.msra.mxu0 %v6044_v14 }
0x1e1e   :  { %4764 = vmatprep.subr.bf16.mxu0 %v5284_v45 }
0x1e21   :  { %4765 = vmatpush3.bf16.msra.mxu0 %v6052_v16 }
0x1e22   :  { %4766 = vmatprep.subr.bf16.mxu0 %v5284_v45 }
0x1e25   :  { %4767 = vmatpush3.bf16.msra.mxu0 %v6060_v47 }
0x1e26   :  { %4788 = vmatprep.subr.bf16.mxu0 %v5284_v45 }
0x1eeb   :  { %v2468_v36 = vpop.f32.mrb[52].mxu0 }
0x1eec   :  { %v2469_v39 = vadd.f32 %v6087_v30, %v2468_v36  ;;  %v4742_v40 = vpop.f32.mrb[53].mxu0 }
0x1eed   :  { %v2471_v61 = vpop.f32.mrb[54].mxu0 }
0x1eee   :  { %5121 = vtanh.f32 %v2469_v39  ;;  %v4743_v31 = vpop.f32.mrb[55].mxu0  ;;  %v4278_v27 = vmul.f32 -1.442695, %v2469_v39 }
0x1ef0   :  { %5123 = vpow2.f32 %v4278_v27 }
0x1ef8   :  { %v5122_v41 = vpop.eup %5121 }
0x1ef9   :  { %2487 = vrot.lane.b32.xlu0 %v5122_v41, %s5287_s1 }
0x1efa   :  { %v5124_v32 = vpop.eup %5123 }
0x1efb   :  { %v2477_v5 = vadd.f32 1.0, %v5124_v32 }
0x1efd   :  { %5125 = vrcp.f32 %v2477_v5 }
0x1f07   :  { %v5126_v28 = vpop.eup %5125 }
0x1f08   :  { %v2485_v37 = vmul.f32 %v5126_v28, %v2483_v13 }
0x1f6b   :  { %v2488_v7 = vpop.permute.xlu0 %2487 }
0x1f6c   :  { %v2490_v34 = vmul.f32 %v5126_v28, %v2488_v7 }
0x1f6e   :  { %2492 = vrot.lane.b32.xlu0 %v2490_v34, %s5286_s24 }
0x1fe0   :  { %v2493_v3 = vpop.permute.xlu0 %2492 }
0x1fe1   :  { %v6092_v38 = vadd.f32 %v2493_v3, %v2485_v37 }
0x1fe3   :  { %5127 = vtanh.f32 %v6092_v38 }
0x1fed   :  { %v5128_v42 = vpop.eup %5127 }
0x1fee   :  { %2498 = vrot.lane.b32.xlu1 %v5128_v42, %s5287_s1 }
0x1ff2   :  { %2383 = vrot.lane.b32.xlu1 %v6028_v62, %s5288_s2 }
0x2060   :  { %v2499_v46 = vpop.permute.xlu1 %2498 }
0x2061   :  { %v2501_v33 = vmul.f32 %v5126_v28, %v2499_v46 }
0x2063   :  { %v2512_v48 = vpack.c.bf16 %v2501_v33, %v2501_v33 }
0x2064   :  { %v2384_v54 = vpop.permute.xlu1 %2383 }
0x2065   :  { %2386 = vst.msk [vmem:[#allocation5] sm:$0xff] %vm341_vm6, %v2384_v54  ;;  %2520 = vrot.lane.b32.xlu0 %v2512_v48, %s5286_s24 }
0x206c   :  { %v2579_v49 = vld [vmem:[#allocation5] sm:$0xff] }
0x206d   :  { %2634 = vrot.lane.b32.xlu1 %v2579_v49, %s5286_s24 }
0x20d7   :  { %v2521_v50 = vpop.permute.xlu0 %2520 }
0x20d8   :  { %4749 = vmatmul.mubr.msk.bf16.vlgmr.msra.gmra.mrb[48].mxu1 %vm341_vm6, %v2521_v50 }
0x20d9   :  { %4753 = vmatpush3.bf16.msra.mxu1 %v5990_v6  ;;  %4756 = vmatprep.mubr.msk.bf16.mxu1 %vm5285_vm1, %v5284_v45 }
0x20da   :  { %4754 = vmatprep.subr.bf16.mxu1 %v5284_v45 }
0x20dd   :  { %4755 = vmatpush3.bf16.msra.mxu1 %v5997_v8 }
0x20de   :  { %4772 = vmatprep.subr.bf16.mxu1 %v5284_v45 }
0x20e0   :  { %4757 = vmatmul.mubr.msk.bf16.vlgmr.msra.gmra.mrb[52].mxu1 %vm341_vm6, %v2581_v51 }
0x20e1   :  { %4773 = vmatpush3.bf16.msra.mxu1 %v6098_v9  ;;  %4776 = vmatprep.mubr.msk.bf16.mxu1 %vm5285_vm1, %v5284_v45 }
0x20e2   :  { %4774 = vmatprep.subr.bf16.mxu1 %v5284_v45 }
0x20e5   :  { %4775 = vmatpush3.bf16.msra.mxu1 %v6105_v43 }
0x20e6   :  { %4780 = vmatprep.subr.bf16.mxu1 %v5284_v45 }
0x21ab   :  { %v2571_v53 = vpop.f32.mrb[48].mxu1 }
0x21ac   :  { %v2572_v55 = vadd.f32 %v6134_v52, %v2571_v53  ;;  %v4750_v56 = vpop.f32.mrb[49].mxu1 }
0x21ad   :  { %v2574_v58 = vpop.f32.mrb[50].mxu1 }
0x21ae   :  { %2577 = vst [vmem:[#allocation6] sm:$0xff] %v2572_v55  ;;  %v4751_v59 = vpop.f32.mrb[51].mxu1 }
0x21b3   :  { %v2619_v60 = vpop.f32.mrb[52].mxu1 }
0x21b4   :  { %v2625_v62 = vadd.f32 %v2619_v60, %v5661_v17  ;;  %v4758_v63 = vpop.f32.mrb[53].mxu1  ;;  %v2635_v17 = vpop.permute.xlu1 %2634 }
0x21b5   :  { %v2622_v1 = vpop.f32.mrb[54].mxu1 }
0x21b6   :  { %5129 = vtanh.f32 %v2625_v62  ;;  %v4759_v2 = vpop.f32.mrb[55].mxu1  ;;  %v4284_v10 = vmul.f32 -1.442695, %v2625_v62 }
0x21b8   :  { %5131 = vpow2.f32 %v4284_v10 }
0x21c0   :  { %v5130_v4 = vpop.eup %5129 }
0x21c1   :  { %2639 = vrot.lane.b32.xlu0 %v5130_v4, %s5287_s1 }
0x21c2   :  { %v5132_v11 = vpop.eup %5131 }
0x21c3   :  { %v2629_v19 = vadd.f32 1.0, %v5132_v11 }
0x21c5   :  { %5133 = vrcp.f32 %v2629_v19 }
0x21cf   :  { %v5134_v21 = vpop.eup %5133 }
0x21d0   :  { %v2637_v25 = vmul.f32 %v5134_v21, %v2635_v17 }
0x2233   :  { %v2640_v23 = vpop.permute.xlu0 %2639 }
0x2234   :  { %v2642_v57 = vmul.f32 %v5134_v21, %v2640_v23 }
0x2236   :  { %2644 = vrot.lane.b32.xlu0 %v2642_v57, %s5286_s24 }
0x223a   :  { %2508 = vrot.lane.b32.xlu0 %v2501_v33, %s5286_s24 }
0x22a8   :  { %v2645_v26 = vpop.permute.xlu0 %2644 }
0x22a9   :  { %v2647_v29 = vadd.f32 %v2645_v26, %v2637_v25 }
0x22ab   :  { %5135 = vtanh.f32 %v2647_v29 }
0x22ac   :  { %v2509_v44 = vpop.permute.xlu0 %2508 }
0x22ad   :  { %2511 = vst.msk [vmem:[#allocation4 + $0x8] sm:$0xff] %vm341_vm6, %v2509_v44 }
0x22b4   :  { %v2664_v35 = vld [vmem:[#allocation4 + $0x8] sm:$0xff] }
0x22b5   :  { %v5136_v36 = vpop.eup %5135  ;;  %2668 = vrot.lane.b32.xlu0 %v2664_v35, %s5286_s24 }
0x22b6   :  { %2650 = vrot.lane.b32.xlu1 %v5136_v36, %s5287_s1 }
0x2327   :  { %v2669_v41 = vpop.permute.xlu0 %2668 }
0x2328   :  { %v2651_v39 = vpop.permute.xlu1 %2650 }
0x2329   :  { %v2653_v40 = vmul.f32 %v5134_v21, %v2651_v39 }
0x232b   :  { %2660 = vrot.lane.b32.xlu1 %v2653_v40, %s5286_s24 }
0x232f   :  { %2503 = vrot.lane.b32.xlu1 %v6092_v38, %s5288_s2 }
0x239d   :  { %v2661_v61 = vpop.permute.xlu1 %2660 }
0x239e   :  { %2663 = vst.msk [vmem:[#allocation4] sm:$0xff] %vm341_vm6, %v2661_v61 }
0x23a1   :  { %v2504_v31 = vpop.permute.xlu1 %2503 }
0x23a2   :  { %2506 = vst.msk [vmem:[#allocation5 + $0x8] sm:$0xff] %vm341_vm6, %v2504_v31 }
0x23a5   :  { %v2666_v27 = vld [vmem:[#allocation4] sm:$0xff] }
0x23a6   :  { %v2671_v32 = vsel %vm341_vm6, %v2666_v27, %v2669_v41  ;;  %v2805_v2 = vpack.c.bf16 %v2666_v27, %v2666_v27 }
0x23a7   :  { %v2672_v5 = vpack.c.bf16 %v2671_v32, %v2671_v32 }
0x23a9   :  { %4769 = vmatmul.mubr.msk.bf16.vlgmr.msra.gmra.mrb[56].mxu0 %vm960_vm4, %v2672_v5  ;;  %v2665_v28 = vld [vmem:[#allocation5 + $0x8] sm:$0xff] }
0x23aa   :  { %2724 = vrot.lane.b32.xlu1 %v2665_v28, %s5286_s24  ;;  %4789 = vmatpush3.bf16.msra.mxu0 %v6037_v0 }
0x23ab   :  { %4790 = vmatprep.subr.bf16.mxu0 %v5284_v45  ;;  %4796 = vmatprep.mubr.msk.bf16.mxu0 %vm5285_vm1, %v5284_v45 }
0x23ae   :  { %4791 = vmatpush3.bf16.msra.mxu0 %v6044_v14 }
0x23af   :  { %4792 = vmatprep.subr.bf16.mxu0 %v5284_v45 }
0x23b2   :  { %4793 = vmatpush3.bf16.msra.mxu0 %v6052_v16 }
0x23b3   :  { %4794 = vmatprep.subr.bf16.mxu0 %v5284_v45 }
0x23b6   :  { %4795 = vmatpush3.bf16.msra.mxu0 %v6060_v47 }
0x23b7   :  { %4816 = vmatprep.subr.bf16.mxu0 %v5284_v45 }
0x241c   :  { %v2725_v50 = vpop.permute.xlu1 %2724 }
0x247c   :  { %v2710_v7 = vpop.f32.mrb[56].mxu0 }
0x247d   :  { %v2711_v34 = vadd.f32 %v6087_v30, %v2710_v7  ;;  %v4770_v13 = vpop.f32.mrb[57].mxu0 }
0x247e   :  { %v2713_v37 = vpop.f32.mrb[58].mxu0 }
0x247f   :  { %5137 = vtanh.f32 %v2711_v34  ;;  %v4771_v3 = vpop.f32.mrb[59].mxu0  ;;  %v4286_v42 = vmul.f32 -1.442695, %v2711_v34 }
0x2481   :  { %5139 = vpow2.f32 %v4286_v42 }
0x2489   :  { %v5138_v38 = vpop.eup %5137 }
0x248a   :  { %2729 = vrot.lane.b32.xlu0 %v5138_v38, %s5287_s1 }
0x248b   :  { %v5140_v46 = vpop.eup %5139 }
0x248c   :  { %v2719_v33 = vadd.f32 1.0, %v5140_v46 }
0x248e   :  { %5141 = vrcp.f32 %v2719_v33 }
0x2498   :  { %v5142_v48 = vpop.eup %5141 }
0x2499   :  { %v2727_v51 = vmul.f32 %v5142_v48, %v2725_v50 }
0x24fc   :  { %v2730_v54 = vpop.permute.xlu0 %2729 }
0x24fd   :  { %v2732_v49 = vmul.f32 %v5142_v48, %v2730_v54 }
0x24ff   :  { %2734 = vrot.lane.b32.xlu0 %v2732_v49, %s5286_s24 }
0x2571   :  { %v2735_v53 = vpop.permute.xlu0 %2734 }
0x2572   :  { %v6165_v55 = vadd.f32 %v2735_v53, %v2727_v51 }
0x2574   :  { %5143 = vtanh.f32 %v6165_v55 }
0x257e   :  { %v5144_v56 = vpop.eup %5143 }
0x257f   :  { %2740 = vrot.lane.b32.xlu1 %v5144_v56, %s5287_s1 }
0x2583   :  { %2655 = vrot.lane.b32.xlu1 %v2647_v29, %s5288_s2 }
0x25f1   :  { %v2741_v58 = vpop.permute.xlu1 %2740 }
0x25f2   :  { %v2743_v59 = vmul.f32 %v5142_v48, %v2741_v58 }
0x25f4   :  { %v2754_v60 = vpack.c.bf16 %v2743_v59, %v2743_v59 }
0x25f5   :  { %v2656_v62 = vpop.permute.xlu1 %2655 }
0x25f6   :  { %2658 = vst.msk [vmem:[#allocation5] sm:$0xff] %vm341_vm6, %v2656_v62  ;;  %2756 = vrot.lane.b32.xlu0 %v2754_v60, %s5286_s24 }
0x25fd   :  { %v2803_v63 = vld [vmem:[#allocation5] sm:$0xff] }
0x25fe   :  { %2858 = vrot.lane.b32.xlu1 %v2803_v63, %s5286_s24 }
0x2668   :  { %v2757_v1 = vpop.permute.xlu0 %2756 }
0x2669   :  { %4777 = vmatmul.mubr.msk.bf16.vlgmr.msra.gmra.mrb[56].mxu1 %vm341_vm6, %v2757_v1 }
0x266a   :  { %4781 = vmatpush3.bf16.msra.mxu1 %v5990_v6  ;;  %4784 = vmatprep.mubr.msk.bf16.mxu1 %vm5285_vm1, %v5284_v45 }
0x266b   :  { %4782 = vmatprep.subr.bf16.mxu1 %v5284_v45 }
0x266e   :  { %4783 = vmatpush3.bf16.msra.mxu1 %v5997_v8 }
0x266f   :  { %4800 = vmatprep.subr.bf16.mxu1 %v5284_v45 }
0x2671   :  { %4785 = vmatmul.mubr.msk.bf16.vlgmr.msra.gmra.mrb[60].mxu1 %vm341_vm6, %v2805_v2 }
0x2672   :  { %4801 = vmatpush3.bf16.msra.mxu1 %v6098_v9  ;;  %4804 = vmatprep.mubr.msk.bf16.mxu1 %vm5285_vm1, %v5284_v45 }
0x2673   :  { %4802 = vmatprep.subr.bf16.mxu1 %v5284_v45 }
0x2676   :  { %4803 = vmatpush3.bf16.msra.mxu1 %v6105_v43 }
0x2677   :  { %4808 = vmatprep.subr.bf16.mxu1 %v5284_v45 }
0x273c   :  { %v2795_v4 = vpop.f32.mrb[56].mxu1 }
0x273d   :  { %v2796_v10 = vadd.f32 %v6134_v52, %v2795_v4  ;;  %v4778_v11 = vpop.f32.mrb[57].mxu1 }
0x273e   :  { %v2798_v19 = vpop.f32.mrb[58].mxu1 }
0x273f   :  { %2801 = vst [vmem:[#allocation6 + $0x8] sm:$0xff] %v2796_v10  ;;  %v4779_v21 = vpop.f32.mrb[59].mxu1 }
0x2744   :  { %v2843_v23 = vpop.f32.mrb[60].mxu1 }
0x2745   :  { %v2849_v57 = vadd.f32 %v2843_v23, %v5655_v12  ;;  %v4786_v17 = vpop.f32.mrb[61].mxu1  ;;  %v2859_v12 = vpop.permute.xlu1 %2858 }
0x2746   :  { %v2846_v25 = vpop.f32.mrb[62].mxu1 }
0x2747   :  { %5145 = vtanh.f32 %v2849_v57  ;;  %v4787_v26 = vpop.f32.mrb[63].mxu1  ;;  %v4289_v44 = vmul.f32 -1.442695, %v2849_v57 }
0x2749   :  { %5147 = vpow2.f32 %v4289_v44 }
0x2751   :  { %v5146_v29 = vpop.eup %5145 }
0x2752   :  { %2863 = vrot.lane.b32.xlu0 %v5146_v29, %s5287_s1 }
0x2753   :  { %v5148_v35 = vpop.eup %5147 }
0x2754   :  { %v2853_v36 = vadd.f32 1.0, %v5148_v35 }
0x2756   :  { %5149 = vrcp.f32 %v2853_v36 }
0x2760   :  { %v5150_v39 = vpop.eup %5149 }
0x2761   :  { %v2861_v31 = vmul.f32 %v5150_v39, %v2859_v12 }
0x27c4   :  { %v2864_v40 = vpop.permute.xlu0 %2863 }
0x27c5   :  { %v2866_v61 = vmul.f32 %v5150_v39, %v2864_v40 }
0x27c7   :  { %2868 = vrot.lane.b32.xlu0 %v2866_v61, %s5286_s24 }
0x27cb   :  { %2750 = vrot.lane.b32.xlu0 %v2743_v59, %s5286_s24 }
0x2839   :  { %v2869_v41 = vpop.permute.xlu0 %2868 }
0x283a   :  { %v2871_v27 = vadd.f32 %v2869_v41, %v2861_v31 }
0x283c   :  { %5151 = vtanh.f32 %v2871_v27 }
0x283d   :  { %v2751_v32 = vpop.permute.xlu0 %2750 }
0x283e   :  { %2753 = vst.msk [vmem:[#allocation4 + $0x8] sm:$0xff] %vm341_vm6, %v2751_v32 }
0x2845   :  { %v2888_v5 = vld [vmem:[#allocation4 + $0x8] sm:$0xff] }
0x2846   :  { %v5152_v28 = vpop.eup %5151  ;;  %2892 = vrot.lane.b32.xlu0 %v2888_v5, %s5286_s24 }
0x2847   :  { %2874 = vrot.lane.b32.xlu1 %v5152_v28, %s5287_s1 }
0x28b8   :  { %v2893_v3 = vpop.permute.xlu0 %2892 }
0x28b9   :  { %v2875_v7 = vpop.permute.xlu1 %2874 }
0x28ba   :  { %v2877_v34 = vmul.f32 %v5150_v39, %v2875_v7 }
0x28bc   :  { %2884 = vrot.lane.b32.xlu1 %v2877_v34, %s5286_s24 }
0x28c0   :  { %2745 = vrot.lane.b32.xlu1 %v6165_v55, %s5288_s2 }
0x292e   :  { %v2885_v13 = vpop.permute.xlu1 %2884 }
0x292f   :  { %2887 = vst.msk [vmem:[#allocation4] sm:$0xff] %vm341_vm6, %v2885_v13 }
0x2932   :  { %v2746_v37 = vpop.permute.xlu1 %2745 }
0x2933   :  { %2748 = vst.msk [vmem:[#allocation5 + $0x8] sm:$0xff] %vm341_vm6, %v2746_v37 }
0x2936   :  { %v2890_v38 = vld [vmem:[#allocation4] sm:$0xff] }
0x2937   :  { %v2895_v42 = vsel %vm341_vm6, %v2890_v38, %v2893_v3  ;;  %v3029_v25 = vpack.c.bf16 %v2890_v38, %v2890_v38 }
0x2938   :  { %v2896_v46 = vpack.c.bf16 %v2895_v42, %v2895_v42 }
0x293a   :  { %4797 = vmatmul.mubr.msk.bf16.vlgmr.msra.gmra.mrb[60].mxu0 %vm960_vm4, %v2896_v46  ;;  %v2889_v33 = vld [vmem:[#allocation5 + $0x8] sm:$0xff] }
0x293b   :  { %2948 = vrot.lane.b32.xlu1 %v2889_v33, %s5286_s24  ;;  %4817 = vmatpush3.bf16.msra.mxu0 %v6037_v0 }
0x293c   :  { %4818 = vmatprep.subr.bf16.mxu0 %v5284_v45  ;;  %4824 = vmatprep.mubr.msk.bf16.mxu0 %vm5285_vm1, %v5284_v45 }
0x293f   :  { %4819 = vmatpush3.bf16.msra.mxu0 %v6044_v14 }
0x2940   :  { %4820 = vmatprep.subr.bf16.mxu0 %v5284_v45 }
0x2943   :  { %4821 = vmatpush3.bf16.msra.mxu0 %v6052_v16 }
0x2944   :  { %4822 = vmatprep.subr.bf16.mxu0 %v5284_v45 }
0x2947   :  { %4823 = vmatpush3.bf16.msra.mxu0 %v6060_v47 }
0x2948   :  { %4844 = vmatprep.subr.bf16.mxu0 %v5284_v45 }
0x29ad   :  { %v2949_v63 = vpop.permute.xlu1 %2948 }
0x2a0d   :  { %v2934_v48 = vpop.f32.mrb[60].mxu0 }
0x2a0e   :  { %v2935_v54 = vadd.f32 %v6087_v30, %v2934_v48  ;;  %v4798_v49 = vpop.f32.mrb[61].mxu0 }
0x2a0f   :  { %v2937_v50 = vpop.f32.mrb[62].mxu0 }
0x2a10   :  { %5153 = vtanh.f32 %v2935_v54  ;;  %v4799_v51 = vpop.f32.mrb[63].mxu0  ;;  %v4291_v55 = vmul.f32 -1.442695, %v2935_v54 }
0x2a12   :  { %5155 = vpow2.f32 %v4291_v55 }
0x2a1a   :  { %v5154_v53 = vpop.eup %5153 }
0x2a1b   :  { %2953 = vrot.lane.b32.xlu0 %v5154_v53, %s5287_s1 }
0x2a1c   :  { %v5156_v56 = vpop.eup %5155 }
0x2a1d   :  { %v2943_v58 = vadd.f32 1.0, %v5156_v56 }
0x2a1f   :  { %5157 = vrcp.f32 %v2943_v58 }
0x2a29   :  { %v5158_v59 = vpop.eup %5157 }
0x2a2a   :  { %v2951_v1 = vmul.f32 %v5158_v59, %v2949_v63 }
0x2a8d   :  { %v2954_v60 = vpop.permute.xlu0 %2953 }
0x2a8e   :  { %v2956_v62 = vmul.f32 %v5158_v59, %v2954_v60 }
0x2a90   :  { %2958 = vrot.lane.b32.xlu0 %v2956_v62, %s5286_s24 }
0x2b02   :  { %v2959_v2 = vpop.permute.xlu0 %2958 }
0x2b03   :  { %v6216_v4 = vadd.f32 %v2959_v2, %v2951_v1 }
0x2b05   :  { %5159 = vtanh.f32 %v6216_v4 }
0x2b0f   :  { %v5160_v10 = vpop.eup %5159 }
0x2b10   :  { %2964 = vrot.lane.b32.xlu1 %v5160_v10, %s5287_s1 }
0x2b14   :  { %2879 = vrot.lane.b32.xlu1 %v2871_v27, %s5288_s2 }
0x2b82   :  { %v2965_v11 = vpop.permute.xlu1 %2964 }
0x2b83   :  { %v2967_v19 = vmul.f32 %v5158_v59, %v2965_v11 }
0x2b85   :  { %v2978_v21 = vpack.c.bf16 %v2967_v19, %v2967_v19 }
0x2b86   :  { %v2880_v23 = vpop.permute.xlu1 %2879 }
0x2b87   :  { %2882 = vst.msk [vmem:[#allocation5] sm:$0xff] %vm341_vm6, %v2880_v23  ;;  %2980 = vrot.lane.b32.xlu0 %v2978_v21, %s5286_s24 }
0x2b8e   :  { %v3027_v57 = vld [vmem:[#allocation5] sm:$0xff] }
0x2b8f   :  { %3082 = vrot.lane.b32.xlu1 %v3027_v57, %s5286_s24 }
0x2bf9   :  { %v2981_v17 = vpop.permute.xlu0 %2980 }
0x2bfa   :  { %4805 = vmatmul.mubr.msk.bf16.vlgmr.msra.gmra.mrb[64].mxu1 %vm341_vm6, %v2981_v17 }
0x2bfb   :  { %4809 = vmatpush3.bf16.msra.mxu1 %v5990_v6  ;;  %4812 = vmatprep.mubr.msk.bf16.mxu1 %vm5285_vm1, %v5284_v45 }
0x2bfc   :  { %4810 = vmatprep.subr.bf16.mxu1 %v5284_v45 }
0x2bff   :  { %4811 = vmatpush3.bf16.msra.mxu1 %v5997_v8 }
0x2c00   :  { %4828 = vmatprep.subr.bf16.mxu1 %v5284_v45 }
0x2c02   :  { %4813 = vmatmul.mubr.msk.bf16.vlgmr.msra.gmra.mrb[68].mxu1 %vm341_vm6, %v3029_v25 }
0x2c03   :  { %4829 = vmatpush3.bf16.msra.mxu1 %v6098_v9  ;;  %4832 = vmatprep.mubr.msk.bf16.mxu1 %vm5285_vm1, %v5284_v45 }
0x2c04   :  { %4830 = vmatprep.subr.bf16.mxu1 %v5284_v45 }
0x2c07   :  { %4831 = vmatpush3.bf16.msra.mxu1 %v6105_v43 }
0x2c08   :  { %4836 = vmatprep.subr.bf16.mxu1 %v5284_v45 }
0x2ccd   :  { %v3019_v26 = vpop.f32.mrb[64].mxu1 }
0x2cce   :  { %v3020_v29 = vadd.f32 %v6134_v52, %v3019_v26  ;;  %v4806_v44 = vpop.f32.mrb[65].mxu1 }
0x2ccf   :  { %v3022_v35 = vpop.f32.mrb[66].mxu1 }
0x2cd0   :  { %3025 = vst [vmem:[#allocation6 + $0x10] sm:$0xff] %v3020_v29  ;;  %v4807_v36 = vpop.f32.mrb[67].mxu1 }
0x2cd5   :  { %v3067_v39 = vpop.f32.mrb[68].mxu1 }
0x2cd6   :  { %v3073_v40 = vadd.f32 %v3067_v39, %v5659_v15  ;;  %v4814_v61 = vpop.f32.mrb[69].mxu1  ;;  %v3083_v15 = vpop.permute.xlu1 %3082 }
0x2cd7   :  { %v3070_v12 = vpop.f32.mrb[70].mxu1 }
0x2cd8   :  { %5161 = vtanh.f32 %v3073_v40  ;;  %v4815_v31 = vpop.f32.mrb[71].mxu1  ;;  %v4294_v27 = vmul.f32 -1.442695, %v3073_v40 }
0x2cda   :  { %5163 = vpow2.f32 %v4294_v27 }
0x2ce2   :  { %v5162_v41 = vpop.eup %5161 }
0x2ce3   :  { %3087 = vrot.lane.b32.xlu0 %v5162_v41, %s5287_s1 }
0x2ce4   :  { %v5164_v32 = vpop.eup %5163 }
0x2ce5   :  { %v3077_v5 = vadd.f32 1.0, %v5164_v32 }
0x2ce7   :  { %5165 = vrcp.f32 %v3077_v5 }
0x2cf1   :  { %v5166_v28 = vpop.eup %5165 }
0x2cf2   :  { %v3085_v13 = vmul.f32 %v5166_v28, %v3083_v15 }
0x2d55   :  { %v3088_v7 = vpop.permute.xlu0 %3087 }
0x2d56   :  { %v3090_v34 = vmul.f32 %v5166_v28, %v3088_v7 }
0x2d58   :  { %3092 = vrot.lane.b32.xlu0 %v3090_v34, %s5286_s24 }
0x2d5c   :  { %2974 = vrot.lane.b32.xlu0 %v2967_v19, %s5286_s24 }
0x2dca   :  { %v3093_v37 = vpop.permute.xlu0 %3092 }
0x2dcb   :  { %v3095_v3 = vadd.f32 %v3093_v37, %v3085_v13 }
0x2dcd   :  { %5167 = vtanh.f32 %v3095_v3 }
0x2dce   :  { %v2975_v38 = vpop.permute.xlu0 %2974 }
0x2dcf   :  { %2977 = vst.msk [vmem:[#allocation4 + $0x8] sm:$0xff] %vm341_vm6, %v2975_v38 }
0x2dd6   :  { %v3112_v42 = vld [vmem:[#allocation4 + $0x8] sm:$0xff] }
0x2dd7   :  { %v5168_v46 = vpop.eup %5167  ;;  %3116 = vrot.lane.b32.xlu0 %v3112_v42, %s5286_s24 }
0x2dd8   :  { %3098 = vrot.lane.b32.xlu1 %v5168_v46, %s5287_s1 }
0x2e49   :  { %v3117_v50 = vpop.permute.xlu0 %3116 }
0x2e4a   :  { %v3099_v33 = vpop.permute.xlu1 %3098 }
0x2e4b   :  { %v3101_v48 = vmul.f32 %v5166_v28, %v3099_v33 }
0x2e4d   :  { %3108 = vrot.lane.b32.xlu1 %v3101_v48, %s5286_s24 }
0x2e51   :  { %2969 = vrot.lane.b32.xlu1 %v6216_v4, %s5288_s2 }
0x2ebf   :  { %v3109_v54 = vpop.permute.xlu1 %3108 }
0x2ec0   :  { %3111 = vst.msk [vmem:[#allocation4] sm:$0xff] %vm341_vm6, %v3109_v54 }
0x2ec3   :  { %v2970_v49 = vpop.permute.xlu1 %2969 }
0x2ec4   :  { %2972 = vst.msk [vmem:[#allocation5 + $0x8] sm:$0xff] %vm341_vm6, %v2970_v49 }
0x2ec7   :  { %v3114_v51 = vld [vmem:[#allocation4] sm:$0xff] }
0x2ec8   :  { %v3119_v53 = vsel %vm341_vm6, %v3114_v51, %v3117_v50  ;;  %v3253_v61 = vpack.c.bf16 %v3114_v51, %v3114_v51 }
0x2ec9   :  { %v3120_v55 = vpack.c.bf16 %v3119_v53, %v3119_v53 }
0x2ecb   :  { %4825 = vmatmul.mubr.msk.bf16.vlgmr.msra.gmra.mrb[64].mxu0 %vm960_vm4, %v3120_v55  ;;  %v3113_v56 = vld [vmem:[#allocation5 + $0x8] sm:$0xff] }
0x2ecc   :  { %3172 = vrot.lane.b32.xlu1 %v3113_v56, %s5286_s24  ;;  %4845 = vmatpush3.bf16.msra.mxu0 %v6037_v0 }
0x2ecd   :  { %4846 = vmatprep.subr.bf16.mxu0 %v5284_v45  ;;  %4852 = vmatprep.mubr.msk.bf16.mxu0 %vm5285_vm1, %v5284_v45 }
0x2ed0   :  { %4847 = vmatpush3.bf16.msra.mxu0 %v6044_v14 }
0x2ed1   :  { %4848 = vmatprep.subr.bf16.mxu0 %v5284_v45 }
0x2ed4   :  { %4849 = vmatpush3.bf16.msra.mxu0 %v6052_v16 }
0x2ed5   :  { %4850 = vmatprep.subr.bf16.mxu0 %v5284_v45 }
0x2ed8   :  { %4851 = vmatpush3.bf16.msra.mxu0 %v6060_v47 }
0x2ed9   :  { %4872 = vmatprep.subr.bf16.mxu0 %v5284_v45 }
0x2f3e   :  { %v3173_v23 = vpop.permute.xlu1 %3172 }
0x2f9e   :  { %v3158_v58 = vpop.f32.mrb[64].mxu0 }
0x2f9f   :  { %v3159_v59 = vadd.f32 %v6087_v30, %v3158_v58  ;;  %v4826_v60 = vpop.f32.mrb[65].mxu0 }
0x2fa0   :  { %v3161_v62 = vpop.f32.mrb[66].mxu0 }
0x2fa1   :  { %5169 = vtanh.f32 %v3159_v59  ;;  %v4827_v63 = vpop.f32.mrb[67].mxu0  ;;  %v4296_v2 = vmul.f32 -1.442695, %v3159_v59 }
0x2fa3   :  { %5171 = vpow2.f32 %v4296_v2 }
0x2fab   :  { %v5170_v1 = vpop.eup %5169 }
0x2fac   :  { %3177 = vrot.lane.b32.xlu0 %v5170_v1, %s5287_s1 }
0x2fad   :  { %v5172_v4 = vpop.eup %5171 }
0x2fae   :  { %v3167_v10 = vadd.f32 1.0, %v5172_v4 }
0x2fb0   :  { %5173 = vrcp.f32 %v3167_v10 }
0x2fba   :  { %v5174_v11 = vpop.eup %5173 }
0x2fbb   :  { %v3175_v57 = vmul.f32 %v5174_v11, %v3173_v23 }
0x301e   :  { %v3178_v19 = vpop.permute.xlu0 %3177 }
0x301f   :  { %v3180_v21 = vmul.f32 %v5174_v11, %v3178_v19 }
0x3021   :  { %3182 = vrot.lane.b32.xlu0 %v3180_v21, %s5286_s24 }
0x3093   :  { %v3183_v17 = vpop.permute.xlu0 %3182 }
0x3094   :  { %v6267_v25 = vadd.f32 %v3183_v17, %v3175_v57 }
0x3096   :  { %5175 = vtanh.f32 %v6267_v25 }
0x30a0   :  { %v5176_v26 = vpop.eup %5175 }
0x30a1   :  { %3188 = vrot.lane.b32.xlu1 %v5176_v26, %s5287_s1 }
0x30a5   :  { %3103 = vrot.lane.b32.xlu1 %v3095_v3, %s5288_s2 }
0x3113   :  { %v3189_v29 = vpop.permute.xlu1 %3188 }
0x3114   :  { %v3191_v44 = vmul.f32 %v5174_v11, %v3189_v29 }
0x3116   :  { %v3202_v35 = vpack.c.bf16 %v3191_v44, %v3191_v44 }
0x3117   :  { %v3104_v36 = vpop.permute.xlu1 %3103 }
0x3118   :  { %3106 = vst.msk [vmem:[#allocation5] sm:$0xff] %vm341_vm6, %v3104_v36  ;;  %3204 = vrot.lane.b32.xlu0 %v3202_v35, %s5286_s24 }
0x311f   :  { %v3251_v39 = vld [vmem:[#allocation5] sm:$0xff] }
0x3120   :  { %3306 = vrot.lane.b32.xlu1 %v3251_v39, %s5286_s24 }
0x318a   :  { %v3205_v40 = vpop.permute.xlu0 %3204 }
0x318b   :  { %4833 = vmatmul.mubr.msk.bf16.vlgmr.msra.gmra.mrb[72].mxu1 %vm341_vm6, %v3205_v40 }
0x318c   :  { %4837 = vmatpush3.bf16.msra.mxu1 %v5990_v6  ;;  %4840 = vmatprep.mubr.msk.bf16.mxu1 %vm5285_vm1, %v5284_v45 }
0x318d   :  { %4838 = vmatprep.subr.bf16.mxu1 %v5284_v45 }
0x3190   :  { %4839 = vmatpush3.bf16.msra.mxu1 %v5997_v8 }
0x3191   :  { %4856 = vmatprep.subr.bf16.mxu1 %v5284_v45 }
0x3193   :  { %4841 = vmatmul.mubr.msk.bf16.vlgmr.msra.gmra.mrb[76].mxu1 %vm341_vm6, %v3253_v61  ;;  %v6330_v61 = vld [vmem:[%s6539_s8 + $0x10] sm:$0xff]  }
0x3194   :  { %4857 = vmatpush3.bf16.msra.mxu1 %v6098_v9  ;;  %4860 = vmatprep.mubr.msk.bf16.mxu1 %vm5285_vm1, %v5284_v45 }
0x3195   :  { %4858 = vmatprep.subr.bf16.mxu1 %v5284_v45 }
0x3198   :  { %4859 = vmatpush3.bf16.msra.mxu1 %v6105_v43 }
0x3199   :  { %4864 = vmatprep.subr.bf16.mxu1 %v5284_v45 }
0x325e   :  { %v3243_v6 = vpop.f32.mrb[72].mxu1 }
0x325f   :  { %v3244_v12 = vadd.f32 %v6134_v52, %v3243_v6  ;;  %v4834_v8 = vpop.f32.mrb[73].mxu1  ;;  %v6339_v6 = vld [vmem:[%s6539_s8 + $0x18] sm:$0xff]  }
0x3260   :  { %v3246_v31 = vpop.f32.mrb[74].mxu1 }
0x3261   :  { %3249 = vst [vmem:[#allocation6 + $0x18] sm:$0xff] %v3244_v12  ;;  %v4835_v41 = vpop.f32.mrb[75].mxu1 }
0x3266   :  { %v3291_v27 = vpop.f32.mrb[76].mxu1 }
0x3267   :  { %v3297_v32 = vadd.f32 %v3291_v27, %v5665_v20  ;;  %v4842_v5 = vpop.f32.mrb[77].mxu1  ;;  %v3307_v20 = vpop.permute.xlu1 %3306 }
0x3268   :  { %v3294_v28 = vpop.f32.mrb[78].mxu1 }
0x3269   :  { %5177 = vtanh.f32 %v3297_v32  ;;  %v4843_v7 = vpop.f32.mrb[79].mxu1  ;;  %v4299_v15 = vmul.f32 -1.442695, %v3297_v32 }
0x326b   :  { %5179 = vpow2.f32 %v4299_v15 }
0x3273   :  { %v5178_v34 = vpop.eup %5177 }
0x3274   :  { %3311 = vrot.lane.b32.xlu0 %v5178_v34, %s5287_s1 }
0x3275   :  { %v5180_v13 = vpop.eup %5179 }
0x3276   :  { %v3301_v37 = vadd.f32 1.0, %v5180_v13 }
0x3278   :  { %5181 = vrcp.f32 %v3301_v37 }
0x3282   :  { %v5182_v3 = vpop.eup %5181 }
0x3283   :  { %v3309_v46 = vmul.f32 %v5182_v3, %v3307_v20 }
0x32e6   :  { %v3312_v38 = vpop.permute.xlu0 %3311 }
0x32e7   :  { %v3314_v42 = vmul.f32 %v5182_v3, %v3312_v38 }
0x32e9   :  { %3316 = vrot.lane.b32.xlu0 %v3314_v42, %s5286_s24 }
0x32ed   :  { %3198 = vrot.lane.b32.xlu0 %v3191_v44, %s5286_s24 }
0x335b   :  { %v3317_v33 = vpop.permute.xlu0 %3316 }
0x335c   :  { %v3319_v48 = vadd.f32 %v3317_v33, %v3309_v46 }
0x335e   :  { %5183 = vtanh.f32 %v3319_v48 }
0x335f   :  { %v3199_v54 = vpop.permute.xlu0 %3198 }
0x3360   :  { %3201 = vst.msk [vmem:[#allocation4 + $0x8] sm:$0xff] %vm341_vm6, %v3199_v54 }
0x3367   :  { %v3336_v49 = vld [vmem:[#allocation4 + $0x8] sm:$0xff] }
0x3368   :  { %v5184_v50 = vpop.eup %5183  ;;  %3340 = vrot.lane.b32.xlu0 %v3336_v49, %s5286_s24 }
0x3369   :  { %3322 = vrot.lane.b32.xlu1 %v5184_v50, %s5287_s1 }
0x33da   :  { %v3341_v58 = vpop.permute.xlu0 %3340 }
0x33db   :  { %v3323_v51 = vpop.permute.xlu1 %3322 }
0x33dc   :  { %v3325_v53 = vmul.f32 %v5182_v3, %v3323_v51 }
0x33de   :  { %3332 = vrot.lane.b32.xlu1 %v3325_v53, %s5286_s24 }
0x33e2   :  { %3193 = vrot.lane.b32.xlu1 %v6267_v25, %s5288_s2 }
0x3450   :  { %v3333_v55 = vpop.permute.xlu1 %3332 }
0x3451   :  { %3335 = vst.msk [vmem:[#allocation4] sm:$0xff] %vm341_vm6, %v3333_v55 }
0x3454   :  { %v3194_v56 = vpop.permute.xlu1 %3193 }
0x3455   :  { %3196 = vst.msk [vmem:[#allocation5 + $0x8] sm:$0xff] %vm341_vm6, %v3194_v56 }
0x3458   :  { %v3338_v59 = vld [vmem:[#allocation4] sm:$0xff] }
0x3459   :  { %v3343_v60 = vsel %vm341_vm6, %v3338_v59, %v3341_v58  ;;  %v3477_v12 = vpack.c.bf16 %v3338_v59, %v3338_v59 }
0x345a   :  { %v3344_v62 = vpack.c.bf16 %v3343_v60, %v3343_v60 }
0x345c   :  { %4853 = vmatmul.mubr.msk.bf16.vlgmr.msra.gmra.mrb[68].mxu0 %vm960_vm4, %v3344_v62  ;;  %v3337_v63 = vld [vmem:[#allocation5 + $0x8] sm:$0xff] }
0x345d   :  { %3396 = vrot.lane.b32.xlu1 %v3337_v63, %s5286_s24  ;;  %4873 = vmatpush3.bf16.msra.mxu0 %v6037_v0  ;;  %v6369_v62 = vld [vmem:[%s6539_s8 + $0x20] sm:$0xff]   ;;  %v6378_v63 = vld [vmem:[%s6539_s8 + $0x28] sm:$0xff]  }
0x345e   :  { %4874 = vmatprep.subr.bf16.mxu0 %v5284_v45  ;;  %4880 = vmatprep.mubr.msk.bf16.mxu0 %vm5285_vm1, %v5284_v45 }
0x3461   :  { %4875 = vmatpush3.bf16.msra.mxu0 %v6044_v14 }
0x3462   :  { %4876 = vmatprep.subr.bf16.mxu0 %v5284_v45 }
0x3465   :  { %4877 = vmatpush3.bf16.msra.mxu0 %v6052_v16 }
0x3466   :  { %4878 = vmatprep.subr.bf16.mxu0 %v5284_v45 }
0x3469   :  { %4879 = vmatpush3.bf16.msra.mxu0 %v6060_v47 }
0x346a   :  { %4900 = vmatprep.subr.bf16.mxu0 %v5284_v45 }
0x34cf   :  { %v3397_v57 = vpop.permute.xlu1 %3396 }
0x352f   :  { %v3382_v1 = vpop.f32.mrb[68].mxu0 }
0x3530   :  { %v3383_v0 = vadd.f32 %v6087_v30, %v3382_v1  ;;  %v4854_v2 = vpop.f32.mrb[69].mxu0  ;;  %v6385_v1 = vld [vmem:[%s6539_s8 + $0x30] sm:$0xff]  }
0x3531   :  { %v3385_v4 = vpop.f32.mrb[70].mxu0 }
0x3532   :  { %5185 = vtanh.f32 %v3383_v0  ;;  %v4855_v10 = vpop.f32.mrb[71].mxu0  ;;  %v4301_v14 = vmul.f32 -1.442695, %v3383_v0  ;;  %v6392_v0 = vld [vmem:[%s6539_s8 + $0x38] sm:$0xff]   ;;  %v6399_v4 = vld [vmem:[%s6540_s9 + $0x1] ss:$0 sm:$0xff] }
0x3534   :  { %5187 = vpow2.f32 %v4301_v14 }
0x353c   :  { %v5186_v11 = vpop.eup %5185 }
0x353d   :  { %3401 = vrot.lane.b32.xlu0 %v5186_v11, %s5287_s1 }
0x353e   :  { %v5188_v19 = vpop.eup %5187 }
0x353f   :  { %v3391_v16 = vadd.f32 1.0, %v5188_v19 }
0x3541   :  { %5189 = vrcp.f32 %v3391_v16 }
0x354b   :  { %v5190_v21 = vpop.eup %5189 }
0x354c   :  { %v3399_v17 = vmul.f32 %v5190_v21, %v3397_v57 }
0x35af   :  { %v3402_v23 = vpop.permute.xlu0 %3401 }
0x35b0   :  { %v3404_v47 = vmul.f32 %v5190_v21, %v3402_v23 }
0x35b2   :  { %3406 = vrot.lane.b32.xlu0 %v3404_v47, %s5286_s24 }
0x3624   :  { %v3407_v30 = vpop.permute.xlu0 %3406 }
0x3625   :  { %v6318_v25 = vadd.f32 %v3407_v30, %v3399_v17 }
0x3627   :  { %5191 = vtanh.f32 %v6318_v25 }
0x3631   :  { %v5192_v26 = vpop.eup %5191 }
0x3632   :  { %3412 = vrot.lane.b32.xlu1 %v5192_v26, %s5287_s1 }
0x3636   :  { %3327 = vrot.lane.b32.xlu1 %v3319_v48, %s5288_s2 }
0x36a4   :  { %v3413_v29 = vpop.permute.xlu1 %3412 }
0x36a5   :  { %v3415_v44 = vmul.f32 %v5190_v21, %v3413_v29 }
0x36a7   :  { %v3426_v35 = vpack.c.bf16 %v3415_v44, %v3415_v44 }
0x36a8   :  { %v3328_v36 = vpop.permute.xlu1 %3327 }
0x36a9   :  { %3330 = vst.msk [vmem:[#allocation5] sm:$0xff] %vm341_vm6, %v3328_v36  ;;  %3428 = vrot.lane.b32.xlu0 %v3426_v35, %s5286_s24 }
0x36b0   :  { %v3475_v39 = vld [vmem:[#allocation5] sm:$0xff] }
0x36b1   :  { %3530 = vrot.lane.b32.xlu1 %v3475_v39, %s5286_s24 }
0x371b   :  { %v3429_v40 = vpop.permute.xlu0 %3428 }
0x371c   :  { %4861 = vmatmul.mubr.msk.bf16.vlgmr.msra.gmra.mrb[80].mxu1 %vm341_vm6, %v3429_v40 }
0x371d   :  { %4865 = vmatpush3.bf16.msra.mxu1 %v6330_v61  ;;  %4868 = vmatprep.mubr.msk.bf16.mxu1 %vm5285_vm1, %v5284_v45 }
0x371e   :  { %4866 = vmatprep.subr.bf16.mxu1 %v5284_v45 }
0x3721   :  { %4867 = vmatpush3.bf16.msra.mxu1 %v6339_v6 }
0x3722   :  { %4884 = vmatprep.subr.bf16.mxu1 %v5284_v45 }
0x3724   :  { %4869 = vmatmul.mubr.msk.bf16.vlgmr.msra.gmra.mrb[84].mxu1 %vm341_vm6, %v3477_v12 }
0x3725   :  { %4885 = vmatpush3.bf16.msra.mxu1 %v6098_v9  ;;  %4888 = vmatprep.mubr.msk.bf16.mxu1 %vm5285_vm1, %v5284_v45 }
0x3726   :  { %4886 = vmatprep.subr.bf16.mxu1 %v5284_v45 }
0x3729   :  { %4887 = vmatpush3.bf16.msra.mxu1 %v6105_v43 }
0x372a   :  { %4892 = vmatprep.subr.bf16.mxu1 %v5284_v45 }
0x37ef   :  { %v3467_v8 = vpop.f32.mrb[80].mxu1 }
0x37f0   :  { %v3468_v31 = vadd.f32 %v6134_v52, %v3467_v8  ;;  %v4862_v41 = vpop.f32.mrb[81].mxu1 }
0x37f1   :  { %v3470_v27 = vpop.f32.mrb[82].mxu1 }
0x37f2   :  { %3473 = vst [vmem:[#allocation6 + $0x20] sm:$0xff] %v3468_v31  ;;  %v4863_v32 = vpop.f32.mrb[83].mxu1  ;;  %v6423_v27 = vld [vmem:[%s6541_s10] sm:$0xff]  }
0x37f3   :  { %v6432_v32 = vld [vmem:[%s6541_s10 + $0x8] sm:$0xff]   ;;  %s5289_s10 = smov [#allocation6]  }
0x37f7   :  { %v3515_v5 = vpop.f32.mrb[84].mxu1 }
0x37f8   :  { %v3521_v28 = vadd.f32 %v3515_v5, %v5669_v24  ;;  %v4870_v9 = vpop.f32.mrb[85].mxu1  ;;  %v3531_v24 = vpop.permute.xlu1 %3530 }
0x37f9   :  { %v3518_v7 = vpop.f32.mrb[86].mxu1 }
0x37fa   :  { %5193 = vtanh.f32 %v3521_v28  ;;  %v4871_v34 = vpop.f32.mrb[87].mxu1  ;;  %v4304_v43 = vmul.f32 -1.442695, %v3521_v28  ;;  %v6439_v28 = vld [vmem:[%s6542_s11] ss:$0 sm:$0xff]  ;;  %s4151_s11 = sshll.u32 %s5289_s10, 4  ;;  %s4152_s11 = int_to_ptr.vmem [resolvable:$true] %s4151_s11 }
0x37fb   :  { %p5264_p1 = scmp.lt.s32.totalorder %s4152_s11, %s4152_s11 }
0x37fc   :  { %5195 = vpow2.f32 %v4304_v43 }
0x3804   :  { %v5194_v15 = vpop.eup %5193 }
0x3805   :  { %3535 = vrot.lane.b32.xlu0 %v5194_v15, %s5287_s1 }
0x3806   :  { %v5196_v13 = vpop.eup %5195 }
0x3807   :  { %v3525_v37 = vadd.f32 1.0, %v5196_v13 }
0x3809   :  { %5197 = vrcp.f32 %v3525_v37 }
0x3813   :  { %v5198_v52 = vpop.eup %5197 }
0x3814   :  { %v3533_v42 = vmul.f32 %v5198_v52, %v3531_v24 }
0x3877   :  { %v3536_v3 = vpop.permute.xlu0 %3535 }
0x3878   :  { %v3538_v38 = vmul.f32 %v5198_v52, %v3536_v3 }
0x387a   :  { %3540 = vrot.lane.b32.xlu0 %v3538_v38, %s5286_s24 }
0x387e   :  { %3422 = vrot.lane.b32.xlu0 %v3415_v44, %s5286_s24 }
0x38ec   :  { %v3541_v20 = vpop.permute.xlu0 %3540 }
0x38ed   :  { %v3543_v46 = vadd.f32 %v3541_v20, %v3533_v42 }
0x38ef   :  { %5199 = vtanh.f32 %v3543_v46 }
0x38f0   :  { %v3423_v33 = vpop.permute.xlu0 %3422 }
0x38f1   :  { %3425 = vst.msk [vmem:[#allocation4 + $0x8] sm:$0xff] %vm341_vm6, %v3423_v33 }
0x38f8   :  { %v3560_v48 = vld [vmem:[#allocation4 + $0x8] sm:$0xff] }
0x38f9   :  { %v5200_v54 = vpop.eup %5199  ;;  %3564 = vrot.lane.b32.xlu0 %v3560_v48, %s5286_s24 }
0x38fa   :  { %3546 = vrot.lane.b32.xlu1 %v5200_v54, %s5287_s1 }
0x396b   :  { %v3565_v55 = vpop.permute.xlu0 %3564 }
0x396c   :  { %v3547_v49 = vpop.permute.xlu1 %3546 }
0x396d   :  { %v3549_v50 = vmul.f32 %v5198_v52, %v3547_v49 }
0x396f   :  { %3556 = vrot.lane.b32.xlu1 %v3549_v50, %s5286_s24 }
0x3973   :  { %3417 = vrot.lane.b32.xlu1 %v6318_v25, %s5288_s2 }
0x39e1   :  { %v3557_v51 = vpop.permute.xlu1 %3556 }
0x39e2   :  { %3559 = vst.msk [vmem:[#allocation4] sm:$0xff] %vm341_vm6, %v3557_v51 }
0x39e5   :  { %v3418_v53 = vpop.permute.xlu1 %3417 }
0x39e6   :  { %3420 = vst.msk [vmem:[#allocation5 + $0x8] sm:$0xff] %vm341_vm6, %v3418_v53 }
0x39e9   :  { %v3562_v56 = vld [vmem:[#allocation4] sm:$0xff] }
0x39ea   :  { %v3567_v58 = vsel %vm341_vm6, %v3562_v56, %v3565_v55  ;;  %v3701_v41 = vpack.c.bf16 %v3562_v56, %v3562_v56 }
0x39eb   :  { %v3568_v59 = vpack.c.bf16 %v3567_v58, %v3567_v58 }
0x39ed   :  { %4881 = vmatmul.mubr.msk.bf16.vlgmr.msra.gmra.mrb[72].mxu0 %vm960_vm4, %v3568_v59  ;;  %v3561_v60 = vld [vmem:[#allocation5 + $0x8] sm:$0xff] }
0x39ee   :  { %3620 = vrot.lane.b32.xlu1 %v3561_v60, %s5286_s24  ;;  %4901 = vmatpush3.bf16.msra.mxu0 %v6369_v62 }
0x39ef   :  { %4902 = vmatprep.subr.bf16.mxu0 %v5284_v45  ;;  %4908 = vmatprep.mubr.msk.bf16.mxu0 %vm5285_vm1, %v5284_v45 }
0x39f2   :  { %4903 = vmatpush3.bf16.msra.mxu0 %v6378_v63 }
0x39f3   :  { %4904 = vmatprep.subr.bf16.mxu0 %v5284_v45 }
0x39f6   :  { %4905 = vmatpush3.bf16.msra.mxu0 %v6385_v1 }
0x39f7   :  { %4906 = vmatprep.subr.bf16.mxu0 %v5284_v45 }
0x39fa   :  { %4907 = vmatpush3.bf16.msra.mxu0 %v6392_v0 }
0x39fb   :  { %4928 = vmatprep.subr.bf16.mxu0 %v5284_v45 }
0x3a60   :  { %v3621_v25 = vpop.permute.xlu1 %3620 }
0x3ac0   :  { %v3606_v2 = vpop.f32.mrb[72].mxu0 }
0x3ac1   :  { %v3607_v10 = vadd.f32 %v6399_v4, %v3606_v2  ;;  %v4882_v11 = vpop.f32.mrb[73].mxu0 }
0x3ac2   :  { %v3609_v14 = vpop.f32.mrb[74].mxu0 }
0x3ac3   :  { %5201 = vtanh.f32 %v3607_v10  ;;  %v4883_v19 = vpop.f32.mrb[75].mxu0  ;;  %v4306_v21 = vmul.f32 -1.442695, %v3607_v10 }
0x3ac5   :  { %5203 = vpow2.f32 %v4306_v21 }
0x3acd   :  { %v5202_v16 = vpop.eup %5201 }
0x3ace   :  { %3625 = vrot.lane.b32.xlu0 %v5202_v16, %s5287_s1 }
0x3acf   :  { %v5204_v23 = vpop.eup %5203 }
0x3ad0   :  { %v3615_v47 = vadd.f32 1.0, %v5204_v23 }
0x3ad2   :  { %5205 = vrcp.f32 %v3615_v47 }
0x3adc   :  { %v5206_v57 = vpop.eup %5205 }
0x3add   :  { %v3623_v26 = vmul.f32 %v5206_v57, %v3621_v25 }
0x3b40   :  { %v3626_v17 = vpop.permute.xlu0 %3625 }
0x3b41   :  { %v3628_v30 = vmul.f32 %v5206_v57, %v3626_v17 }
0x3b43   :  { %3630 = vrot.lane.b32.xlu0 %v3628_v30, %s5286_s24 }
0x3bb5   :  { %v3631_v29 = vpop.permute.xlu0 %3630 }
0x3bb6   :  { %v6404_v44 = vadd.f32 %v3631_v29, %v3623_v26 }
0x3bb8   :  { %5207 = vtanh.f32 %v6404_v44 }
0x3bc2   :  { %v5208_v35 = vpop.eup %5207 }
0x3bc3   :  { %3636 = vrot.lane.b32.xlu1 %v5208_v35, %s5287_s1 }
0x3bc7   :  { %3551 = vrot.lane.b32.xlu1 %v3543_v46, %s5288_s2 }
0x3c35   :  { %v3637_v36 = vpop.permute.xlu1 %3636 }
0x3c36   :  { %v3639_v39 = vmul.f32 %v5206_v57, %v3637_v36 }
0x3c38   :  { %v3650_v40 = vpack.c.bf16 %v3639_v39, %v3639_v39 }
0x3c39   :  { %v3552_v12 = vpop.permute.xlu1 %3551 }
0x3c3a   :  { %3554 = vst.msk [vmem:[#allocation5] sm:$0xff] %vm341_vm6, %v3552_v12  ;;  %3652 = vrot.lane.b32.xlu0 %v3650_v40, %s5286_s24 }
0x3c41   :  { %v3699_v8 = vld [vmem:[#allocation5] sm:$0xff] }
0x3c42   :  { %3754 = vrot.lane.b32.xlu1 %v3699_v8, %s5286_s24 }
0x3cac   :  { %v3653_v31 = vpop.permute.xlu0 %3652 }
0x3cad   :  { %4889 = vmatmul.mubr.msk.bf16.vlgmr.msra.gmra.mrb[88].mxu1 %vm341_vm6, %v3653_v31 }
0x3cae   :  { %4893 = vmatpush3.bf16.msra.mxu1 %v6330_v61  ;;  %4896 = vmatprep.mubr.msk.bf16.mxu1 %vm5285_vm1, %v5284_v45 }
0x3caf   :  { %4894 = vmatprep.subr.bf16.mxu1 %v5284_v45 }
0x3cb2   :  { %4895 = vmatpush3.bf16.msra.mxu1 %v6339_v6 }
0x3cb3   :  { %4912 = vmatprep.subr.bf16.mxu1 %v5284_v45 }
0x3cb5   :  { %4897 = vmatmul.mubr.msk.bf16.vlgmr.msra.gmra.mrb[92].mxu1 %vm341_vm6, %v3701_v41 }
0x3cb6   :  { %4913 = vmatpush3.bf16.msra.mxu1 %v6423_v27  ;;  %4916 = vmatprep.mubr.msk.bf16.mxu1 %vm5285_vm1, %v5284_v45 }
0x3cb7   :  { %4914 = vmatprep.subr.bf16.mxu1 %v5284_v45 }
0x3cba   :  { %4915 = vmatpush3.bf16.msra.mxu1 %v6432_v32 }
0x3cbb   :  { %4920 = vmatprep.subr.bf16.mxu1 %v5284_v45 }
0x3d80   :  { %v3691_v5 = vpop.f32.mrb[88].mxu1 }
0x3d81   :  { %v3692_v9 = vadd.f32 %v6439_v28, %v3691_v5  ;;  %v4890_v7 = vpop.f32.mrb[89].mxu1 }
0x3d82   :  { %v3694_v34 = vpop.f32.mrb[90].mxu1 }
0x3d83   :  { %3697 = vst [vmem:[#allocation6 + $0x28] sm:$0xff] %v3692_v9  ;;  %v4891_v15 = vpop.f32.mrb[91].mxu1 }
0x3d88   :  { %v3739_v43 = vpop.f32.mrb[92].mxu1 }
0x3d89   :  { %v3745_v13 = vadd.f32 %v3739_v43, %v5663_v18  ;;  %v4898_v37 = vpop.f32.mrb[93].mxu1  ;;  %v3755_v18 = vpop.permute.xlu1 %3754 }
0x3d8a   :  { %v3742_v52 = vpop.f32.mrb[94].mxu1 }
0x3d8b   :  { %5209 = vtanh.f32 %v3745_v13  ;;  %v4899_v3 = vpop.f32.mrb[95].mxu1  ;;  %v4309_v24 = vmul.f32 -1.442695, %v3745_v13 }
0x3d8d   :  { %5211 = vpow2.f32 %v4309_v24 }
0x3d95   :  { %v5210_v38 = vpop.eup %5209 }
0x3d96   :  { %3759 = vrot.lane.b32.xlu0 %v5210_v38, %s5287_s1 }
0x3d97   :  { %v5212_v42 = vpop.eup %5211 }
0x3d98   :  { %v3749_v20 = vadd.f32 1.0, %v5212_v42 }
0x3d9a   :  { %5213 = vrcp.f32 %v3749_v20 }
0x3da4   :  { %v5214_v46 = vpop.eup %5213 }
0x3da5   :  { %v3757_v54 = vmul.f32 %v5214_v46, %v3755_v18 }
0x3e08   :  { %v3760_v33 = vpop.permute.xlu0 %3759 }
0x3e09   :  { %v3762_v48 = vmul.f32 %v5214_v46, %v3760_v33 }
0x3e0b   :  { %3764 = vrot.lane.b32.xlu0 %v3762_v48, %s5286_s24 }
0x3e0f   :  { %3646 = vrot.lane.b32.xlu0 %v3639_v39, %s5286_s24 }
0x3e7d   :  { %v3765_v49 = vpop.permute.xlu0 %3764 }
0x3e7e   :  { %v3767_v50 = vadd.f32 %v3765_v49, %v3757_v54 }
0x3e80   :  { %5215 = vtanh.f32 %v3767_v50 }
0x3e81   :  { %v3647_v51 = vpop.permute.xlu0 %3646 }
0x3e82   :  { %3649 = vst.msk [vmem:[#allocation4 + $0x8] sm:$0xff] %vm341_vm6, %v3647_v51 }
0x3e89   :  { %v3784_v53 = vld [vmem:[#allocation4 + $0x8] sm:$0xff] }
0x3e8a   :  { %v5216_v55 = vpop.eup %5215  ;;  %3788 = vrot.lane.b32.xlu0 %v3784_v53, %s5286_s24 }
0x3e8b   :  { %3770 = vrot.lane.b32.xlu1 %v5216_v55, %s5287_s1 }
0x3efc   :  { %v3789_v2 = vpop.permute.xlu0 %3788 }
0x3efd   :  { %v3771_v56 = vpop.permute.xlu1 %3770 }
0x3efe   :  { %v3773_v58 = vmul.f32 %v5214_v46, %v3771_v56 }
0x3f00   :  { %3780 = vrot.lane.b32.xlu1 %v3773_v58, %s5286_s24 }
0x3f04   :  { %3641 = vrot.lane.b32.xlu1 %v6404_v44, %s5288_s2 }
0x3f72   :  { %v3781_v59 = vpop.permute.xlu1 %3780 }
0x3f73   :  { %3783 = vst.msk [vmem:[#allocation4] sm:$0xff] %vm341_vm6, %v3781_v59 }
0x3f76   :  { %v3642_v60 = vpop.permute.xlu1 %3641 }
0x3f77   :  { %3644 = vst.msk [vmem:[#allocation5 + $0x8] sm:$0xff] %vm341_vm6, %v3642_v60 }
0x3f7a   :  { %v3786_v10 = vld [vmem:[#allocation4] sm:$0xff] }
0x3f7b   :  { %v3791_v11 = vsel %vm341_vm6, %v3786_v10, %v3789_v2  ;;  %v3925_v5 = vpack.c.bf16 %v3786_v10, %v3786_v10 }
0x3f7c   :  { %v3792_v14 = vpack.c.bf16 %v3791_v11, %v3791_v11 }
0x3f7e   :  { %4909 = vmatmul.mubr.msk.bf16.vlgmr.msra.gmra.mrb[76].mxu0 %vm960_vm4, %v3792_v14  ;;  %v3785_v19 = vld [vmem:[#allocation5 + $0x8] sm:$0xff] }
0x3f7f   :  { %3844 = vrot.lane.b32.xlu1 %v3785_v19, %s5286_s24  ;;  %4929 = vmatpush3.bf16.msra.mxu0 %v6369_v62 }
0x3f80   :  { %4930 = vmatprep.subr.bf16.mxu0 %v5284_v45  ;;  %4936 = vmatprep.mubr.msk.bf16.mxu0 %vm5285_vm1, %v5284_v45 }
0x3f83   :  { %4931 = vmatpush3.bf16.msra.mxu0 %v6378_v63 }
0x3f84   :  { %4932 = vmatprep.subr.bf16.mxu0 %v5284_v45 }
0x3f87   :  { %4933 = vmatpush3.bf16.msra.mxu0 %v6385_v1 }
0x3f88   :  { %4934 = vmatprep.subr.bf16.mxu0 %v5284_v45 }
0x3f8b   :  { %4935 = vmatpush3.bf16.msra.mxu0 %v6392_v0 }
0x3ff1   :  { %v3845_v0 = vpop.permute.xlu1 %3844 }
0x4051   :  { %v3830_v16 = vpop.f32.mrb[76].mxu0 }
0x4052   :  { %v3831_v21 = vadd.f32 %v6399_v4, %v3830_v16  ;;  %v4910_v23 = vpop.f32.mrb[77].mxu0 }
0x4053   :  { %v3833_v62 = vpop.f32.mrb[78].mxu0 }
0x4054   :  { %5217 = vtanh.f32 %v3831_v21  ;;  %v4911_v47 = vpop.f32.mrb[79].mxu0  ;;  %v4311_v17 = vmul.f32 -1.442695, %v3831_v21 }
0x4056   :  { %5219 = vpow2.f32 %v4311_v17 }
0x405e   :  { %v5218_v57 = vpop.eup %5217 }
0x405f   :  { %3849 = vrot.lane.b32.xlu0 %v5218_v57, %s5287_s1 }
0x4060   :  { %v5220_v63 = vpop.eup %5219 }
0x4061   :  { %v3839_v30 = vadd.f32 1.0, %v5220_v63 }
0x4063   :  { %5221 = vrcp.f32 %v3839_v30 }
0x406d   :  { %v5222_v1 = vpop.eup %5221 }
0x406e   :  { %v3847_v29 = vmul.f32 %v5222_v1, %v3845_v0 }
0x40d1   :  { %v3850_v25 = vpop.permute.xlu0 %3849 }
0x40d2   :  { %v3852_v26 = vmul.f32 %v5222_v1, %v3850_v25 }
0x40d4   :  { %3854 = vrot.lane.b32.xlu0 %v3852_v26, %s5286_s24 }
0x4146   :  { %v3855_v44 = vpop.permute.xlu0 %3854 }
0x4147   :  { %v6469_v35 = vadd.f32 %v3855_v44, %v3847_v29 }
0x4149   :  { %5223 = vtanh.f32 %v6469_v35 }
0x4153   :  { %v5224_v36 = vpop.eup %5223 }
0x4154   :  { %3860 = vrot.lane.b32.xlu1 %v5224_v36, %s5287_s1 }
0x4158   :  { %3775 = vrot.lane.b32.xlu1 %v3767_v50, %s5288_s2 }
0x41c6   :  { %v3861_v39 = vpop.permute.xlu1 %3860 }
0x41c7   :  { %v3863_v40 = vmul.f32 %v5222_v1, %v3861_v39 }
0x41c9   :  { %v3874_v12 = vpack.c.bf16 %v3863_v40, %v3863_v40 }
0x41ca   :  { %v3776_v8 = vpop.permute.xlu1 %3775 }
0x41cb   :  { %3778 = vst.msk [vmem:[#allocation5] sm:$0xff] %vm341_vm6, %v3776_v8  ;;  %3876 = vrot.lane.b32.xlu0 %v3874_v12, %s5286_s24 }
0x41d2   :  { %v3923_v31 = vld [vmem:[#allocation5] sm:$0xff] }
0x41d3   :  { %3978 = vrot.lane.b32.xlu1 %v3923_v31, %s5286_s24 }
0x423d   :  { %v3877_v41 = vpop.permute.xlu0 %3876 }
0x423e   :  { %4917 = vmatmul.mubr.msk.bf16.vlgmr.msra.gmra.mrb[96].mxu1 %vm341_vm6, %v3877_v41 }
0x423f   :  { %4921 = vmatpush3.bf16.msra.mxu1 %v6330_v61  ;;  %4924 = vmatprep.mubr.msk.bf16.mxu1 %vm5285_vm1, %v5284_v45 }
0x4240   :  { %4922 = vmatprep.subr.bf16.mxu1 %v5284_v45 }
0x4243   :  { %4923 = vmatpush3.bf16.msra.mxu1 %v6339_v6 }
0x4244   :  { %4940 = vmatprep.subr.bf16.mxu1 %v5284_v45 }
0x4246   :  { %4925 = vmatmul.mubr.msk.bf16.vlgmr.msra.gmra.mrb[100].mxu1 %vm341_vm6, %v3925_v5 }
0x4247   :  { %4941 = vmatpush3.bf16.msra.mxu1 %v6423_v27  ;;  %4944 = vmatprep.mubr.msk.bf16.mxu1 %vm5285_vm1, %v5284_v45 }
0x4248   :  { %4942 = vmatprep.subr.bf16.mxu1 %v5284_v45 }
0x424b   :  { %4943 = vmatpush3.bf16.msra.mxu1 %v6432_v32 }
0x4311   :  { %v3915_v61 = vpop.f32.mrb[96].mxu1 }
0x4312   :  { %v3916_v9 = vadd.f32 %v6439_v28, %v3915_v61  ;;  %v4918_v7 = vpop.f32.mrb[97].mxu1 }
0x4313   :  { %v3918_v34 = vpop.f32.mrb[98].mxu1 }
0x4314   :  { %3921 = vst [vmem:[#allocation6 + $0x30] sm:$0xff] %v3916_v9  ;;  %v4919_v6 = vpop.f32.mrb[99].mxu1 }
0x4319   :  { %v3963_v15 = vpop.f32.mrb[100].mxu1 }
0x431a   :  { %v3969_v43 = vadd.f32 %v3963_v15, %v5667_v22  ;;  %v4926_v13 = vpop.f32.mrb[101].mxu1  ;;  %v3979_v22 = vpop.permute.xlu1 %3978 }
0x431b   :  { %v3966_v37 = vpop.f32.mrb[102].mxu1 }
0x431c   :  { %5225 = vtanh.f32 %v3969_v43  ;;  %v4927_v27 = vpop.f32.mrb[103].mxu1  ;;  %v4314_v45 = vmul.f32 -1.442695, %v3969_v43 }
0x431e   :  { %5227 = vpow2.f32 %v4314_v45 }
0x4326   :  { %v5226_v52 = vpop.eup %5225 }
0x4327   :  { %3983 = vrot.lane.b32.xlu0 %v5226_v52, %s5287_s1 }
0x4328   :  { %v5228_v32 = vpop.eup %5227 }
0x4329   :  { %v3973_v3 = vadd.f32 1.0, %v5228_v32 }
0x432b   :  { %5229 = vrcp.f32 %v3973_v3 }
0x4335   :  { %v5230_v38 = vpop.eup %5229 }
0x4336   :  { %v3981_v20 = vmul.f32 %v5230_v38, %v3979_v22 }
0x4399   :  { %v3984_v24 = vpop.permute.xlu0 %3983 }
0x439a   :  { %v3986_v42 = vmul.f32 %v5230_v38, %v3984_v24 }
0x439c   :  { %3988 = vrot.lane.b32.xlu0 %v3986_v42, %s5286_s24 }
0x43a0   :  { %3870 = vrot.lane.b32.xlu0 %v3863_v40, %s5286_s24 }
0x440e   :  { %v3989_v46 = vpop.permute.xlu0 %3988 }
0x440f   :  { %v3991_v33 = vadd.f32 %v3989_v46, %v3981_v20 }
0x4411   :  { %5231 = vtanh.f32 %v3991_v33 }
0x4412   :  { %v3871_v48 = vpop.permute.xlu0 %3870 }
0x4413   :  { %3873 = vst.msk [vmem:[#allocation4 + $0x8] sm:$0xff] %vm341_vm6, %v3871_v48 }
0x441a   :  { %v4008_v18 = vld [vmem:[#allocation4 + $0x8] sm:$0xff] }
0x441b   :  { %v5232_v54 = vpop.eup %5231  ;;  %4012 = vrot.lane.b32.xlu0 %v4008_v18, %s5286_s24 }
0x441c   :  { %3994 = vrot.lane.b32.xlu1 %v5232_v54, %s5287_s1 }
0x448d   :  { %v4013_v55 = vpop.permute.xlu0 %4012 }
0x448e   :  { %v3995_v49 = vpop.permute.xlu1 %3994 }
0x448f   :  { %v3997_v50 = vmul.f32 %v5230_v38, %v3995_v49 }
0x4491   :  { %4004 = vrot.lane.b32.xlu1 %v3997_v50, %s5286_s24 }
0x4495   :  { %3865 = vrot.lane.b32.xlu1 %v6469_v35, %s5288_s2 }
0x4503   :  { %v4005_v51 = vpop.permute.xlu1 %4004 }
0x4504   :  { %4007 = vst.msk [vmem:[#allocation4] sm:$0xff] %vm341_vm6, %v4005_v51 }
0x4507   :  { %v3866_v53 = vpop.permute.xlu1 %3865 }
0x4508   :  { %3868 = vst.msk [vmem:[#allocation5 + $0x8] sm:$0xff] %vm341_vm6, %v3866_v53 }
0x450b   :  { %v4010_v56 = vld [vmem:[#allocation4] sm:$0xff] }
0x450c   :  { %v4015_v58 = vsel %vm341_vm6, %v4010_v56, %v4013_v55 }
0x450d   :  { %v4016_v59 = vpack.c.bf16 %v4015_v58, %v4015_v58 }
0x450f   :  { %4937 = vmatmul.mubr.msk.bf16.vlgmr.msra.gmra.mrb[80].mxu0 %vm960_vm4, %v4016_v59  ;;  %v4009_v60 = vld [vmem:[#allocation5 + $0x8] sm:$0xff] }
0x4510   :  { %4068 = vrot.lane.b32.xlu1 %v4009_v60, %s5286_s24 }
0x4582   :  { %v4069_v63 = vpop.permute.xlu1 %4068 }
0x45e2   :  { %v4054_v2 = vpop.f32.mrb[80].mxu0 }
0x45e3   :  { %v4055_v10 = vadd.f32 %v6399_v4, %v4054_v2  ;;  %v4938_v11 = vpop.f32.mrb[81].mxu0 }
0x45e4   :  { %v4057_v14 = vpop.f32.mrb[82].mxu0 }
0x45e5   :  { %5233 = vtanh.f32 %v4055_v10  ;;  %v4939_v19 = vpop.f32.mrb[83].mxu0  ;;  %v4316_v21 = vmul.f32 -1.442695, %v4055_v10 }
0x45e7   :  { %5235 = vpow2.f32 %v4316_v21 }
0x45ef   :  { %v5234_v16 = vpop.eup %5233 }
0x45f0   :  { %4073 = vrot.lane.b32.xlu0 %v5234_v16, %s5287_s1 }
0x45f1   :  { %v5236_v23 = vpop.eup %5235 }
0x45f2   :  { %v4063_v62 = vadd.f32 1.0, %v5236_v23 }
0x45f4   :  { %5237 = vrcp.f32 %v4063_v62 }
0x45fe   :  { %v5238_v47 = vpop.eup %5237 }
0x45ff   :  { %v4071_v30 = vmul.f32 %v5238_v47, %v4069_v63 }
0x4662   :  { %v4074_v57 = vpop.permute.xlu0 %4073 }
0x4663   :  { %v4076_v17 = vmul.f32 %v5238_v47, %v4074_v57 }
0x4665   :  { %4078 = vrot.lane.b32.xlu0 %v4076_v17, %s5286_s24 }
0x46d7   :  { %v4079_v4 = vpop.permute.xlu0 %4078 }
0x46d8   :  { %v4081_v1 = vadd.f32 %v4079_v4, %v4071_v30 }
0x46da   :  { %5239 = vtanh.f32 %v4081_v1 }
0x46e4   :  { %v5240_v25 = vpop.eup %5239 }
0x46e5   :  { %4084 = vrot.lane.b32.xlu1 %v5240_v25, %s5287_s1 }
0x46e9   :  { %3999 = vrot.lane.b32.xlu1 %v3991_v33, %s5288_s2 }
0x4757   :  { %v4085_v26 = vpop.permute.xlu1 %4084 }
0x4758   :  { %v4087_v0 = vmul.f32 %v5238_v47, %v4085_v26 }
0x475a   :  { %v4098_v29 = vpack.c.bf16 %v4087_v0, %v4087_v0  ;;  %4094 = vrot.lane.b32.xlu1 %v4087_v0, %s5286_s24 }
0x475b   :  { %v4000_v44 = vpop.permute.xlu1 %3999 }
0x475c   :  { %4002 = vst.msk [vmem:[#allocation5] sm:$0xff] %vm341_vm6, %v4000_v44  ;;  %4100 = vrot.lane.b32.xlu0 %v4098_v29, %s5286_s24  ;;  %s5259_s24 = scalar_lea.vmem %s4152_s11, 1024 }
0x475d   :  { %p5260_p0 = scmp.ne.s32.totalorder %s4152_s11, %s5259_s24  ;;  %p5265_p2 = scmp.lt.s32.totalorder %s5259_s24, %s5259_s24 }
0x475f   :  { %p5266_p3 = por %p5265_p2, %p5264_p1 }
0x4760   :  { %4089 = vrot.lane.b32.xlu0 %v4081_v1, %s5288_s2 }
0x4761   :  { %p5267_p4 = pnand %p5266_p3, %p5260_p0 }
0x47cc   :  { %v4095_v35 = vpop.permute.xlu1 %4094 }
0x47cd   :  { %4097 = vst.msk [vmem:[#allocation4 + $0x8] sm:$0xff] %vm341_vm6, %v4095_v35 }
0x47ce   :  { %v4101_v36 = vpop.permute.xlu0 %4100 }
0x47cf   :  { %4945 = vmatmul.mubr.msk.bf16.vlgmr.msra.gmra.mrb[104].mxu1 %vm341_vm6, %v4101_v36 }
0x47d2   :  { %v4090_v39 = vpop.permute.xlu0 %4089 }
0x47d3   :  { %4092 = vst.msk [vmem:[#allocation5 + $0x8] sm:$0xff] %vm341_vm6, %v4090_v39 }
0x48a2   :  { %v4139_v40 = vpop.f32.mrb[104].mxu1 }
0x48a3   :  { %v4140_v12 = vadd.f32 %v6439_v28, %v4139_v40  ;;  %v4946_v8 = vpop.f32.mrb[105].mxu1 }
0x48a4   :  { %v4142_v31 = vpop.f32.mrb[106].mxu1 }
0x48a5   :  { %4145 = vst [vmem:[#allocation6 + $0x38] sm:$0xff] %v4140_v12  ;;  %v4947_v41 = vpop.f32.mrb[107].mxu1 }
0x48a6   :  { %5270 = shalt.err (!%p5267_p4)
}
0x48a7   :  { %s5271_s28 = scalar_lea.hbm %s6543_s12, 1024 }
0x48a8   :  { %p5272_p5 = scmp.ne.s32.totalorder %s6543_s12, %s5271_s28  ;;  %p5275_p6 = scmp.lt.u32.totalorder %s5271_s28, %s6543_s12 }
0x48aa   :  { %p5277_p7 = pnand %p5275_p6, %p5272_p5 }
0x48ac   :  { %5280 = shalt.err (!%p5277_p7)
}
0x48ad   :  { %s5290_s14 = smov 128   ;;  %s5291_s6 = smov 8  }
0x48ae   :  { %4157 = dma.vmem_to_hbm [thread:$0]  %s4152_s11, 1024, %s6543_s12, [#allocation7], %s5290_s14, %s5290_s14, %s5291_s6  }
0x48af   :  { %5281 = dma.done.wait [#allocation7], 1024  }
0x48b0   :  { %5282 = vsyncadd [#allocation7], 4294966272 }
0x48b1   :  { %4161 = vsyncpa [#allocation7], 1 }

</bundles_post_ra>
